<compile_context>
chip_gen: v5e
topology: v5e:2x2
jax: 0.10.0
libtpu: 0.0.40
codegen_flags: <defaults>
</compile_context>

<pallas_src>
import jax
import jax.numpy as jnp
from jax import lax
from jax.experimental import pallas as pl
from jax.experimental.pallas import tpu as pltpu

# architecture constants
C1_OC, C2_OC = 32, 64
K = 5
H1 = 14                    # 28 / stride 2
H2 = 7                     # 14 / stride 2
N_POS = H2 * H2            # 49 conv2 output positions
K2 = K * K * C1_OC         # 800 = conv2 im2col depth
FC1_OUT = 512
FC2_PAD = 128              # fc2 output padded 1 -> 128 lanes (lane-dense store)
K1_PAD = 32                # conv1 im2col depth padded 25 -> 32


def _round_up(x, m):
    return (x + m - 1) // m * m


# -------- kernel 1: conv1 (im2col matmul) + bias + LeakyReLU(0.2) --------
def _conv1_kernel(p_ref, w_ref, b_ref, o_ref):
    z = jnp.dot(p_ref[...], w_ref[...], preferred_element_type=jnp.float32)
    z = z + b_ref[...]
    z = jnp.maximum(z, 0.2 * z)                      # LeakyReLU(0.2)
    o_ref[...] = z.astype(o_ref.dtype)


# -------- kernel 2: conv2 + lrelu + fc1 + lrelu + fc2 + sigmoid (fused) --------
def _head_kernel(p2_ref, w2_ref, b2_ref, wf1_ref, bf1_ref, wf2_ref, bf2_ref,
                 o_ref, acc_ref):
    acc_ref[...] = jnp.zeros_like(acc_ref)

    def body(p, carry):
        xp = p2_ref[p]                                           # (TB, 800) bf16
        z = jnp.dot(xp, w2_ref[...], preferred_element_type=jnp.float32)
        z = z + b2_ref[...]
        z = jnp.maximum(z, 0.2 * z)                              # LeakyReLU(0.2)
        # fc1 contribution of this conv2 output position
        acc_ref[...] += jnp.dot(z.astype(jnp.bfloat16), wf1_ref[p],
                                preferred_element_type=jnp.float32)
        return carry

    lax.fori_loop(0, N_POS, body, 0)

    h = acc_ref[...] + bf1_ref[...]
    h = jnp.maximum(h, 0.2 * h)                                  # LeakyReLU(0.2)
    y = jnp.dot(h.astype(jnp.bfloat16), wf2_ref[...],
                preferred_element_type=jnp.float32) + bf2_ref[...]
    # sigmoid = 1 / (1 + exp(-y)) routed through the EUP (exp + reciprocal)
    o_ref[...] = pl.reciprocal(1.0 + jnp.exp(-y), approx=True).astype(o_ref.dtype)


def discriminator_forward(x, params, *, images_per_step=64):
    """x: (B, 1, 28, 28) f32; params in torch layouts -> (B, 1) f32."""
    cw1, cb1, cw2, cb2, fw1, fb1, fw2, fb2 = params
    B = x.shape[0]
    TB = min(images_per_step, _round_up(B, 8))
    B_pad = _round_up(B, TB)
    x = jnp.pad(x.astype(jnp.float32),
                ((0, B_pad - B), (0, 0), (0, 0), (0, 0)))

    # ---- conv1 im2col (plain-JAX data movement) ----
    # TODO(synk): patch extraction could be moved in-kernel (phase-split layout)
    # to avoid the ~6x im2col expansion of the conv2 input in HBM.
    xp = jnp.pad(x[:, 0], ((0, 0), (2, 2), (2, 2)))              # (B,32,32)
    p1 = jnp.stack([xp[:, kh:kh + 28:2, kw:kw + 28:2]
                    for kh in range(K) for kw in range(K)], axis=-1)  # (B,14,14,25)
    p1 = p1.reshape(B_pad * H1 * H1, K * K)
    p1 = jnp.pad(p1, ((0, 0), (0, K1_PAD - K * K))).astype(jnp.bfloat16)

    w1c = jnp.pad(cw1.reshape(C1_OC, K * K).T,
                  ((0, K1_PAD - K * K), (0, 0))).astype(jnp.bfloat16)   # (32,32)
    b1r = cb1.reshape(1, C1_OC).astype(jnp.float32)

    rows_per_step = 8 * H1 * H1                                  # 8 images / step
    n_rows = B_pad * H1 * H1
    h1 = pl.pallas_call(
        _conv1_kernel,
        out_shape=jax.ShapeDtypeStruct((n_rows, C1_OC), jnp.bfloat16),
        grid=(n_rows // rows_per_step,),
        in_specs=[
            pl.BlockSpec((rows_per_step, K1_PAD), lambda i: (i, 0)),
            pl.BlockSpec((K1_PAD, C1_OC), lambda i: (0, 0)),
            pl.BlockSpec((1, C1_OC), lambda i: (0, 0)),
        ],
        out_specs=pl.BlockSpec((rows_per_step, C1_OC), lambda i: (i, 0)),
        compiler_params=pltpu.CompilerParams(
            dimension_semantics=("parallel",)),
    )(p1, w1c, b1r)

    # ---- conv2 im2col on the conv1 output (plain-JAX data movement) ----
    h1m = h1.reshape(B_pad, H1, H1, C1_OC)
    h1p = jnp.pad(h1m, ((0, 0), (2, 2), (2, 2), (0, 0)))         # (B,18,18,32)
    p2 = jnp.stack([h1p[:, kh:kh + 13:2, kw:kw + 13:2, :]
                    for kh in range(K) for kw in range(K)], axis=3)   # (B,7,7,25,32)
    p2 = p2.reshape(B_pad, N_POS, K2).transpose(1, 0, 2)         # (49, B, 800)

    # weight layout plumbing (exact, done once at trace time)
    w2c = cw2.transpose(2, 3, 1, 0).reshape(K2, C2_OC).astype(jnp.bfloat16)
    b2r = cb2.reshape(1, C2_OC).astype(jnp.float32)
    # torch flatten order is c*49 + (h*7+w)  ->  wf1r[p, c, :] = fw1[:, c*49+p].T
    wf1r = fw1.reshape(FC1_OUT, C2_OC, N_POS).transpose(2, 1, 0).astype(jnp.bfloat16)
    bf1r = fb1.reshape(1, FC1_OUT).astype(jnp.float32)
    wf2r = jnp.pad(fw2.T, ((0, 0), (0, FC2_PAD - 1))).astype(jnp.bfloat16)
    bf2r = jnp.pad(fb2.reshape(1, 1), ((0, 0), (0, FC2_PAD - 1))).astype(jnp.float32)

    out = pl.pallas_call(
        _head_kernel,
        out_shape=jax.ShapeDtypeStruct((B_pad, FC2_PAD), jnp.float32),
        grid=(B_pad // TB,),
        in_specs=[
            pl.BlockSpec((N_POS, TB, K2), lambda i: (0, i, 0)),
            pl.BlockSpec((K2, C2_OC), lambda i: (0, 0)),
            pl.BlockSpec((1, C2_OC), lambda i: (0, 0)),
            pl.BlockSpec((N_POS, C2_OC, FC1_OUT), lambda i: (0, 0, 0)),
            pl.BlockSpec((1, FC1_OUT), lambda i: (0, 0)),
            pl.BlockSpec((FC1_OUT, FC2_PAD), lambda i: (0, 0)),
            pl.BlockSpec((1, FC2_PAD), lambda i: (0, 0)),
        ],
        out_specs=pl.BlockSpec((TB, FC2_PAD), lambda i: (i, 0)),
        scratch_shapes=[pltpu.VMEM((TB, FC1_OUT), jnp.float32)],
        compiler_params=pltpu.CompilerParams(
            dimension_semantics=("parallel",)),
    )(p2, w2c, b2r, wf1r, bf1r, wf2r, bf2r)

    return out[:B, :1]


def init_params(key):
    """nn.Conv2d / nn.Linear default init: U(-1/sqrt(fan_in), 1/sqrt(fan_in))."""
    ks = jax.random.split(key, 8)

    def uni(k, shape, fan_in):
        b = 1.0 / jnp.sqrt(float(fan_in))
        return jax.random.uniform(k, shape, jnp.float32, -b, b)

    cw1 = uni(ks[0], (C1_OC, 1, K, K), K * K)
    cb1 = uni(ks[1], (C1_OC,), K * K)
    cw2 = uni(ks[2], (C2_OC, C1_OC, K, K), C1_OC * K * K)
    cb2 = uni(ks[3], (C2_OC,), C1_OC * K * K)
    fw1 = uni(ks[4], (FC1_OUT, N_POS * C2_OC), N_POS * C2_OC)
    fb1 = uni(ks[5], (FC1_OUT,), N_POS * C2_OC)
    fw2 = uni(ks[6], (1, FC1_OUT), FC1_OUT)
    fb2 = uni(ks[7], (1,), FC1_OUT)
    return (cw1, cb1, cw2, cb2, fw1, fb1, fw2, fb2)


def reference_forward(x, params):
    """Pure-JAX f32 reference implementing the exact torch forward."""
    cw1, cb1, cw2, cb2, fw1, fb1, fw2, fb2 = params
    lrelu = lambda t: jnp.where(t >= 0, t, 0.2 * t)
    y = lax.conv_general_dilated(x, cw1, (2, 2), ((2, 2), (2, 2)),
                                 dimension_numbers=("NCHW", "OIHW", "NCHW"))
    y = lrelu(y + cb1[None, :, None, None])
    y = lax.conv_general_dilated(y, cw2, (2, 2), ((2, 2), (2, 2)),
                                 dimension_numbers=("NCHW", "OIHW", "NCHW"))
    y = lrelu(y + cb2[None, :, None, None])
    y = y.reshape(y.shape[0], -1)                    # NCHW flatten == torch .view
    y = lrelu(y @ fw1.T + fb1)
    return jax.nn.sigmoid(y @ fw2.T + fb2)


if __name__ == "__main__":
    key = jax.random.PRNGKey(0)
    kx, kp = jax.random.split(key)

    B = 4
    x = jax.random.uniform(kx, (B, 1, 28, 28), jnp.float32)   # fake images in [0,1]
    params = init_params(kp)

    out = jax.jit(discriminator_forward)(x, params)
    out = jax.block_until_ready(out)

    ref = reference_forward(x, params)
    assert out.shape == (B, 1), out.shape
    err = float(jnp.max(jnp.abs(out - ref)))
    assert jnp.allclose(out, ref, atol=1e-2, rtol=1e-2), f"max abs err = {err}"

    print("KERNEL_OK")
</pallas_src>

<mosaic_0001>
module attributes {stable_mosaic.version = 11 : i64} {
  func.func @_conv1_kernel(%arg0: i32, %arg1: memref<1568x32xbf16, #tpu.memory_space<vmem>>, %arg2: memref<32x32xbf16, #tpu.memory_space<vmem>>, %arg3: memref<1x32xf32, #tpu.memory_space<vmem>>, %arg4: memref<1568x32xbf16, #tpu.memory_space<vmem>>) attributes {dimension_semantics = [#tpu.dimension_semantics<parallel>], iteration_bounds = array<i64: 1>, scalar_prefetch = 0 : i64, scratch_operands = 0 : i64, tpu.core_type = #tpu.core_type<tc>, window_params = [{transform_indices = @transform_0, window_bounds = array<i64: 1568, 32>}, {pipeline_mode = #tpu.pipeline_mode<synchronous>, transform_indices = @transform_1, window_bounds = array<i64: 32, 32>}, {pipeline_mode = #tpu.pipeline_mode<synchronous>, transform_indices = @transform_2, window_bounds = array<i64: 1, 32>}, {transform_indices = @transform_3, window_bounds = array<i64: 1568, 32>}]} {
    %c0 = arith.constant 0 : index
    %c0_0 = arith.constant 0 : index
    %0 = vector.load %arg1[%c0, %c0_0] : memref<1568x32xbf16, #tpu.memory_space<vmem>>, vector<1568x32xbf16>
    %c0_1 = arith.constant 0 : index
    %c0_2 = arith.constant 0 : index
    %1 = vector.load %arg2[%c0_1, %c0_2] : memref<32x32xbf16, #tpu.memory_space<vmem>>, vector<32x32xbf16>
    %cst = arith.constant dense<0.000000e+00> : vector<1568x32xf32>
    %2 = tpu.matmul %0, %1, %cst {dimension_numbers = #tpu.dot_dimension_numbers<[1], [0], [0], [1], [0, 0, 1, 1], [], []>} : vector<1568x32xbf16>, vector<32x32xbf16>, vector<1568x32xf32> -> vector<1568x32xf32>
    %c0_3 = arith.constant 0 : index
    %c0_4 = arith.constant 0 : index
    %3 = vector.load %arg3[%c0_3, %c0_4] : memref<1x32xf32, #tpu.memory_space<vmem>>, vector<1x32xf32>
    %4 = vector.broadcast %3 : vector<1x32xf32> to vector<1568x32xf32>
    %5 = arith.addf %2, %4 : vector<1568x32xf32>
    %cst_5 = arith.constant 2.000000e-01 : f32
    %6 = vector.broadcast %cst_5 : f32 to vector<1568x32xf32>
    %7 = arith.mulf %6, %5 : vector<1568x32xf32>
    %8 = arith.maximumf %5, %7 : vector<1568x32xf32>
    %9 = arith.truncf %8 : vector<1568x32xf32> to vector<1568x32xbf16>
    %c0_6 = arith.constant 0 : index
    %c0_7 = arith.constant 0 : index
    %10 = vector.load %arg4[%c0_6, %c0_7] : memref<1568x32xbf16, #tpu.memory_space<vmem>>, vector<1568x32xbf16>
    tpu.vector_store %arg4[%c0_6, %c0_7], %9 {strides = array<i32>} : memref<1568x32xbf16, #tpu.memory_space<vmem>>, vector<1568x32xbf16>,
    return
  }
  func.func @transform_0(%arg0: i32) -> (i32, i32) {
    %c0_i32 = arith.constant 0 : i32
    %c0_i32_0 = arith.constant 0 : i32
    return %arg0, %c0_i32 : i32, i32
  }
  func.func @transform_1(%arg0: i32) -> (i32, i32) {
    %c0_i32 = arith.constant 0 : i32
    %c0_i32_0 = arith.constant 0 : i32
    %c0_i32_1 = arith.constant 0 : i32
    return %c0_i32, %c0_i32_0 : i32, i32
  }
  func.func @transform_2(%arg0: i32) -> (i32, i32) {
    %c0_i32 = arith.constant 0 : i32
    %c0_i32_0 = arith.constant 0 : i32
    %c0_i32_1 = arith.constant 0 : i32
    return %c0_i32, %c0_i32_0 : i32, i32
  }
  func.func @transform_3(%arg0: i32) -> (i32, i32) {
    %c0_i32 = arith.constant 0 : i32
    %c0_i32_0 = arith.constant 0 : i32
    return %arg0, %c0_i32 : i32, i32
  }
}

module attributes {stable_mosaic.version = 11 : i64} {
  func.func @_head_kernel(%arg0: i32, %arg1: memref<49x8x800xbf16, #tpu.memory_space<vmem>>, %arg2: memref<800x64xbf16, #tpu.memory_space<vmem>>, %arg3: memref<1x64xf32, #tpu.memory_space<vmem>>, %arg4: memref<49x64x512xbf16, #tpu.memory_space<vmem>>, %arg5: memref<1x512xf32, #tpu.memory_space<vmem>>, %arg6: memref<512x128xbf16, #tpu.memory_space<vmem>>, %arg7: memref<1x128xf32, #tpu.memory_space<vmem>>, %arg8: memref<8x128xf32, #tpu.memory_space<vmem>>, %arg9: memref<8x512xf32, #tpu.memory_space<vmem>>) attributes {dimension_semantics = [#tpu.dimension_semantics<parallel>], iteration_bounds = array<i64: 1>, scalar_prefetch = 0 : i64, scratch_operands = 1 : i64, tpu.core_type = #tpu.core_type<tc>, window_params = [{transform_indices = @transform_0, window_bounds = array<i64: 49, 8, 800>}, {pipeline_mode = #tpu.pipeline_mode<synchronous>, transform_indices = @transform_1, window_bounds = array<i64: 800, 64>}, {pipeline_mode = #tpu.pipeline_mode<synchronous>, transform_indices = @transform_2, window_bounds = array<i64: 1, 64>}, {pipeline_mode = #tpu.pipeline_mode<synchronous>, transform_indices = @transform_3, window_bounds = array<i64: 49, 64, 512>}, {pipeline_mode = #tpu.pipeline_mode<synchronous>, transform_indices = @transform_4, window_bounds = array<i64: 1, 512>}, {pipeline_mode = #tpu.pipeline_mode<synchronous>, transform_indices = @transform_5, window_bounds = array<i64: 512, 128>}, {pipeline_mode = #tpu.pipeline_mode<synchronous>, transform_indices = @transform_6, window_bounds = array<i64: 1, 128>}, {transform_indices = @transform_7, window_bounds = array<i64: 8, 128>}]} {
    %cst = arith.constant 0.000000e+00 : f32
    %0 = vector.broadcast %cst : f32 to vector<8x512xf32>
    %c0 = arith.constant 0 : index
    %c0_0 = arith.constant 0 : index
    %1 = vector.load %arg9[%c0, %c0_0] : memref<8x512xf32, #tpu.memory_space<vmem>>, vector<8x512xf32>
    tpu.vector_store %arg9[%c0, %c0_0], %0 {strides = array<i32>} : memref<8x512xf32, #tpu.memory_space<vmem>>, vector<8x512xf32>,
    %c0_i32 = arith.constant 0 : i32
    %c49_i32 = arith.constant 49 : i32
    %2 = arith.addi %c0_i32, %c49_i32 : i32
    %c1_i32 = arith.constant 1 : i32
    scf.for %arg10 = %c0_i32 to %2 step %c1_i32  : i32 {
      %23 = arith.index_cast %arg10 : i32 to index
      %c0_16 = arith.constant 0 : index
      %c0_17 = arith.constant 0 : index
      %24 = vector.load %arg1[%23, %c0_16, %c0_17] : memref<49x8x800xbf16, #tpu.memory_space<vmem>>, vector<1x8x800xbf16>
      %25 = vector.shape_cast %24 : vector<1x8x800xbf16> to vector<8x800xbf16>
      %c0_18 = arith.constant 0 : index
      %c0_19 = arith.constant 0 : index
      %26 = vector.load %arg2[%c0_18, %c0_19] : memref<800x64xbf16, #tpu.memory_space<vmem>>, vector<800x64xbf16>
      %cst_20 = arith.constant dense<0.000000e+00> : vector<8x64xf32>
      %27 = tpu.matmul %25, %26, %cst_20 {dimension_numbers = #tpu.dot_dimension_numbers<[1], [0], [0], [1], [0, 0, 1, 1], [], []>} : vector<8x800xbf16>, vector<800x64xbf16>, vector<8x64xf32> -> vector<8x64xf32>
      %c0_21 = arith.constant 0 : index
      %c0_22 = arith.constant 0 : index
      %28 = vector.load %arg3[%c0_21, %c0_22] : memref<1x64xf32, #tpu.memory_space<vmem>>, vector<1x64xf32>
      %29 = vector.broadcast %28 : vector<1x64xf32> to vector<8x64xf32>
      %30 = arith.addf %27, %29 : vector<8x64xf32>
      %cst_23 = arith.constant 2.000000e-01 : f32
      %31 = vector.broadcast %cst_23 : f32 to vector<8x64xf32>
      %32 = arith.mulf %31, %30 : vector<8x64xf32>
      %33 = arith.maximumf %30, %32 : vector<8x64xf32>
      %c0_24 = arith.constant 0 : index
      %c0_25 = arith.constant 0 : index
      %34 = vector.load %arg9[%c0_24, %c0_25] : memref<8x512xf32, #tpu.memory_space<vmem>>, vector<8x512xf32>
      %35 = arith.truncf %33 : vector<8x64xf32> to vector<8x64xbf16>
      %36 = arith.index_cast %arg10 : i32 to index
      %c0_26 = arith.constant 0 : index
      %c0_27 = arith.constant 0 : index
      %37 = vector.load %arg4[%36, %c0_26, %c0_27] : memref<49x64x512xbf16, #tpu.memory_space<vmem>>, vector<1x64x512xbf16>
      %38 = vector.shape_cast %37 : vector<1x64x512xbf16> to vector<64x512xbf16>
      %cst_28 = arith.constant dense<0.000000e+00> : vector<8x512xf32>
      %39 = tpu.matmul %35, %38, %cst_28 {dimension_numbers = #tpu.dot_dimension_numbers<[1], [0], [0], [1], [0, 0, 1, 1], [], []>} : vector<8x64xbf16>, vector<64x512xbf16>, vector<8x512xf32> -> vector<8x512xf32>
      %40 = arith.addf %34, %39 : vector<8x512xf32>
      %c0_29 = arith.constant 0 : index
      %c0_30 = arith.constant 0 : index
      %41 = vector.load %arg9[%c0_29, %c0_30] : memref<8x512xf32, #tpu.memory_space<vmem>>, vector<8x512xf32>
      tpu.vector_store %arg9[%c0_29, %c0_30], %40 {strides = array<i32>} : memref<8x512xf32, #tpu.memory_space<vmem>>, vector<8x512xf32>,
    }
    %c49_i32_1 = arith.constant 49 : i32
    %c0_2 = arith.constant 0 : index
    %c0_3 = arith.constant 0 : index
    %3 = vector.load %arg9[%c0_2, %c0_3] : memref<8x512xf32, #tpu.memory_space<vmem>>, vector<8x512xf32>
    %c0_4 = arith.constant 0 : index
    %c0_5 = arith.constant 0 : index
    %4 = vector.load %arg5[%c0_4, %c0_5] : memref<1x512xf32, #tpu.memory_space<vmem>>, vector<1x512xf32>
    %5 = vector.broadcast %4 : vector<1x512xf32> to vector<8x512xf32>
    %6 = arith.addf %3, %5 : vector<8x512xf32>
    %cst_6 = arith.constant 2.000000e-01 : f32
    %7 = vector.broadcast %cst_6 : f32 to vector<8x512xf32>
    %8 = arith.mulf %7, %6 : vector<8x512xf32>
    %9 = arith.maximumf %6, %8 : vector<8x512xf32>
    %10 = arith.truncf %9 : vector<8x512xf32> to vector<8x512xbf16>
    %c0_7 = arith.constant 0 : index
    %c0_8 = arith.constant 0 : index
    %11 = vector.load %arg6[%c0_7, %c0_8] : memref<512x128xbf16, #tpu.memory_space<vmem>>, vector<512x128xbf16>
    %cst_9 = arith.constant dense<0.000000e+00> : vector<8x128xf32>
    %12 = tpu.matmul %10, %11, %cst_9 {dimension_numbers = #tpu.dot_dimension_numbers<[1], [0], [0], [1], [0, 0, 1, 1], [], []>} : vector<8x512xbf16>, vector<512x128xbf16>, vector<8x128xf32> -> vector<8x128xf32>
    %c0_10 = arith.constant 0 : index
    %c0_11 = arith.constant 0 : index
    %13 = vector.load %arg7[%c0_10, %c0_11] : memref<1x128xf32, #tpu.memory_space<vmem>>, vector<1x128xf32>
    %14 = vector.broadcast %13 : vector<1x128xf32> to vector<8x128xf32>
    %15 = arith.addf %12, %14 : vector<8x128xf32>
    %cst_12 = arith.constant 0.000000e+00 : f32
    %16 = vector.broadcast %cst_12 : f32 to vector<8x128xf32>
    %17 = arith.subf %16, %15 : vector<8x128xf32>
    %18 = math.exp %17 : vector<8x128xf32>
    %cst_13 = arith.constant 1.000000e+00 : f32
    %19 = vector.broadcast %cst_13 : f32 to vector<8x128xf32>
    %20 = arith.addf %19, %18 : vector<8x128xf32>
    %21 = tpu.reciprocal %20 {approx = true} : vector<8x128xf32> -> vector<8x128xf32>
    %c0_14 = arith.constant 0 : index
    %c0_15 = arith.constant 0 : index
    %22 = vector.load %arg8[%c0_14, %c0_15] : memref<8x128xf32, #tpu.memory_space<vmem>>, vector<8x128xf32>
    tpu.vector_store %arg8[%c0_14, %c0_15], %21 {strides = array<i32>} : memref<8x128xf32, #tpu.memory_space<vmem>>, vector<8x128xf32>,
    return
  }
  func.func @transform_0(%arg0: i32) -> (i32, i32, i32) {
    %c0_i32 = arith.constant 0 : i32
    %c0_i32_0 = arith.constant 0 : i32
    %c0_i32_1 = arith.constant 0 : i32
    return %c0_i32, %arg0, %c0_i32_0 : i32, i32, i32
  }
  func.func @transform_1(%arg0: i32) -> (i32, i32) {
    %c0_i32 = arith.constant 0 : i32
    %c0_i32_0 = arith.constant 0 : i32
    %c0_i32_1 = arith.constant 0 : i32
    return %c0_i32, %c0_i32_0 : i32, i32
  }
  func.func @transform_2(%arg0: i32) -> (i32, i32) {
    %c0_i32 = arith.constant 0 : i32
    %c0_i32_0 = arith.constant 0 : i32
    %c0_i32_1 = arith.constant 0 : i32
    return %c0_i32, %c0_i32_0 : i32, i32
  }
  func.func @transform_3(%arg0: i32) -> (i32, i32, i32) {
    %c0_i32 = arith.constant 0 : i32
    %c0_i32_0 = arith.constant 0 : i32
    %c0_i32_1 = arith.constant 0 : i32
    %c0_i32_2 = arith.constant 0 : i32
    return %c0_i32, %c0_i32_0, %c0_i32_1 : i32, i32, i32
  }
  func.func @transform_4(%arg0: i32) -> (i32, i32) {
    %c0_i32 = arith.constant 0 : i32
    %c0_i32_0 = arith.constant 0 : i32
    %c0_i32_1 = arith.constant 0 : i32
    return %c0_i32, %c0_i32_0 : i32, i32
  }
  func.func @transform_5(%arg0: i32) -> (i32, i32) {
    %c0_i32 = arith.constant 0 : i32
    %c0_i32_0 = arith.constant 0 : i32
    %c0_i32_1 = arith.constant 0 : i32
    return %c0_i32, %c0_i32_0 : i32, i32
  }
  func.func @transform_6(%arg0: i32) -> (i32, i32) {
    %c0_i32 = arith.constant 0 : i32
    %c0_i32_0 = arith.constant 0 : i32
    %c0_i32_1 = arith.constant 0 : i32
    return %c0_i32, %c0_i32_0 : i32, i32
  }
  func.func @transform_7(%arg0: i32) -> (i32, i32) {
    %c0_i32 = arith.constant 0 : i32
    %c0_i32_0 = arith.constant 0 : i32
    return %arg0, %c0_i32 : i32, i32
  }
}

</mosaic_0001>

<bundles_post_ra>
// kernel: discriminator_forward.2
= control target key start
LH: loop header
LB: loop body
LE: loop exit
PB: predicated region body
PF: predicated region fallthrough
CT: control target
= control target key end

     0   :  { %vm721_vm0 = vcmask 261120   ;;  %vm2103_vm1 = vcmask 257024   ;;  %s4324_s1 = inlined_call_operand.vmem [shape: bf16[32,32], index: 1, kind: input, shape index: {}]   ;;  %s4325_s0 = inlined_call_operand.vmem [shape: bf16[1568,32], index: 0, kind: input, shape index: {}]   ;;  %s4326_s2 = inlined_call_operand.vmem [shape: f32[1,32], index: 2, kind: input, shape index: {}]   ;;  %s4327_s3 = inlined_call_operand.vmem [shape: bf16[1568,32], index: 3, kind: output, shape index: {}]  }
   0x1   :  { %v2901_v0 = vld [vmem:[%s4324_s1 + $0x8] sm:$0xff]  ;;  %v2900_v1 = vld [vmem:[%s4324_s1] sm:$0xff]  ;;  %v2852_v4 = vld [vmem:[%s4325_s0 + $0x190] sm:$0xff] }
   0x2   :  { %1022 = vmatpush.bf16.msra.mxu0 %v2901_v0  ;;  %2902 = vmatpush.bf16.msra.mxu1 %v2901_v0  ;;  %v2802_v2 = vld [vmem:[%s4325_s0] sm:$0xff]  ;;  %v2827_v3 = vld [vmem:[%s4325_s0 + $0xc8] sm:$0xff]  ;;  %v2877_v5 = vld [vmem:[%s4325_s0 + $0x258] sm:$0xff] }
   0x3   :  { %2903 = vmatpush.bf16.msra.mxu2 %v2901_v0  ;;  %2904 = vmatpush.bf16.msra.mxu3 %v2901_v0  ;;  %v2803_v6 = vld [vmem:[%s4325_s0 + $0x8] sm:$0xff]  ;;  %v2828_v7 = vld [vmem:[%s4325_s0 + $0xd0] sm:$0xff]  ;;  %v2853_v8 = vld [vmem:[%s4325_s0 + $0x198] sm:$0xff] }
   0x4   :  { %v2878_v9 = vld [vmem:[%s4325_s0 + $0x260] sm:$0xff]  ;;  %v2804_v10 = vld [vmem:[%s4325_s0 + $0x10] sm:$0xff]  ;;  %v2829_v11 = vld [vmem:[%s4325_s0 + $0xd8] sm:$0xff] }
   0x5   :  { %v2854_v12 = vld [vmem:[%s4325_s0 + $0x1a0] sm:$0xff]  ;;  %v2879_v13 = vld [vmem:[%s4325_s0 + $0x268] sm:$0xff]  ;;  %v2805_v14 = vld [vmem:[%s4325_s0 + $0x18] sm:$0xff] }
   0x6   :  { %1023 = vmatpush.bf16.msra.mxu0 %v2900_v1  ;;  %2905 = vmatpush.bf16.msra.mxu1 %v2900_v1  ;;  %v2830_v15 = vld [vmem:[%s4325_s0 + $0xe0] sm:$0xff]  ;;  %v2855_v16 = vld [vmem:[%s4325_s0 + $0x1a8] sm:$0xff]  ;;  %v2880_v17 = vld [vmem:[%s4325_s0 + $0x270] sm:$0xff] }
   0x7   :  { %2906 = vmatpush.bf16.msra.mxu2 %v2900_v1  ;;  %2907 = vmatpush.bf16.msra.mxu3 %v2900_v1  ;;  %v2806_v18 = vld [vmem:[%s4325_s0 + $0x20] sm:$0xff]  ;;  %v2831_v19 = vld [vmem:[%s4325_s0 + $0xe8] sm:$0xff]  ;;  %v2856_v20 = vld [vmem:[%s4325_s0 + $0x1b0] sm:$0xff] }
   0x8   :  { %v2881_v21 = vld [vmem:[%s4325_s0 + $0x278] sm:$0xff]  ;;  %v2807_v22 = vld [vmem:[%s4325_s0 + $0x28] sm:$0xff]  ;;  %v2832_v23 = vld [vmem:[%s4325_s0 + $0xf0] sm:$0xff] }
   0x9   :  { %2704 = vmatmul.msk.bf16.vlgmr.msra.gmra.mxu0 %vm721_vm0, %v2802_v2  ;;  %2729 = vmatmul.msk.bf16.vlgmr.msra.gmra.mxu1 %vm721_vm0, %v2827_v3  ;;  %v2857_v24 = vld [vmem:[%s4325_s0 + $0x1b8] sm:$0xff]  ;;  %v2882_v25 = vld [vmem:[%s4325_s0 + $0x280] sm:$0xff]  ;;  %v2808_v26 = vld [vmem:[%s4325_s0 + $0x30] sm:$0xff] }
   0xa   :  { %2754 = vmatmul.msk.bf16.vlgmr.msra.gmra.mxu2 %vm721_vm0, %v2852_v4  ;;  %2779 = vmatmul.msk.bf16.vlgmr.msra.gmra.mxu3 %vm721_vm0, %v2877_v5  ;;  %v2833_v27 = vld [vmem:[%s4325_s0 + $0xf8] sm:$0xff]  ;;  %v2858_v28 = vld [vmem:[%s4325_s0 + $0x1c0] sm:$0xff]  ;;  %v2883_v29 = vld [vmem:[%s4325_s0 + $0x288] sm:$0xff] }
   0xb   :  { %v2809_v30 = vld [vmem:[%s4325_s0 + $0x38] sm:$0xff]  ;;  %v2834_v31 = vld [vmem:[%s4325_s0 + $0x100] sm:$0xff]  ;;  %v2859_v32 = vld [vmem:[%s4325_s0 + $0x1c8] sm:$0xff] }
   0xc   :  { %v2884_v33 = vld [vmem:[%s4325_s0 + $0x290] sm:$0xff]  ;;  %v3068_v34 = vld [vmem:[%s4326_s2] ss:$0 sm:$0xff]  ;;  %v2835_v36 = vld [vmem:[%s4325_s0 + $0x108] sm:$0xff] }
   0xd   :  { %v2810_v35 = vld [vmem:[%s4325_s0 + $0x40] sm:$0xff]  ;;  %v2860_v39 = vld [vmem:[%s4325_s0 + $0x1d0] sm:$0xff]  ;;  %v2885_v40 = vld [vmem:[%s4325_s0 + $0x298] sm:$0xff] }
   0xe   :  { %v2811_v5 = vld [vmem:[%s4325_s0 + $0x48] sm:$0xff] }
  0x19   :  { %2705 = vmatmul.msk.bf16.gmra.mxu0 %vm721_vm0, %v2803_v6  ;;  %2730 = vmatmul.msk.bf16.gmra.mxu1 %vm721_vm0, %v2828_v7  ;;  %v2836_v6 = vld [vmem:[%s4325_s0 + $0x110] sm:$0xff] }
  0x1a   :  { %2755 = vmatmul.msk.bf16.gmra.mxu2 %vm721_vm0, %v2853_v8  ;;  %2780 = vmatmul.msk.bf16.gmra.mxu3 %vm721_vm0, %v2878_v9 }
  0x29   :  { %2706 = vmatmul.msk.bf16.gmra.mxu0 %vm721_vm0, %v2804_v10  ;;  %2731 = vmatmul.msk.bf16.gmra.mxu1 %vm721_vm0, %v2829_v11 }
  0x2a   :  { %2756 = vmatmul.msk.bf16.gmra.mxu2 %vm721_vm0, %v2854_v12  ;;  %2781 = vmatmul.msk.bf16.gmra.mxu3 %vm721_vm0, %v2879_v13  ;;  %v2861_v12 = vld [vmem:[%s4325_s0 + $0x1d8] sm:$0xff] }
  0x39   :  { %2707 = vmatmul.msk.bf16.gmra.mxu0 %vm721_vm0, %v2805_v14  ;;  %2732 = vmatmul.msk.bf16.gmra.mxu1 %vm721_vm0, %v2830_v15  ;;  %v2886_v14 = vld [vmem:[%s4325_s0 + $0x2a0] sm:$0xff] }
  0x3a   :  { %2757 = vmatmul.msk.bf16.gmra.mxu2 %vm721_vm0, %v2855_v16  ;;  %2782 = vmatmul.msk.bf16.gmra.mxu3 %vm721_vm0, %v2880_v17 }
  0x49   :  { %2708 = vmatmul.msk.bf16.gmra.mxu0 %vm721_vm0, %v2806_v18  ;;  %2733 = vmatmul.msk.bf16.gmra.mxu1 %vm721_vm0, %v2831_v19 }
  0x4a   :  { %2758 = vmatmul.msk.bf16.gmra.mxu2 %vm721_vm0, %v2856_v20  ;;  %2783 = vmatmul.msk.bf16.gmra.mxu3 %vm721_vm0, %v2881_v21 }
  0x59   :  { %2709 = vmatmul.msk.bf16.gmra.mxu0 %vm721_vm0, %v2807_v22  ;;  %2734 = vmatmul.msk.bf16.gmra.mxu1 %vm721_vm0, %v2832_v23 }
  0x5a   :  { %2759 = vmatmul.msk.bf16.gmra.mxu2 %vm721_vm0, %v2857_v24  ;;  %2784 = vmatmul.msk.bf16.gmra.mxu3 %vm721_vm0, %v2882_v25 }
  0x69   :  { %2710 = vmatmul.msk.bf16.gmra.mxu0 %vm721_vm0, %v2808_v26  ;;  %2735 = vmatmul.msk.bf16.gmra.mxu1 %vm721_vm0, %v2833_v27 }
  0x6a   :  { %2760 = vmatmul.msk.bf16.gmra.mxu2 %vm721_vm0, %v2858_v28  ;;  %2785 = vmatmul.msk.bf16.gmra.mxu3 %vm721_vm0, %v2883_v29 }
  0x79   :  { %2711 = vmatmul.msk.bf16.gmra.mxu0 %vm721_vm0, %v2809_v30  ;;  %2736 = vmatmul.msk.bf16.gmra.mxu1 %vm721_vm0, %v2834_v31 }
  0x7a   :  { %2761 = vmatmul.msk.bf16.gmra.mxu2 %vm721_vm0, %v2859_v32  ;;  %2786 = vmatmul.msk.bf16.gmra.mxu3 %vm721_vm0, %v2884_v33 }
  0x86   :  { %v1025_v37 = vpop.f32.mrf.mxu0  ;;  %v1150_v38 = vpop.f32.mrf.mxu1 }
  0x87   :  { %v1026_v41 = vadd.f32 %v3068_v34, %v1025_v37  ;;  %v1151_v42 = vadd.f32 %v3068_v34, %v1150_v38 }
  0x89   :  { %v1515_v43 = vmul.f32 0.2, %v1026_v41  ;;  %v1565_v44 = vmul.f32 0.2, %v1151_v42  ;;  %2712 = vmatmul.msk.bf16.gmra.mxu0 %vm721_vm0, %v2810_v35  ;;  %2737 = vmatmul.msk.bf16.gmra.mxu1 %vm721_vm0, %v2835_v36 }
  0x8a   :  { %2762 = vmatmul.msk.bf16.gmra.mxu2 %vm721_vm0, %v2860_v39  ;;  %2787 = vmatmul.msk.bf16.gmra.mxu3 %vm721_vm0, %v2885_v40 }
  0x8b   :  { %v1711_v45 = vmax.f32 %v1026_v41, %v1515_v43  ;;  %v1761_v46 = vmax.f32 %v1151_v42, %v1565_v44 }
  0x8d   :  { %v1907_v47 = vpack.c.bf16 %v1711_v45, %v1711_v45  ;;  %v1957_v48 = vpack.c.bf16 %v1761_v46, %v1761_v46  ;;  %v1275_v49 = vpop.f32.mrf.mxu2  ;;  %v1400_v50 = vpop.f32.mrf.mxu3 }
  0x8e   :  { %v1276_v51 = vadd.f32 %v3068_v34, %v1275_v49  ;;  %v1027_v52 = vpop.f32.mrf.mxu0  ;;  %v1152_v53 = vpop.f32.mrf.mxu1  ;;  %v1401_v54 = vadd.f32 %v3068_v34, %v1400_v50  ;;  %v2812_v50 = vld [vmem:[%s4325_s0 + $0x50] sm:$0xff] }
  0x8f   :  { %2104 = vst.msk [vmem:[%s4327_s3] sm:$0xf] %vm2103_vm1, %v1907_v47  ;;  %v1028_v55 = vadd.f32 %v3068_v34, %v1027_v52  ;;  %v1153_v56 = vadd.f32 %v3068_v34, %v1152_v53 }
  0x90   :  { %2154 = vst.msk [vmem:[%s4327_s3 + $0xc8] sm:$0xf] %vm2103_vm1, %v1957_v48  ;;  %v1615_v57 = vmul.f32 0.2, %v1276_v51  ;;  %v1665_v58 = vmul.f32 0.2, %v1401_v54 }
  0x91   :  { %v1516_v59 = vmul.f32 0.2, %v1028_v55  ;;  %v1566_v60 = vmul.f32 0.2, %v1153_v56 }
  0x92   :  { %v1811_v61 = vmax.f32 %v1276_v51, %v1615_v57  ;;  %v1861_v62 = vmax.f32 %v1401_v54, %v1665_v58  ;;  %v2837_v51 = vld [vmem:[%s4325_s0 + $0x118] sm:$0xff]  ;;  %v2862_v57 = vld [vmem:[%s4325_s0 + $0x1e0] sm:$0xff] }
  0x93   :  { %v1712_v63 = vmax.f32 %v1028_v55, %v1516_v59  ;;  %v1762_v0 = vmax.f32 %v1153_v56, %v1566_v60  ;;  %v2887_v59 = vld [vmem:[%s4325_s0 + $0x2a8] sm:$0xff] }
  0x94   :  { %v2007_v1 = vpack.c.bf16 %v1811_v61, %v1811_v61  ;;  %v2057_v7 = vpack.c.bf16 %v1861_v62, %v1861_v62 }
  0x95   :  { %v1908_v2 = vpack.c.bf16 %v1712_v63, %v1712_v63  ;;  %v1958_v3 = vpack.c.bf16 %v1762_v0, %v1762_v0  ;;  %v1277_v4 = vpop.f32.mrf.mxu2  ;;  %v1402_v8 = vpop.f32.mrf.mxu3 }
  0x96   :  { %2204 = vst.msk [vmem:[%s4327_s3 + $0x190] sm:$0xf] %vm2103_vm1, %v2007_v1  ;;  %v1278_v9 = vadd.f32 %v3068_v34, %v1277_v4  ;;  %v1030_v10 = vpop.f32.mrf.mxu0  ;;  %v1155_v11 = vpop.f32.mrf.mxu1  ;;  %v1403_v13 = vadd.f32 %v3068_v34, %v1402_v8 }
  0x97   :  { %2105 = vst.msk [vmem:[%s4327_s3 + $0x4] sm:$0xf] %vm2103_vm1, %v1908_v2  ;;  %v1031_v15 = vadd.f32 %v3068_v34, %v1030_v10  ;;  %v1156_v16 = vadd.f32 %v3068_v34, %v1155_v11 }
  0x98   :  { %2155 = vst.msk [vmem:[%s4327_s3 + $0xcc] sm:$0xf] %vm2103_vm1, %v1958_v3  ;;  %v1616_v17 = vmul.f32 0.2, %v1278_v9  ;;  %v1666_v18 = vmul.f32 0.2, %v1403_v13 }
  0x99   :  { %v1517_v19 = vmul.f32 0.2, %v1031_v15  ;;  %v1567_v20 = vmul.f32 0.2, %v1156_v16  ;;  %2713 = vmatmul.msk.bf16.gmra.mxu0 %vm721_vm0, %v2811_v5  ;;  %2738 = vmatmul.msk.bf16.gmra.mxu1 %vm721_vm0, %v2836_v6  ;;  %2254 = vst.msk [vmem:[%s4327_s3 + $0x258] sm:$0xf] %vm2103_vm1, %v2057_v7 }
  0x9a   :  { %v1812_v21 = vmax.f32 %v1278_v9, %v1616_v17  ;;  %2763 = vmatmul.msk.bf16.gmra.mxu2 %vm721_vm0, %v2861_v12  ;;  %v1862_v22 = vmax.f32 %v1403_v13, %v1666_v18  ;;  %2788 = vmatmul.msk.bf16.gmra.mxu3 %vm721_vm0, %v2886_v14 }
  0x9b   :  { %v1713_v23 = vmax.f32 %v1031_v15, %v1517_v19  ;;  %v1763_v24 = vmax.f32 %v1156_v16, %v1567_v20 }
  0x9c   :  { %v2008_v25 = vpack.c.bf16 %v1812_v21, %v1812_v21  ;;  %v2058_v29 = vpack.c.bf16 %v1862_v22, %v1862_v22 }
  0x9d   :  { %v1909_v26 = vpack.c.bf16 %v1713_v23, %v1713_v23  ;;  %v1959_v27 = vpack.c.bf16 %v1763_v24, %v1763_v24  ;;  %v1280_v28 = vpop.f32.mrf.mxu2  ;;  %v1405_v30 = vpop.f32.mrf.mxu3 }
  0x9e   :  { %2205 = vst.msk [vmem:[%s4327_s3 + $0x194] sm:$0xf] %vm2103_vm1, %v2008_v25  ;;  %v1281_v31 = vadd.f32 %v3068_v34, %v1280_v28  ;;  %v1032_v32 = vpop.f32.mrf.mxu0  ;;  %v1157_v33 = vpop.f32.mrf.mxu1  ;;  %v1406_v35 = vadd.f32 %v3068_v34, %v1405_v30  ;;  %v2813_v30 = vld [vmem:[%s4325_s0 + $0x58] sm:$0xff] }
  0x9f   :  { %2106 = vst.msk [vmem:[%s4327_s3 + $0x8] sm:$0xf] %vm2103_vm1, %v1909_v26  ;;  %v1033_v36 = vadd.f32 %v3068_v34, %v1032_v32  ;;  %v1158_v37 = vadd.f32 %v3068_v34, %v1157_v33 }
  0xa0   :  { %2156 = vst.msk [vmem:[%s4327_s3 + $0xd0] sm:$0xf] %vm2103_vm1, %v1959_v27  ;;  %v1617_v38 = vmul.f32 0.2, %v1281_v31  ;;  %v1667_v39 = vmul.f32 0.2, %v1406_v35 }
  0xa1   :  { %v1518_v40 = vmul.f32 0.2, %v1033_v36  ;;  %v1568_v41 = vmul.f32 0.2, %v1158_v37  ;;  %2255 = vst.msk [vmem:[%s4327_s3 + $0x25c] sm:$0xf] %vm2103_vm1, %v2058_v29 }
  0xa2   :  { %v1813_v42 = vmax.f32 %v1281_v31, %v1617_v38  ;;  %v1863_v43 = vmax.f32 %v1406_v35, %v1667_v39  ;;  %v2838_v31 = vld [vmem:[%s4325_s0 + $0x120] sm:$0xff]  ;;  %v2863_v38 = vld [vmem:[%s4325_s0 + $0x1e8] sm:$0xff] }
  0xa3   :  { %v1714_v44 = vmax.f32 %v1033_v36, %v1518_v40  ;;  %v1764_v45 = vmax.f32 %v1158_v37, %v1568_v41  ;;  %v2888_v40 = vld [vmem:[%s4325_s0 + $0x2b0] sm:$0xff] }
  0xa4   :  { %v2009_v46 = vpack.c.bf16 %v1813_v42, %v1813_v42  ;;  %v2059_v52 = vpack.c.bf16 %v1863_v43, %v1863_v43 }
  0xa5   :  { %v1910_v47 = vpack.c.bf16 %v1714_v44, %v1714_v44  ;;  %v1960_v48 = vpack.c.bf16 %v1764_v45, %v1764_v45  ;;  %v1282_v49 = vpop.f32.mrf.mxu2  ;;  %v1407_v53 = vpop.f32.mrf.mxu3 }
  0xa6   :  { %2206 = vst.msk [vmem:[%s4327_s3 + $0x198] sm:$0xf] %vm2103_vm1, %v2009_v46  ;;  %v1283_v54 = vadd.f32 %v3068_v34, %v1282_v49  ;;  %v1035_v55 = vpop.f32.mrf.mxu0  ;;  %v1160_v56 = vpop.f32.mrf.mxu1  ;;  %v1408_v58 = vadd.f32 %v3068_v34, %v1407_v53 }
  0xa7   :  { %2107 = vst.msk [vmem:[%s4327_s3 + $0xc] sm:$0xf] %vm2103_vm1, %v1910_v47  ;;  %v1036_v60 = vadd.f32 %v3068_v34, %v1035_v55  ;;  %v1161_v61 = vadd.f32 %v3068_v34, %v1160_v56 }
  0xa8   :  { %2157 = vst.msk [vmem:[%s4327_s3 + $0xd4] sm:$0xf] %vm2103_vm1, %v1960_v48  ;;  %v1618_v62 = vmul.f32 0.2, %v1283_v54  ;;  %v1668_v63 = vmul.f32 0.2, %v1408_v58 }
  0xa9   :  { %v1519_v0 = vmul.f32 0.2, %v1036_v60  ;;  %v1569_v1 = vmul.f32 0.2, %v1161_v61  ;;  %2714 = vmatmul.msk.bf16.gmra.mxu0 %vm721_vm0, %v2812_v50  ;;  %2739 = vmatmul.msk.bf16.gmra.mxu1 %vm721_vm0, %v2837_v51  ;;  %2256 = vst.msk [vmem:[%s4327_s3 + $0x260] sm:$0xf] %vm2103_vm1, %v2059_v52 }
  0xaa   :  { %v1814_v2 = vmax.f32 %v1283_v54, %v1618_v62  ;;  %2764 = vmatmul.msk.bf16.gmra.mxu2 %vm721_vm0, %v2862_v57  ;;  %v1864_v3 = vmax.f32 %v1408_v58, %v1668_v63  ;;  %2789 = vmatmul.msk.bf16.gmra.mxu3 %vm721_vm0, %v2887_v59 }
  0xab   :  { %v1715_v4 = vmax.f32 %v1036_v60, %v1519_v0  ;;  %v1765_v5 = vmax.f32 %v1161_v61, %v1569_v1 }
  0xac   :  { %v2010_v6 = vpack.c.bf16 %v1814_v2, %v1814_v2  ;;  %v2060_v10 = vpack.c.bf16 %v1864_v3, %v1864_v3 }
  0xad   :  { %v1911_v7 = vpack.c.bf16 %v1715_v4, %v1715_v4  ;;  %v1961_v8 = vpack.c.bf16 %v1765_v5, %v1765_v5  ;;  %v1285_v9 = vpop.f32.mrf.mxu2  ;;  %v1410_v11 = vpop.f32.mrf.mxu3 }
  0xae   :  { %2207 = vst.msk [vmem:[%s4327_s3 + $0x19c] sm:$0xf] %vm2103_vm1, %v2010_v6  ;;  %v1286_v12 = vadd.f32 %v3068_v34, %v1285_v9  ;;  %v1037_v13 = vpop.f32.mrf.mxu0  ;;  %v1162_v14 = vpop.f32.mrf.mxu1  ;;  %v1411_v15 = vadd.f32 %v3068_v34, %v1410_v11  ;;  %v2814_v11 = vld [vmem:[%s4325_s0 + $0x60] sm:$0xff] }
  0xaf   :  { %2108 = vst.msk [vmem:[%s4327_s3 + $0x10] sm:$0xf] %vm2103_vm1, %v1911_v7  ;;  %v1038_v16 = vadd.f32 %v3068_v34, %v1037_v13  ;;  %v1163_v17 = vadd.f32 %v3068_v34, %v1162_v14 }
  0xb0   :  { %2158 = vst.msk [vmem:[%s4327_s3 + $0xd8] sm:$0xf] %vm2103_vm1, %v1961_v8  ;;  %v1619_v18 = vmul.f32 0.2, %v1286_v12  ;;  %v1669_v19 = vmul.f32 0.2, %v1411_v15 }
  0xb1   :  { %v1520_v20 = vmul.f32 0.2, %v1038_v16  ;;  %v1570_v21 = vmul.f32 0.2, %v1163_v17  ;;  %2257 = vst.msk [vmem:[%s4327_s3 + $0x264] sm:$0xf] %vm2103_vm1, %v2060_v10 }
  0xb2   :  { %v1815_v22 = vmax.f32 %v1286_v12, %v1619_v18  ;;  %v1865_v23 = vmax.f32 %v1411_v15, %v1669_v19  ;;  %v2839_v12 = vld [vmem:[%s4325_s0 + $0x128] sm:$0xff]  ;;  %v2864_v18 = vld [vmem:[%s4325_s0 + $0x1f0] sm:$0xff] }
  0xb3   :  { %v1716_v24 = vmax.f32 %v1038_v16, %v1520_v20  ;;  %v1766_v25 = vmax.f32 %v1163_v17, %v1570_v21  ;;  %v2889_v20 = vld [vmem:[%s4325_s0 + $0x2b8] sm:$0xff] }
  0xb4   :  { %v2011_v26 = vpack.c.bf16 %v1815_v22, %v1815_v22  ;;  %v2061_v32 = vpack.c.bf16 %v1865_v23, %v1865_v23 }
  0xb5   :  { %v1912_v27 = vpack.c.bf16 %v1716_v24, %v1716_v24  ;;  %v1962_v28 = vpack.c.bf16 %v1766_v25, %v1766_v25  ;;  %v1287_v29 = vpop.f32.mrf.mxu2  ;;  %v1412_v33 = vpop.f32.mrf.mxu3 }
  0xb6   :  { %2208 = vst.msk [vmem:[%s4327_s3 + $0x1a0] sm:$0xf] %vm2103_vm1, %v2011_v26  ;;  %v1288_v35 = vadd.f32 %v3068_v34, %v1287_v29  ;;  %v1040_v36 = vpop.f32.mrf.mxu0  ;;  %v1165_v37 = vpop.f32.mrf.mxu1  ;;  %v1413_v39 = vadd.f32 %v3068_v34, %v1412_v33 }
  0xb7   :  { %2109 = vst.msk [vmem:[%s4327_s3 + $0x14] sm:$0xf] %vm2103_vm1, %v1912_v27  ;;  %v1041_v41 = vadd.f32 %v3068_v34, %v1040_v36  ;;  %v1166_v42 = vadd.f32 %v3068_v34, %v1165_v37 }
  0xb8   :  { %2159 = vst.msk [vmem:[%s4327_s3 + $0xdc] sm:$0xf] %vm2103_vm1, %v1962_v28  ;;  %v1620_v43 = vmul.f32 0.2, %v1288_v35  ;;  %v1670_v44 = vmul.f32 0.2, %v1413_v39 }
  0xb9   :  { %v1521_v45 = vmul.f32 0.2, %v1041_v41  ;;  %v1571_v46 = vmul.f32 0.2, %v1166_v42  ;;  %2715 = vmatmul.msk.bf16.gmra.mxu0 %vm721_vm0, %v2813_v30  ;;  %2740 = vmatmul.msk.bf16.gmra.mxu1 %vm721_vm0, %v2838_v31  ;;  %2258 = vst.msk [vmem:[%s4327_s3 + $0x268] sm:$0xf] %vm2103_vm1, %v2061_v32 }
  0xba   :  { %v1816_v47 = vmax.f32 %v1288_v35, %v1620_v43  ;;  %2765 = vmatmul.msk.bf16.gmra.mxu2 %vm721_vm0, %v2863_v38  ;;  %v1866_v48 = vmax.f32 %v1413_v39, %v1670_v44  ;;  %2790 = vmatmul.msk.bf16.gmra.mxu3 %vm721_vm0, %v2888_v40 }
  0xbb   :  { %v1717_v49 = vmax.f32 %v1041_v41, %v1521_v45  ;;  %v1767_v50 = vmax.f32 %v1166_v42, %v1571_v46 }
  0xbc   :  { %v2012_v51 = vpack.c.bf16 %v1816_v47, %v1816_v47  ;;  %v2062_v55 = vpack.c.bf16 %v1866_v48, %v1866_v48 }
  0xbd   :  { %v1913_v52 = vpack.c.bf16 %v1717_v49, %v1717_v49  ;;  %v1963_v53 = vpack.c.bf16 %v1767_v50, %v1767_v50  ;;  %v1290_v54 = vpop.f32.mrf.mxu2  ;;  %v1415_v56 = vpop.f32.mrf.mxu3 }
  0xbe   :  { %2209 = vst.msk [vmem:[%s4327_s3 + $0x1a4] sm:$0xf] %vm2103_vm1, %v2012_v51  ;;  %v1291_v57 = vadd.f32 %v3068_v34, %v1290_v54  ;;  %v1042_v58 = vpop.f32.mrf.mxu0  ;;  %v1167_v59 = vpop.f32.mrf.mxu1  ;;  %v1416_v60 = vadd.f32 %v3068_v34, %v1415_v56  ;;  %v2815_v56 = vld [vmem:[%s4325_s0 + $0x68] sm:$0xff] }
  0xbf   :  { %2110 = vst.msk [vmem:[%s4327_s3 + $0x18] sm:$0xf] %vm2103_vm1, %v1913_v52  ;;  %v1043_v61 = vadd.f32 %v3068_v34, %v1042_v58  ;;  %v1168_v62 = vadd.f32 %v3068_v34, %v1167_v59 }
  0xc0   :  { %2160 = vst.msk [vmem:[%s4327_s3 + $0xe0] sm:$0xf] %vm2103_vm1, %v1963_v53  ;;  %v1621_v63 = vmul.f32 0.2, %v1291_v57  ;;  %v1671_v0 = vmul.f32 0.2, %v1416_v60 }
  0xc1   :  { %v1522_v1 = vmul.f32 0.2, %v1043_v61  ;;  %v1572_v2 = vmul.f32 0.2, %v1168_v62  ;;  %2259 = vst.msk [vmem:[%s4327_s3 + $0x26c] sm:$0xf] %vm2103_vm1, %v2062_v55 }
  0xc2   :  { %v1817_v3 = vmax.f32 %v1291_v57, %v1621_v63  ;;  %v1867_v4 = vmax.f32 %v1416_v60, %v1671_v0  ;;  %v2840_v57 = vld [vmem:[%s4325_s0 + $0x130] sm:$0xff]  ;;  %v2865_v63 = vld [vmem:[%s4325_s0 + $0x1f8] sm:$0xff] }
  0xc3   :  { %v1718_v5 = vmax.f32 %v1043_v61, %v1522_v1  ;;  %v1768_v6 = vmax.f32 %v1168_v62, %v1572_v2  ;;  %v2890_v1 = vld [vmem:[%s4325_s0 + $0x2c0] sm:$0xff] }
  0xc4   :  { %v2013_v7 = vpack.c.bf16 %v1817_v3, %v1817_v3  ;;  %v2063_v13 = vpack.c.bf16 %v1867_v4, %v1867_v4 }
  0xc5   :  { %v1914_v8 = vpack.c.bf16 %v1718_v5, %v1718_v5  ;;  %v1964_v9 = vpack.c.bf16 %v1768_v6, %v1768_v6  ;;  %v1292_v10 = vpop.f32.mrf.mxu2  ;;  %v1417_v14 = vpop.f32.mrf.mxu3 }
  0xc6   :  { %2210 = vst.msk [vmem:[%s4327_s3 + $0x1a8] sm:$0xf] %vm2103_vm1, %v2013_v7  ;;  %v1293_v15 = vadd.f32 %v3068_v34, %v1292_v10  ;;  %v1045_v16 = vpop.f32.mrf.mxu0  ;;  %v1170_v17 = vpop.f32.mrf.mxu1  ;;  %v1418_v19 = vadd.f32 %v3068_v34, %v1417_v14 }
  0xc7   :  { %2111 = vst.msk [vmem:[%s4327_s3 + $0x1c] sm:$0xf] %vm2103_vm1, %v1914_v8  ;;  %v1046_v21 = vadd.f32 %v3068_v34, %v1045_v16  ;;  %v1171_v22 = vadd.f32 %v3068_v34, %v1170_v17 }
  0xc8   :  { %2161 = vst.msk [vmem:[%s4327_s3 + $0xe4] sm:$0xf] %vm2103_vm1, %v1964_v9  ;;  %v1622_v23 = vmul.f32 0.2, %v1293_v15  ;;  %v1672_v24 = vmul.f32 0.2, %v1418_v19 }
  0xc9   :  { %v1523_v25 = vmul.f32 0.2, %v1046_v21  ;;  %v1573_v26 = vmul.f32 0.2, %v1171_v22  ;;  %2716 = vmatmul.msk.bf16.gmra.mxu0 %vm721_vm0, %v2814_v11  ;;  %2741 = vmatmul.msk.bf16.gmra.mxu1 %vm721_vm0, %v2839_v12  ;;  %2260 = vst.msk [vmem:[%s4327_s3 + $0x270] sm:$0xf] %vm2103_vm1, %v2063_v13 }
  0xca   :  { %v1818_v27 = vmax.f32 %v1293_v15, %v1622_v23  ;;  %2766 = vmatmul.msk.bf16.gmra.mxu2 %vm721_vm0, %v2864_v18  ;;  %v1868_v28 = vmax.f32 %v1418_v19, %v1672_v24  ;;  %2791 = vmatmul.msk.bf16.gmra.mxu3 %vm721_vm0, %v2889_v20 }
  0xcb   :  { %v1719_v29 = vmax.f32 %v1046_v21, %v1523_v25  ;;  %v1769_v30 = vmax.f32 %v1171_v22, %v1573_v26 }
  0xcc   :  { %v2014_v31 = vpack.c.bf16 %v1818_v27, %v1818_v27  ;;  %v2064_v36 = vpack.c.bf16 %v1868_v28, %v1868_v28 }
  0xcd   :  { %v1915_v32 = vpack.c.bf16 %v1719_v29, %v1719_v29  ;;  %v1965_v33 = vpack.c.bf16 %v1769_v30, %v1769_v30  ;;  %v1295_v35 = vpop.f32.mrf.mxu2  ;;  %v1420_v37 = vpop.f32.mrf.mxu3 }
  0xce   :  { %2211 = vst.msk [vmem:[%s4327_s3 + $0x1ac] sm:$0xf] %vm2103_vm1, %v2014_v31  ;;  %v1296_v38 = vadd.f32 %v3068_v34, %v1295_v35  ;;  %v1047_v39 = vpop.f32.mrf.mxu0  ;;  %v1172_v40 = vpop.f32.mrf.mxu1  ;;  %v1421_v41 = vadd.f32 %v3068_v34, %v1420_v37  ;;  %v2816_v37 = vld [vmem:[%s4325_s0 + $0x70] sm:$0xff] }
  0xcf   :  { %2112 = vst.msk [vmem:[%s4327_s3 + $0x20] sm:$0xf] %vm2103_vm1, %v1915_v32  ;;  %v1048_v42 = vadd.f32 %v3068_v34, %v1047_v39  ;;  %v1173_v43 = vadd.f32 %v3068_v34, %v1172_v40 }
  0xd0   :  { %2162 = vst.msk [vmem:[%s4327_s3 + $0xe8] sm:$0xf] %vm2103_vm1, %v1965_v33  ;;  %v1623_v44 = vmul.f32 0.2, %v1296_v38  ;;  %v1673_v45 = vmul.f32 0.2, %v1421_v41 }
  0xd1   :  { %v1524_v46 = vmul.f32 0.2, %v1048_v42  ;;  %v1574_v47 = vmul.f32 0.2, %v1173_v43  ;;  %2261 = vst.msk [vmem:[%s4327_s3 + $0x274] sm:$0xf] %vm2103_vm1, %v2064_v36 }
  0xd2   :  { %v1819_v48 = vmax.f32 %v1296_v38, %v1623_v44  ;;  %v1869_v49 = vmax.f32 %v1421_v41, %v1673_v45  ;;  %v2841_v38 = vld [vmem:[%s4325_s0 + $0x138] sm:$0xff]  ;;  %v2866_v44 = vld [vmem:[%s4325_s0 + $0x200] sm:$0xff] }
  0xd3   :  { %v1720_v50 = vmax.f32 %v1048_v42, %v1524_v46  ;;  %v1770_v51 = vmax.f32 %v1173_v43, %v1574_v47  ;;  %v2891_v46 = vld [vmem:[%s4325_s0 + $0x2c8] sm:$0xff] }
  0xd4   :  { %v2015_v52 = vpack.c.bf16 %v1819_v48, %v1819_v48  ;;  %v2065_v58 = vpack.c.bf16 %v1869_v49, %v1869_v49 }
  0xd5   :  { %v1916_v53 = vpack.c.bf16 %v1720_v50, %v1720_v50  ;;  %v1966_v54 = vpack.c.bf16 %v1770_v51, %v1770_v51  ;;  %v1297_v55 = vpop.f32.mrf.mxu2  ;;  %v1422_v59 = vpop.f32.mrf.mxu3 }
  0xd6   :  { %2212 = vst.msk [vmem:[%s4327_s3 + $0x1b0] sm:$0xf] %vm2103_vm1, %v2015_v52  ;;  %v1298_v60 = vadd.f32 %v3068_v34, %v1297_v55  ;;  %v1050_v61 = vpop.f32.mrf.mxu0  ;;  %v1175_v62 = vpop.f32.mrf.mxu1  ;;  %v1423_v0 = vadd.f32 %v3068_v34, %v1422_v59 }
  0xd7   :  { %2113 = vst.msk [vmem:[%s4327_s3 + $0x24] sm:$0xf] %vm2103_vm1, %v1916_v53  ;;  %v1051_v2 = vadd.f32 %v3068_v34, %v1050_v61  ;;  %v1176_v3 = vadd.f32 %v3068_v34, %v1175_v62 }
  0xd8   :  { %2163 = vst.msk [vmem:[%s4327_s3 + $0xec] sm:$0xf] %vm2103_vm1, %v1966_v54  ;;  %v1624_v4 = vmul.f32 0.2, %v1298_v60  ;;  %v1674_v5 = vmul.f32 0.2, %v1423_v0 }
  0xd9   :  { %v1525_v6 = vmul.f32 0.2, %v1051_v2  ;;  %v1575_v7 = vmul.f32 0.2, %v1176_v3  ;;  %2717 = vmatmul.msk.bf16.gmra.mxu0 %vm721_vm0, %v2815_v56  ;;  %2742 = vmatmul.msk.bf16.gmra.mxu1 %vm721_vm0, %v2840_v57  ;;  %2262 = vst.msk [vmem:[%s4327_s3 + $0x278] sm:$0xf] %vm2103_vm1, %v2065_v58 }
  0xda   :  { %v1820_v8 = vmax.f32 %v1298_v60, %v1624_v4  ;;  %2767 = vmatmul.msk.bf16.gmra.mxu2 %vm721_vm0, %v2865_v63  ;;  %v1870_v9 = vmax.f32 %v1423_v0, %v1674_v5  ;;  %2792 = vmatmul.msk.bf16.gmra.mxu3 %vm721_vm0, %v2890_v1 }
  0xdb   :  { %v1721_v10 = vmax.f32 %v1051_v2, %v1525_v6  ;;  %v1771_v11 = vmax.f32 %v1176_v3, %v1575_v7 }
  0xdc   :  { %v2016_v12 = vpack.c.bf16 %v1820_v8, %v1820_v8  ;;  %v2066_v16 = vpack.c.bf16 %v1870_v9, %v1870_v9 }
  0xdd   :  { %v1917_v13 = vpack.c.bf16 %v1721_v10, %v1721_v10  ;;  %v1967_v14 = vpack.c.bf16 %v1771_v11, %v1771_v11  ;;  %v1300_v15 = vpop.f32.mrf.mxu2  ;;  %v1425_v17 = vpop.f32.mrf.mxu3 }
  0xde   :  { %2213 = vst.msk [vmem:[%s4327_s3 + $0x1b4] sm:$0xf] %vm2103_vm1, %v2016_v12  ;;  %v1301_v18 = vadd.f32 %v3068_v34, %v1300_v15  ;;  %v1052_v19 = vpop.f32.mrf.mxu0  ;;  %v1177_v20 = vpop.f32.mrf.mxu1  ;;  %v1426_v21 = vadd.f32 %v3068_v34, %v1425_v17  ;;  %v2817_v17 = vld [vmem:[%s4325_s0 + $0x78] sm:$0xff] }
  0xdf   :  { %2114 = vst.msk [vmem:[%s4327_s3 + $0x28] sm:$0xf] %vm2103_vm1, %v1917_v13  ;;  %v1053_v22 = vadd.f32 %v3068_v34, %v1052_v19  ;;  %v1178_v23 = vadd.f32 %v3068_v34, %v1177_v20 }
  0xe0   :  { %2164 = vst.msk [vmem:[%s4327_s3 + $0xf0] sm:$0xf] %vm2103_vm1, %v1967_v14  ;;  %v1625_v24 = vmul.f32 0.2, %v1301_v18  ;;  %v1675_v25 = vmul.f32 0.2, %v1426_v21 }
  0xe1   :  { %v1526_v26 = vmul.f32 0.2, %v1053_v22  ;;  %v1576_v27 = vmul.f32 0.2, %v1178_v23  ;;  %2263 = vst.msk [vmem:[%s4327_s3 + $0x27c] sm:$0xf] %vm2103_vm1, %v2066_v16 }
  0xe2   :  { %v1821_v28 = vmax.f32 %v1301_v18, %v1625_v24  ;;  %v1871_v29 = vmax.f32 %v1426_v21, %v1675_v25  ;;  %v2842_v18 = vld [vmem:[%s4325_s0 + $0x140] sm:$0xff]  ;;  %v2867_v24 = vld [vmem:[%s4325_s0 + $0x208] sm:$0xff] }
  0xe3   :  { %v1722_v30 = vmax.f32 %v1053_v22, %v1526_v26  ;;  %v1772_v31 = vmax.f32 %v1178_v23, %v1576_v27  ;;  %v2892_v26 = vld [vmem:[%s4325_s0 + $0x2d0] sm:$0xff] }
  0xe4   :  { %v2017_v32 = vpack.c.bf16 %v1821_v28, %v1821_v28  ;;  %v2067_v39 = vpack.c.bf16 %v1871_v29, %v1871_v29 }
  0xe5   :  { %v1918_v33 = vpack.c.bf16 %v1722_v30, %v1722_v30  ;;  %v1968_v35 = vpack.c.bf16 %v1772_v31, %v1772_v31  ;;  %v1302_v36 = vpop.f32.mrf.mxu2  ;;  %v1427_v40 = vpop.f32.mrf.mxu3 }
  0xe6   :  { %2214 = vst.msk [vmem:[%s4327_s3 + $0x1b8] sm:$0xf] %vm2103_vm1, %v2017_v32  ;;  %v1303_v41 = vadd.f32 %v3068_v34, %v1302_v36  ;;  %v1055_v42 = vpop.f32.mrf.mxu0  ;;  %v1180_v43 = vpop.f32.mrf.mxu1  ;;  %v1428_v45 = vadd.f32 %v3068_v34, %v1427_v40 }
  0xe7   :  { %2115 = vst.msk [vmem:[%s4327_s3 + $0x2c] sm:$0xf] %vm2103_vm1, %v1918_v33  ;;  %v1056_v47 = vadd.f32 %v3068_v34, %v1055_v42  ;;  %v1181_v48 = vadd.f32 %v3068_v34, %v1180_v43 }
  0xe8   :  { %2165 = vst.msk [vmem:[%s4327_s3 + $0xf4] sm:$0xf] %vm2103_vm1, %v1968_v35  ;;  %v1626_v49 = vmul.f32 0.2, %v1303_v41  ;;  %v1676_v50 = vmul.f32 0.2, %v1428_v45 }
  0xe9   :  { %v1527_v51 = vmul.f32 0.2, %v1056_v47  ;;  %v1577_v52 = vmul.f32 0.2, %v1181_v48  ;;  %2718 = vmatmul.msk.bf16.gmra.mxu0 %vm721_vm0, %v2816_v37  ;;  %2743 = vmatmul.msk.bf16.gmra.mxu1 %vm721_vm0, %v2841_v38  ;;  %2264 = vst.msk [vmem:[%s4327_s3 + $0x280] sm:$0xf] %vm2103_vm1, %v2067_v39 }
  0xea   :  { %v1822_v53 = vmax.f32 %v1303_v41, %v1626_v49  ;;  %2768 = vmatmul.msk.bf16.gmra.mxu2 %vm721_vm0, %v2866_v44  ;;  %v1872_v54 = vmax.f32 %v1428_v45, %v1676_v50  ;;  %2793 = vmatmul.msk.bf16.gmra.mxu3 %vm721_vm0, %v2891_v46 }
  0xeb   :  { %v1723_v55 = vmax.f32 %v1056_v47, %v1527_v51  ;;  %v1773_v56 = vmax.f32 %v1181_v48, %v1577_v52 }
  0xec   :  { %v2018_v57 = vpack.c.bf16 %v1822_v53, %v1822_v53  ;;  %v2068_v61 = vpack.c.bf16 %v1872_v54, %v1872_v54 }
  0xed   :  { %v1919_v58 = vpack.c.bf16 %v1723_v55, %v1723_v55  ;;  %v1969_v59 = vpack.c.bf16 %v1773_v56, %v1773_v56  ;;  %v1305_v60 = vpop.f32.mrf.mxu2  ;;  %v1430_v62 = vpop.f32.mrf.mxu3 }
  0xee   :  { %2215 = vst.msk [vmem:[%s4327_s3 + $0x1bc] sm:$0xf] %vm2103_vm1, %v2018_v57  ;;  %v1306_v63 = vadd.f32 %v3068_v34, %v1305_v60  ;;  %v1057_v0 = vpop.f32.mrf.mxu0  ;;  %v1182_v1 = vpop.f32.mrf.mxu1  ;;  %v1431_v2 = vadd.f32 %v3068_v34, %v1430_v62  ;;  %v2818_v62 = vld [vmem:[%s4325_s0 + $0x80] sm:$0xff] }
  0xef   :  { %2116 = vst.msk [vmem:[%s4327_s3 + $0x30] sm:$0xf] %vm2103_vm1, %v1919_v58  ;;  %v1058_v3 = vadd.f32 %v3068_v34, %v1057_v0  ;;  %v1183_v4 = vadd.f32 %v3068_v34, %v1182_v1 }
  0xf0   :  { %2166 = vst.msk [vmem:[%s4327_s3 + $0xf8] sm:$0xf] %vm2103_vm1, %v1969_v59  ;;  %v1627_v5 = vmul.f32 0.2, %v1306_v63  ;;  %v1677_v6 = vmul.f32 0.2, %v1431_v2 }
  0xf1   :  { %v1528_v7 = vmul.f32 0.2, %v1058_v3  ;;  %v1578_v8 = vmul.f32 0.2, %v1183_v4  ;;  %2265 = vst.msk [vmem:[%s4327_s3 + $0x284] sm:$0xf] %vm2103_vm1, %v2068_v61 }
  0xf2   :  { %v1823_v9 = vmax.f32 %v1306_v63, %v1627_v5  ;;  %v1873_v10 = vmax.f32 %v1431_v2, %v1677_v6  ;;  %v2843_v63 = vld [vmem:[%s4325_s0 + $0x148] sm:$0xff]  ;;  %v2868_v5 = vld [vmem:[%s4325_s0 + $0x210] sm:$0xff] }
  0xf3   :  { %v1724_v11 = vmax.f32 %v1058_v3, %v1528_v7  ;;  %v1774_v12 = vmax.f32 %v1183_v4, %v1578_v8  ;;  %v2893_v7 = vld [vmem:[%s4325_s0 + $0x2d8] sm:$0xff] }
  0xf4   :  { %v2019_v13 = vpack.c.bf16 %v1823_v9, %v1823_v9  ;;  %v2069_v19 = vpack.c.bf16 %v1873_v10, %v1873_v10 }
  0xf5   :  { %v1920_v14 = vpack.c.bf16 %v1724_v11, %v1724_v11  ;;  %v1970_v15 = vpack.c.bf16 %v1774_v12, %v1774_v12  ;;  %v1307_v16 = vpop.f32.mrf.mxu2  ;;  %v1432_v20 = vpop.f32.mrf.mxu3 }
  0xf6   :  { %2216 = vst.msk [vmem:[%s4327_s3 + $0x1c0] sm:$0xf] %vm2103_vm1, %v2019_v13  ;;  %v1308_v21 = vadd.f32 %v3068_v34, %v1307_v16  ;;  %v1060_v22 = vpop.f32.mrf.mxu0  ;;  %v1185_v23 = vpop.f32.mrf.mxu1  ;;  %v1433_v25 = vadd.f32 %v3068_v34, %v1432_v20 }
  0xf7   :  { %2117 = vst.msk [vmem:[%s4327_s3 + $0x34] sm:$0xf] %vm2103_vm1, %v1920_v14  ;;  %v1061_v27 = vadd.f32 %v3068_v34, %v1060_v22  ;;  %v1186_v28 = vadd.f32 %v3068_v34, %v1185_v23 }
  0xf8   :  { %2167 = vst.msk [vmem:[%s4327_s3 + $0xfc] sm:$0xf] %vm2103_vm1, %v1970_v15  ;;  %v1628_v29 = vmul.f32 0.2, %v1308_v21  ;;  %v1678_v30 = vmul.f32 0.2, %v1433_v25 }
  0xf9   :  { %v1529_v31 = vmul.f32 0.2, %v1061_v27  ;;  %v1579_v32 = vmul.f32 0.2, %v1186_v28  ;;  %2719 = vmatmul.msk.bf16.gmra.mxu0 %vm721_vm0, %v2817_v17  ;;  %2744 = vmatmul.msk.bf16.gmra.mxu1 %vm721_vm0, %v2842_v18  ;;  %2266 = vst.msk [vmem:[%s4327_s3 + $0x288] sm:$0xf] %vm2103_vm1, %v2069_v19 }
  0xfa   :  { %v1824_v33 = vmax.f32 %v1308_v21, %v1628_v29  ;;  %2769 = vmatmul.msk.bf16.gmra.mxu2 %vm721_vm0, %v2867_v24  ;;  %v1874_v35 = vmax.f32 %v1433_v25, %v1678_v30  ;;  %2794 = vmatmul.msk.bf16.gmra.mxu3 %vm721_vm0, %v2892_v26 }
  0xfb   :  { %v1725_v36 = vmax.f32 %v1061_v27, %v1529_v31  ;;  %v1775_v37 = vmax.f32 %v1186_v28, %v1579_v32 }
  0xfc   :  { %v2020_v38 = vpack.c.bf16 %v1824_v33, %v1824_v33  ;;  %v2070_v42 = vpack.c.bf16 %v1874_v35, %v1874_v35 }
  0xfd   :  { %v1921_v39 = vpack.c.bf16 %v1725_v36, %v1725_v36  ;;  %v1971_v40 = vpack.c.bf16 %v1775_v37, %v1775_v37  ;;  %v1310_v41 = vpop.f32.mrf.mxu2  ;;  %v1435_v43 = vpop.f32.mrf.mxu3 }
  0xfe   :  { %2217 = vst.msk [vmem:[%s4327_s3 + $0x1c4] sm:$0xf] %vm2103_vm1, %v2020_v38  ;;  %v1311_v44 = vadd.f32 %v3068_v34, %v1310_v41  ;;  %v1062_v45 = vpop.f32.mrf.mxu0  ;;  %v1187_v46 = vpop.f32.mrf.mxu1  ;;  %v1436_v47 = vadd.f32 %v3068_v34, %v1435_v43  ;;  %v2819_v43 = vld [vmem:[%s4325_s0 + $0x88] sm:$0xff] }
  0xff   :  { %2118 = vst.msk [vmem:[%s4327_s3 + $0x38] sm:$0xf] %vm2103_vm1, %v1921_v39  ;;  %v1063_v48 = vadd.f32 %v3068_v34, %v1062_v45  ;;  %v1188_v49 = vadd.f32 %v3068_v34, %v1187_v46 }
 0x100   :  { %2168 = vst.msk [vmem:[%s4327_s3 + $0x100] sm:$0xf] %vm2103_vm1, %v1971_v40  ;;  %v1629_v50 = vmul.f32 0.2, %v1311_v44  ;;  %v1679_v51 = vmul.f32 0.2, %v1436_v47 }
 0x101   :  { %v1530_v52 = vmul.f32 0.2, %v1063_v48  ;;  %v1580_v53 = vmul.f32 0.2, %v1188_v49  ;;  %2267 = vst.msk [vmem:[%s4327_s3 + $0x28c] sm:$0xf] %vm2103_vm1, %v2070_v42 }
 0x102   :  { %v1825_v54 = vmax.f32 %v1311_v44, %v1629_v50  ;;  %v1875_v55 = vmax.f32 %v1436_v47, %v1679_v51  ;;  %v2844_v44 = vld [vmem:[%s4325_s0 + $0x150] sm:$0xff]  ;;  %v2869_v50 = vld [vmem:[%s4325_s0 + $0x218] sm:$0xff] }
 0x103   :  { %v1726_v56 = vmax.f32 %v1063_v48, %v1530_v52  ;;  %v1776_v57 = vmax.f32 %v1188_v49, %v1580_v53  ;;  %v2894_v52 = vld [vmem:[%s4325_s0 + $0x2e0] sm:$0xff] }
 0x104   :  { %v2021_v58 = vpack.c.bf16 %v1825_v54, %v1825_v54  ;;  %v2071_v0 = vpack.c.bf16 %v1875_v55, %v1875_v55 }
 0x105   :  { %v1922_v59 = vpack.c.bf16 %v1726_v56, %v1726_v56  ;;  %v1972_v60 = vpack.c.bf16 %v1776_v57, %v1776_v57  ;;  %v1312_v61 = vpop.f32.mrf.mxu2  ;;  %v1437_v1 = vpop.f32.mrf.mxu3 }
 0x106   :  { %2218 = vst.msk [vmem:[%s4327_s3 + $0x1c8] sm:$0xf] %vm2103_vm1, %v2021_v58  ;;  %v1313_v2 = vadd.f32 %v3068_v34, %v1312_v61  ;;  %v1065_v3 = vpop.f32.mrf.mxu0  ;;  %v1190_v4 = vpop.f32.mrf.mxu1  ;;  %v1438_v6 = vadd.f32 %v3068_v34, %v1437_v1 }
 0x107   :  { %2119 = vst.msk [vmem:[%s4327_s3 + $0x3c] sm:$0xf] %vm2103_vm1, %v1922_v59  ;;  %v1066_v8 = vadd.f32 %v3068_v34, %v1065_v3  ;;  %v1191_v9 = vadd.f32 %v3068_v34, %v1190_v4  ;;  %v3591_v4 = vld [vmem:[%s4326_s2] ss:$0 sm:$0xff] }
 0x108   :  { %2169 = vst.msk [vmem:[%s4327_s3 + $0x104] sm:$0xf] %vm2103_vm1, %v1972_v60  ;;  %v1630_v10 = vmul.f32 0.2, %v1313_v2  ;;  %v1680_v11 = vmul.f32 0.2, %v1438_v6 }
 0x109   :  { %v1531_v12 = vmul.f32 0.2, %v1066_v8  ;;  %v1581_v13 = vmul.f32 0.2, %v1191_v9  ;;  %2720 = vmatmul.msk.bf16.gmra.mxu0 %vm721_vm0, %v2818_v62  ;;  %2745 = vmatmul.msk.bf16.gmra.mxu1 %vm721_vm0, %v2843_v63  ;;  %2268 = vst.msk [vmem:[%s4327_s3 + $0x290] sm:$0xf] %vm2103_vm1, %v2071_v0 }
 0x10a   :  { %v1826_v14 = vmax.f32 %v1313_v2, %v1630_v10  ;;  %2770 = vmatmul.msk.bf16.gmra.mxu2 %vm721_vm0, %v2868_v5  ;;  %v1876_v15 = vmax.f32 %v1438_v6, %v1680_v11  ;;  %2795 = vmatmul.msk.bf16.gmra.mxu3 %vm721_vm0, %v2893_v7 }
 0x10b   :  { %v1727_v16 = vmax.f32 %v1066_v8, %v1531_v12  ;;  %v1777_v17 = vmax.f32 %v1191_v9, %v1581_v13 }
 0x10c   :  { %v2022_v18 = vpack.c.bf16 %v1826_v14, %v1826_v14  ;;  %v2072_v22 = vpack.c.bf16 %v1876_v15, %v1876_v15 }
 0x10d   :  { %v1923_v19 = vpack.c.bf16 %v1727_v16, %v1727_v16  ;;  %v1973_v20 = vpack.c.bf16 %v1777_v17, %v1777_v17  ;;  %v1315_v21 = vpop.f32.mrf.mxu2  ;;  %v1440_v23 = vpop.f32.mrf.mxu3 }
 0x10e   :  { %2219 = vst.msk [vmem:[%s4327_s3 + $0x1cc] sm:$0xf] %vm2103_vm1, %v2022_v18  ;;  %v1316_v24 = vadd.f32 %v3068_v34, %v1315_v21  ;;  %v1067_v25 = vpop.f32.mrf.mxu0  ;;  %v1192_v26 = vpop.f32.mrf.mxu1  ;;  %v1441_v27 = vadd.f32 %v3068_v34, %v1440_v23  ;;  %v2820_v23 = vld [vmem:[%s4325_s0 + $0x90] sm:$0xff] }
 0x10f   :  { %2120 = vst.msk [vmem:[%s4327_s3 + $0x40] sm:$0xf] %vm2103_vm1, %v1923_v19  ;;  %v1068_v28 = vadd.f32 %v3068_v34, %v1067_v25  ;;  %v1193_v29 = vadd.f32 %v3068_v34, %v1192_v26 }
 0x110   :  { %2170 = vst.msk [vmem:[%s4327_s3 + $0x108] sm:$0xf] %vm2103_vm1, %v1973_v20  ;;  %v1631_v30 = vmul.f32 0.2, %v1316_v24  ;;  %v1681_v31 = vmul.f32 0.2, %v1441_v27 }
 0x111   :  { %v1532_v32 = vmul.f32 0.2, %v1068_v28  ;;  %v1582_v33 = vmul.f32 0.2, %v1193_v29  ;;  %2269 = vst.msk [vmem:[%s4327_s3 + $0x294] sm:$0xf] %vm2103_vm1, %v2072_v22 }
 0x112   :  { %v1827_v35 = vmax.f32 %v1316_v24, %v1631_v30  ;;  %v1877_v36 = vmax.f32 %v1441_v27, %v1681_v31  ;;  %v2845_v24 = vld [vmem:[%s4325_s0 + $0x158] sm:$0xff]  ;;  %v2870_v30 = vld [vmem:[%s4325_s0 + $0x220] sm:$0xff] }
 0x113   :  { %v1728_v37 = vmax.f32 %v1068_v28, %v1532_v32  ;;  %v1778_v38 = vmax.f32 %v1193_v29, %v1582_v33  ;;  %v2895_v32 = vld [vmem:[%s4325_s0 + $0x2e8] sm:$0xff] }
 0x114   :  { %v2023_v39 = vpack.c.bf16 %v1827_v35, %v1827_v35  ;;  %v2073_v45 = vpack.c.bf16 %v1877_v36, %v1877_v36 }
 0x115   :  { %v1924_v40 = vpack.c.bf16 %v1728_v37, %v1728_v37  ;;  %v1974_v41 = vpack.c.bf16 %v1778_v38, %v1778_v38  ;;  %v1317_v42 = vpop.f32.mrf.mxu2  ;;  %v1442_v46 = vpop.f32.mrf.mxu3 }
 0x116   :  { %2220 = vst.msk [vmem:[%s4327_s3 + $0x1d0] sm:$0xf] %vm2103_vm1, %v2023_v39  ;;  %v1318_v47 = vadd.f32 %v3068_v34, %v1317_v42  ;;  %v1070_v48 = vpop.f32.mrf.mxu0  ;;  %v1195_v49 = vpop.f32.mrf.mxu1  ;;  %v1443_v51 = vadd.f32 %v3068_v34, %v1442_v46 }
 0x117   :  { %2121 = vst.msk [vmem:[%s4327_s3 + $0x44] sm:$0xf] %vm2103_vm1, %v1924_v40  ;;  %v1071_v53 = vadd.f32 %v3068_v34, %v1070_v48  ;;  %v1196_v54 = vadd.f32 %v3068_v34, %v1195_v49 }
 0x118   :  { %2171 = vst.msk [vmem:[%s4327_s3 + $0x10c] sm:$0xf] %vm2103_vm1, %v1974_v41  ;;  %v1632_v55 = vmul.f32 0.2, %v1318_v47  ;;  %v1682_v56 = vmul.f32 0.2, %v1443_v51 }
 0x119   :  { %v1533_v57 = vmul.f32 0.2, %v1071_v53  ;;  %v1583_v58 = vmul.f32 0.2, %v1196_v54  ;;  %2721 = vmatmul.msk.bf16.gmra.mxu0 %vm721_vm0, %v2819_v43  ;;  %2746 = vmatmul.msk.bf16.gmra.mxu1 %vm721_vm0, %v2844_v44  ;;  %2270 = vst.msk [vmem:[%s4327_s3 + $0x298] sm:$0xf] %vm2103_vm1, %v2073_v45 }
 0x11a   :  { %v1828_v59 = vmax.f32 %v1318_v47, %v1632_v55  ;;  %2771 = vmatmul.msk.bf16.gmra.mxu2 %vm721_vm0, %v2869_v50  ;;  %v1878_v34 = vmax.f32 %v1443_v51, %v1682_v56  ;;  %2796 = vmatmul.msk.bf16.gmra.mxu3 %vm721_vm0, %v2894_v52 }
 0x11b   :  { %v1729_v60 = vmax.f32 %v1071_v53, %v1533_v57  ;;  %v1779_v61 = vmax.f32 %v1196_v54, %v1583_v58 }
 0x11c   :  { %v2024_v62 = vpack.c.bf16 %v1828_v59, %v1828_v59  ;;  %v2074_v2 = vpack.c.bf16 %v1878_v34, %v1878_v34 }
 0x11d   :  { %v1925_v63 = vpack.c.bf16 %v1729_v60, %v1729_v60  ;;  %v1975_v0 = vpack.c.bf16 %v1779_v61, %v1779_v61  ;;  %v1320_v1 = vpop.f32.mrf.mxu2  ;;  %v1445_v3 = vpop.f32.mrf.mxu3 }
 0x11e   :  { %2221 = vst.msk [vmem:[%s4327_s3 + $0x1d4] sm:$0xf] %vm2103_vm1, %v2024_v62  ;;  %v1321_v5 = vadd.f32 %v3591_v4, %v1320_v1  ;;  %v1072_v6 = vpop.f32.mrf.mxu0  ;;  %v1197_v7 = vpop.f32.mrf.mxu1  ;;  %v1446_v8 = vadd.f32 %v3591_v4, %v1445_v3  ;;  %v2821_v3 = vld [vmem:[%s4325_s0 + $0x98] sm:$0xff] }
 0x11f   :  { %2122 = vst.msk [vmem:[%s4327_s3 + $0x48] sm:$0xf] %vm2103_vm1, %v1925_v63  ;;  %v1073_v9 = vadd.f32 %v3591_v4, %v1072_v6  ;;  %v1198_v10 = vadd.f32 %v3591_v4, %v1197_v7 }
 0x120   :  { %2172 = vst.msk [vmem:[%s4327_s3 + $0x110] sm:$0xf] %vm2103_vm1, %v1975_v0  ;;  %v1633_v11 = vmul.f32 0.2, %v1321_v5  ;;  %v1683_v12 = vmul.f32 0.2, %v1446_v8 }
 0x121   :  { %v1534_v13 = vmul.f32 0.2, %v1073_v9  ;;  %v1584_v14 = vmul.f32 0.2, %v1198_v10  ;;  %2271 = vst.msk [vmem:[%s4327_s3 + $0x29c] sm:$0xf] %vm2103_vm1, %v2074_v2 }
 0x122   :  { %v1829_v15 = vmax.f32 %v1321_v5, %v1633_v11  ;;  %v1879_v16 = vmax.f32 %v1446_v8, %v1683_v12  ;;  %v2846_v5 = vld [vmem:[%s4325_s0 + $0x160] sm:$0xff]  ;;  %v2871_v11 = vld [vmem:[%s4325_s0 + $0x228] sm:$0xff] }
 0x123   :  { %v1730_v17 = vmax.f32 %v1073_v9, %v1534_v13  ;;  %v1780_v18 = vmax.f32 %v1198_v10, %v1584_v14  ;;  %v2896_v13 = vld [vmem:[%s4325_s0 + $0x2f0] sm:$0xff] }
 0x124   :  { %v2025_v19 = vpack.c.bf16 %v1829_v15, %v1829_v15  ;;  %v2075_v25 = vpack.c.bf16 %v1879_v16, %v1879_v16 }
 0x125   :  { %v1926_v20 = vpack.c.bf16 %v1730_v17, %v1730_v17  ;;  %v1976_v21 = vpack.c.bf16 %v1780_v18, %v1780_v18  ;;  %v1322_v22 = vpop.f32.mrf.mxu2  ;;  %v1447_v26 = vpop.f32.mrf.mxu3 }
 0x126   :  { %2222 = vst.msk [vmem:[%s4327_s3 + $0x1d8] sm:$0xf] %vm2103_vm1, %v2025_v19  ;;  %v1323_v27 = vadd.f32 %v3591_v4, %v1322_v22  ;;  %v1075_v28 = vpop.f32.mrf.mxu0  ;;  %v1200_v29 = vpop.f32.mrf.mxu1  ;;  %v1448_v31 = vadd.f32 %v3591_v4, %v1447_v26 }
 0x127   :  { %2123 = vst.msk [vmem:[%s4327_s3 + $0x4c] sm:$0xf] %vm2103_vm1, %v1926_v20  ;;  %v1076_v33 = vadd.f32 %v3591_v4, %v1075_v28  ;;  %v1201_v35 = vadd.f32 %v3591_v4, %v1200_v29 }
 0x128   :  { %2173 = vst.msk [vmem:[%s4327_s3 + $0x114] sm:$0xf] %vm2103_vm1, %v1976_v21  ;;  %v1634_v36 = vmul.f32 0.2, %v1323_v27  ;;  %v1684_v37 = vmul.f32 0.2, %v1448_v31 }
 0x129   :  { %v1535_v38 = vmul.f32 0.2, %v1076_v33  ;;  %v1585_v39 = vmul.f32 0.2, %v1201_v35  ;;  %2722 = vmatmul.msk.bf16.gmra.mxu0 %vm721_vm0, %v2820_v23  ;;  %2747 = vmatmul.msk.bf16.gmra.mxu1 %vm721_vm0, %v2845_v24  ;;  %2272 = vst.msk [vmem:[%s4327_s3 + $0x2a0] sm:$0xf] %vm2103_vm1, %v2075_v25 }
 0x12a   :  { %v1830_v40 = vmax.f32 %v1323_v27, %v1634_v36  ;;  %2772 = vmatmul.msk.bf16.gmra.mxu2 %vm721_vm0, %v2870_v30  ;;  %v1880_v41 = vmax.f32 %v1448_v31, %v1684_v37  ;;  %2797 = vmatmul.msk.bf16.gmra.mxu3 %vm721_vm0, %v2895_v32 }
 0x12b   :  { %v1731_v42 = vmax.f32 %v1076_v33, %v1535_v38  ;;  %v1781_v43 = vmax.f32 %v1201_v35, %v1585_v39 }
 0x12c   :  { %v2026_v44 = vpack.c.bf16 %v1830_v40, %v1830_v40  ;;  %v2076_v48 = vpack.c.bf16 %v1880_v41, %v1880_v41 }
 0x12d   :  { %v1927_v45 = vpack.c.bf16 %v1731_v42, %v1731_v42  ;;  %v1977_v46 = vpack.c.bf16 %v1781_v43, %v1781_v43  ;;  %v1325_v47 = vpop.f32.mrf.mxu2  ;;  %v1450_v49 = vpop.f32.mrf.mxu3 }
 0x12e   :  { %2223 = vst.msk [vmem:[%s4327_s3 + $0x1dc] sm:$0xf] %vm2103_vm1, %v2026_v44  ;;  %v1326_v50 = vadd.f32 %v3591_v4, %v1325_v47  ;;  %v1077_v51 = vpop.f32.mrf.mxu0  ;;  %v1202_v52 = vpop.f32.mrf.mxu1  ;;  %v1451_v53 = vadd.f32 %v3591_v4, %v1450_v49  ;;  %v2822_v49 = vld [vmem:[%s4325_s0 + $0xa0] sm:$0xff] }
 0x12f   :  { %2124 = vst.msk [vmem:[%s4327_s3 + $0x50] sm:$0xf] %vm2103_vm1, %v1927_v45  ;;  %v1078_v54 = vadd.f32 %v3591_v4, %v1077_v51  ;;  %v1203_v55 = vadd.f32 %v3591_v4, %v1202_v52 }
 0x130   :  { %2174 = vst.msk [vmem:[%s4327_s3 + $0x118] sm:$0xf] %vm2103_vm1, %v1977_v46  ;;  %v1635_v56 = vmul.f32 0.2, %v1326_v50  ;;  %v1685_v57 = vmul.f32 0.2, %v1451_v53 }
 0x131   :  { %v1536_v58 = vmul.f32 0.2, %v1078_v54  ;;  %v1586_v59 = vmul.f32 0.2, %v1203_v55  ;;  %2273 = vst.msk [vmem:[%s4327_s3 + $0x2a4] sm:$0xf] %vm2103_vm1, %v2076_v48 }
 0x132   :  { %v1831_v34 = vmax.f32 %v1326_v50, %v1635_v56  ;;  %v1881_v60 = vmax.f32 %v1451_v53, %v1685_v57  ;;  %v2847_v50 = vld [vmem:[%s4325_s0 + $0x168] sm:$0xff]  ;;  %v2872_v56 = vld [vmem:[%s4325_s0 + $0x230] sm:$0xff] }
 0x133   :  { %v1732_v61 = vmax.f32 %v1078_v54, %v1536_v58  ;;  %v1782_v62 = vmax.f32 %v1203_v55, %v1586_v59  ;;  %v2897_v58 = vld [vmem:[%s4325_s0 + $0x2f8] sm:$0xff] }
 0x134   :  { %v2027_v63 = vpack.c.bf16 %v1831_v34, %v1831_v34  ;;  %v2077_v6 = vpack.c.bf16 %v1881_v60, %v1881_v60 }
 0x135   :  { %v1928_v0 = vpack.c.bf16 %v1732_v61, %v1732_v61  ;;  %v1978_v1 = vpack.c.bf16 %v1782_v62, %v1782_v62  ;;  %v1327_v2 = vpop.f32.mrf.mxu2  ;;  %v1452_v7 = vpop.f32.mrf.mxu3 }
 0x136   :  { %2224 = vst.msk [vmem:[%s4327_s3 + $0x1e0] sm:$0xf] %vm2103_vm1, %v2027_v63  ;;  %v1328_v8 = vadd.f32 %v3591_v4, %v1327_v2  ;;  %v1080_v9 = vpop.f32.mrf.mxu0  ;;  %v1205_v10 = vpop.f32.mrf.mxu1  ;;  %v1453_v12 = vadd.f32 %v3591_v4, %v1452_v7 }
 0x137   :  { %2125 = vst.msk [vmem:[%s4327_s3 + $0x54] sm:$0xf] %vm2103_vm1, %v1928_v0  ;;  %v1081_v14 = vadd.f32 %v3591_v4, %v1080_v9  ;;  %v1206_v15 = vadd.f32 %v3591_v4, %v1205_v10 }
 0x138   :  { %2175 = vst.msk [vmem:[%s4327_s3 + $0x11c] sm:$0xf] %vm2103_vm1, %v1978_v1  ;;  %v1636_v16 = vmul.f32 0.2, %v1328_v8  ;;  %v1686_v17 = vmul.f32 0.2, %v1453_v12 }
 0x139   :  { %v1537_v18 = vmul.f32 0.2, %v1081_v14  ;;  %v1587_v19 = vmul.f32 0.2, %v1206_v15  ;;  %2723 = vmatmul.msk.bf16.gmra.mxu0 %vm721_vm0, %v2821_v3  ;;  %2748 = vmatmul.msk.bf16.gmra.mxu1 %vm721_vm0, %v2846_v5  ;;  %2274 = vst.msk [vmem:[%s4327_s3 + $0x2a8] sm:$0xf] %vm2103_vm1, %v2077_v6 }
 0x13a   :  { %v1832_v20 = vmax.f32 %v1328_v8, %v1636_v16  ;;  %2773 = vmatmul.msk.bf16.gmra.mxu2 %vm721_vm0, %v2871_v11  ;;  %v1882_v21 = vmax.f32 %v1453_v12, %v1686_v17  ;;  %2798 = vmatmul.msk.bf16.gmra.mxu3 %vm721_vm0, %v2896_v13 }
 0x13b   :  { %v1733_v22 = vmax.f32 %v1081_v14, %v1537_v18  ;;  %v1783_v23 = vmax.f32 %v1206_v15, %v1587_v19 }
 0x13c   :  { %v2028_v24 = vpack.c.bf16 %v1832_v20, %v1832_v20  ;;  %v2078_v28 = vpack.c.bf16 %v1882_v21, %v1882_v21 }
 0x13d   :  { %v1929_v25 = vpack.c.bf16 %v1733_v22, %v1733_v22  ;;  %v1979_v26 = vpack.c.bf16 %v1783_v23, %v1783_v23  ;;  %v1330_v27 = vpop.f32.mrf.mxu2  ;;  %v1455_v29 = vpop.f32.mrf.mxu3 }
 0x13e   :  { %2225 = vst.msk [vmem:[%s4327_s3 + $0x1e4] sm:$0xf] %vm2103_vm1, %v2028_v24  ;;  %v1331_v30 = vadd.f32 %v3591_v4, %v1330_v27  ;;  %v1082_v31 = vpop.f32.mrf.mxu0  ;;  %v1207_v32 = vpop.f32.mrf.mxu1  ;;  %v1456_v33 = vadd.f32 %v3591_v4, %v1455_v29  ;;  %v2823_v29 = vld [vmem:[%s4325_s0 + $0xa8] sm:$0xff] }
 0x13f   :  { %2126 = vst.msk [vmem:[%s4327_s3 + $0x58] sm:$0xf] %vm2103_vm1, %v1929_v25  ;;  %v1083_v35 = vadd.f32 %v3591_v4, %v1082_v31  ;;  %v1208_v36 = vadd.f32 %v3591_v4, %v1207_v32 }
 0x140   :  { %2176 = vst.msk [vmem:[%s4327_s3 + $0x120] sm:$0xf] %vm2103_vm1, %v1979_v26  ;;  %v1637_v37 = vmul.f32 0.2, %v1331_v30  ;;  %v1687_v38 = vmul.f32 0.2, %v1456_v33 }
 0x141   :  { %v1538_v39 = vmul.f32 0.2, %v1083_v35  ;;  %v1588_v40 = vmul.f32 0.2, %v1208_v36  ;;  %2275 = vst.msk [vmem:[%s4327_s3 + $0x2ac] sm:$0xf] %vm2103_vm1, %v2078_v28 }
 0x142   :  { %v1833_v41 = vmax.f32 %v1331_v30, %v1637_v37  ;;  %v1883_v42 = vmax.f32 %v1456_v33, %v1687_v38  ;;  %v2848_v30 = vld [vmem:[%s4325_s0 + $0x170] sm:$0xff]  ;;  %v2873_v37 = vld [vmem:[%s4325_s0 + $0x238] sm:$0xff] }
 0x143   :  { %v1734_v43 = vmax.f32 %v1083_v35, %v1538_v39  ;;  %v1784_v44 = vmax.f32 %v1208_v36, %v1588_v40  ;;  %v2898_v39 = vld [vmem:[%s4325_s0 + $0x300] sm:$0xff] }
 0x144   :  { %v2029_v45 = vpack.c.bf16 %v1833_v41, %v1833_v41  ;;  %v2079_v51 = vpack.c.bf16 %v1883_v42, %v1883_v42 }
 0x145   :  { %v1930_v46 = vpack.c.bf16 %v1734_v43, %v1734_v43  ;;  %v1980_v47 = vpack.c.bf16 %v1784_v44, %v1784_v44  ;;  %v1332_v48 = vpop.f32.mrf.mxu2  ;;  %v1457_v52 = vpop.f32.mrf.mxu3 }
 0x146   :  { %2226 = vst.msk [vmem:[%s4327_s3 + $0x1e8] sm:$0xf] %vm2103_vm1, %v2029_v45  ;;  %v1333_v53 = vadd.f32 %v3591_v4, %v1332_v48  ;;  %v1085_v54 = vpop.f32.mrf.mxu0  ;;  %v1210_v55 = vpop.f32.mrf.mxu1  ;;  %v1458_v57 = vadd.f32 %v3591_v4, %v1457_v52 }
 0x147   :  { %2127 = vst.msk [vmem:[%s4327_s3 + $0x5c] sm:$0xf] %vm2103_vm1, %v1930_v46  ;;  %v1086_v59 = vadd.f32 %v3591_v4, %v1085_v54  ;;  %v1211_v34 = vadd.f32 %v3591_v4, %v1210_v55 }
 0x148   :  { %2177 = vst.msk [vmem:[%s4327_s3 + $0x124] sm:$0xf] %vm2103_vm1, %v1980_v47  ;;  %v1638_v60 = vmul.f32 0.2, %v1333_v53  ;;  %v1688_v61 = vmul.f32 0.2, %v1458_v57 }
 0x149   :  { %v1539_v62 = vmul.f32 0.2, %v1086_v59  ;;  %v1589_v63 = vmul.f32 0.2, %v1211_v34  ;;  %2724 = vmatmul.msk.bf16.gmra.mxu0 %vm721_vm0, %v2822_v49  ;;  %2749 = vmatmul.msk.bf16.gmra.mxu1 %vm721_vm0, %v2847_v50  ;;  %2276 = vst.msk [vmem:[%s4327_s3 + $0x2b0] sm:$0xf] %vm2103_vm1, %v2079_v51 }
 0x14a   :  { %v1834_v0 = vmax.f32 %v1333_v53, %v1638_v60  ;;  %2774 = vmatmul.msk.bf16.gmra.mxu2 %vm721_vm0, %v2872_v56  ;;  %v1884_v1 = vmax.f32 %v1458_v57, %v1688_v61  ;;  %2799 = vmatmul.msk.bf16.gmra.mxu3 %vm721_vm0, %v2897_v58 }
 0x14b   :  { %v1735_v2 = vmax.f32 %v1086_v59, %v1539_v62  ;;  %v1785_v3 = vmax.f32 %v1211_v34, %v1589_v63 }
 0x14c   :  { %v2030_v5 = vpack.c.bf16 %v1834_v0, %v1834_v0  ;;  %v2080_v9 = vpack.c.bf16 %v1884_v1, %v1884_v1 }
 0x14d   :  { %v1931_v6 = vpack.c.bf16 %v1735_v2, %v1735_v2  ;;  %v1981_v7 = vpack.c.bf16 %v1785_v3, %v1785_v3  ;;  %v1335_v8 = vpop.f32.mrf.mxu2  ;;  %v1460_v10 = vpop.f32.mrf.mxu3 }
 0x14e   :  { %2227 = vst.msk [vmem:[%s4327_s3 + $0x1ec] sm:$0xf] %vm2103_vm1, %v2030_v5  ;;  %v1336_v11 = vadd.f32 %v3591_v4, %v1335_v8  ;;  %v1087_v12 = vpop.f32.mrf.mxu0  ;;  %v1212_v13 = vpop.f32.mrf.mxu1  ;;  %v1461_v14 = vadd.f32 %v3591_v4, %v1460_v10  ;;  %v2824_v10 = vld [vmem:[%s4325_s0 + $0xb0] sm:$0xff] }
 0x14f   :  { %2128 = vst.msk [vmem:[%s4327_s3 + $0x60] sm:$0xf] %vm2103_vm1, %v1931_v6  ;;  %v1088_v15 = vadd.f32 %v3591_v4, %v1087_v12  ;;  %v1213_v16 = vadd.f32 %v3591_v4, %v1212_v13 }
 0x150   :  { %2178 = vst.msk [vmem:[%s4327_s3 + $0x128] sm:$0xf] %vm2103_vm1, %v1981_v7  ;;  %v1639_v17 = vmul.f32 0.2, %v1336_v11  ;;  %v1689_v18 = vmul.f32 0.2, %v1461_v14 }
 0x151   :  { %v1540_v19 = vmul.f32 0.2, %v1088_v15  ;;  %v1590_v20 = vmul.f32 0.2, %v1213_v16  ;;  %2277 = vst.msk [vmem:[%s4327_s3 + $0x2b4] sm:$0xf] %vm2103_vm1, %v2080_v9 }
 0x152   :  { %v1835_v21 = vmax.f32 %v1336_v11, %v1639_v17  ;;  %v1885_v22 = vmax.f32 %v1461_v14, %v1689_v18  ;;  %v2849_v11 = vld [vmem:[%s4325_s0 + $0x178] sm:$0xff]  ;;  %v2874_v17 = vld [vmem:[%s4325_s0 + $0x240] sm:$0xff] }
 0x153   :  { %v1736_v23 = vmax.f32 %v1088_v15, %v1540_v19  ;;  %v1786_v24 = vmax.f32 %v1213_v16, %v1590_v20  ;;  %v2899_v19 = vld [vmem:[%s4325_s0 + $0x308] sm:$0xff] }
 0x154   :  { %v2031_v25 = vpack.c.bf16 %v1835_v21, %v1835_v21  ;;  %v2081_v31 = vpack.c.bf16 %v1885_v22, %v1885_v22 }
 0x155   :  { %v1932_v26 = vpack.c.bf16 %v1736_v23, %v1736_v23  ;;  %v1982_v27 = vpack.c.bf16 %v1786_v24, %v1786_v24  ;;  %v1337_v28 = vpop.f32.mrf.mxu2  ;;  %v1462_v32 = vpop.f32.mrf.mxu3 }
 0x156   :  { %2228 = vst.msk [vmem:[%s4327_s3 + $0x1f0] sm:$0xf] %vm2103_vm1, %v2031_v25  ;;  %v1338_v33 = vadd.f32 %v3591_v4, %v1337_v28  ;;  %v1090_v35 = vpop.f32.mrf.mxu0  ;;  %v1215_v36 = vpop.f32.mrf.mxu1  ;;  %v1463_v38 = vadd.f32 %v3591_v4, %v1462_v32 }
 0x157   :  { %2129 = vst.msk [vmem:[%s4327_s3 + $0x64] sm:$0xf] %vm2103_vm1, %v1932_v26  ;;  %v1091_v40 = vadd.f32 %v3591_v4, %v1090_v35  ;;  %v1216_v41 = vadd.f32 %v3591_v4, %v1215_v36 }
 0x158   :  { %2179 = vst.msk [vmem:[%s4327_s3 + $0x12c] sm:$0xf] %vm2103_vm1, %v1982_v27  ;;  %v1640_v42 = vmul.f32 0.2, %v1338_v33  ;;  %v1690_v43 = vmul.f32 0.2, %v1463_v38 }
 0x159   :  { %v1541_v44 = vmul.f32 0.2, %v1091_v40  ;;  %v1591_v45 = vmul.f32 0.2, %v1216_v41  ;;  %2725 = vmatmul.msk.bf16.gmra.mxu0 %vm721_vm0, %v2823_v29  ;;  %2750 = vmatmul.msk.bf16.gmra.mxu1 %vm721_vm0, %v2848_v30  ;;  %2278 = vst.msk [vmem:[%s4327_s3 + $0x2b8] sm:$0xf] %vm2103_vm1, %v2081_v31 }
 0x15a   :  { %v1836_v46 = vmax.f32 %v1338_v33, %v1640_v42  ;;  %2775 = vmatmul.msk.bf16.gmra.mxu2 %vm721_vm0, %v2873_v37  ;;  %v1886_v47 = vmax.f32 %v1463_v38, %v1690_v43  ;;  %2800 = vmatmul.msk.bf16.gmra.mxu3 %vm721_vm0, %v2898_v39 }
 0x15b   :  { %v1737_v48 = vmax.f32 %v1091_v40, %v1541_v44  ;;  %v1787_v49 = vmax.f32 %v1216_v41, %v1591_v45 }
 0x15c   :  { %v2032_v50 = vpack.c.bf16 %v1836_v46, %v1836_v46  ;;  %v2082_v54 = vpack.c.bf16 %v1886_v47, %v1886_v47 }
 0x15d   :  { %v1933_v51 = vpack.c.bf16 %v1737_v48, %v1737_v48  ;;  %v1983_v52 = vpack.c.bf16 %v1787_v49, %v1787_v49  ;;  %v1340_v53 = vpop.f32.mrf.mxu2  ;;  %v1465_v55 = vpop.f32.mrf.mxu3 }
 0x15e   :  { %2229 = vst.msk [vmem:[%s4327_s3 + $0x1f4] sm:$0xf] %vm2103_vm1, %v2032_v50  ;;  %v1341_v56 = vadd.f32 %v3591_v4, %v1340_v53  ;;  %v1092_v57 = vpop.f32.mrf.mxu0  ;;  %v1217_v58 = vpop.f32.mrf.mxu1  ;;  %v1466_v59 = vadd.f32 %v3591_v4, %v1465_v55  ;;  %v2825_v55 = vld [vmem:[%s4325_s0 + $0xb8] sm:$0xff] }
 0x15f   :  { %2130 = vst.msk [vmem:[%s4327_s3 + $0x68] sm:$0xf] %vm2103_vm1, %v1933_v51  ;;  %v1093_v34 = vadd.f32 %v3591_v4, %v1092_v57  ;;  %v1218_v60 = vadd.f32 %v3591_v4, %v1217_v58 }
 0x160   :  { %2180 = vst.msk [vmem:[%s4327_s3 + $0x130] sm:$0xf] %vm2103_vm1, %v1983_v52  ;;  %v1641_v61 = vmul.f32 0.2, %v1341_v56  ;;  %v1691_v62 = vmul.f32 0.2, %v1466_v59 }
 0x161   :  { %v1542_v63 = vmul.f32 0.2, %v1093_v34  ;;  %v1592_v0 = vmul.f32 0.2, %v1218_v60  ;;  %2279 = vst.msk [vmem:[%s4327_s3 + $0x2bc] sm:$0xf] %vm2103_vm1, %v2082_v54 }
 0x162   :  { %v1837_v1 = vmax.f32 %v1341_v56, %v1641_v61  ;;  %v1887_v2 = vmax.f32 %v1466_v59, %v1691_v62  ;;  %v2850_v56 = vld [vmem:[%s4325_s0 + $0x180] sm:$0xff]  ;;  %v2875_v61 = vld [vmem:[%s4325_s0 + $0x248] sm:$0xff] }
 0x163   :  { %v1738_v3 = vmax.f32 %v1093_v34, %v1542_v63  ;;  %v1788_v5 = vmax.f32 %v1218_v60, %v1592_v0 }
 0x164   :  { %v2033_v6 = vpack.c.bf16 %v1837_v1, %v1837_v1  ;;  %v2083_v12 = vpack.c.bf16 %v1887_v2, %v1887_v2 }
 0x165   :  { %v1934_v7 = vpack.c.bf16 %v1738_v3, %v1738_v3  ;;  %v1984_v8 = vpack.c.bf16 %v1788_v5, %v1788_v5  ;;  %v1342_v9 = vpop.f32.mrf.mxu2  ;;  %v1467_v13 = vpop.f32.mrf.mxu3 }
 0x166   :  { %2230 = vst.msk [vmem:[%s4327_s3 + $0x1f8] sm:$0xf] %vm2103_vm1, %v2033_v6  ;;  %v1343_v14 = vadd.f32 %v3591_v4, %v1342_v9  ;;  %v1095_v15 = vpop.f32.mrf.mxu0  ;;  %v1220_v16 = vpop.f32.mrf.mxu1  ;;  %v1468_v18 = vadd.f32 %v3591_v4, %v1467_v13 }
 0x167   :  { %2131 = vst.msk [vmem:[%s4327_s3 + $0x6c] sm:$0xf] %vm2103_vm1, %v1934_v7  ;;  %v1096_v20 = vadd.f32 %v3591_v4, %v1095_v15  ;;  %v1221_v21 = vadd.f32 %v3591_v4, %v1220_v16 }
 0x168   :  { %2181 = vst.msk [vmem:[%s4327_s3 + $0x134] sm:$0xf] %vm2103_vm1, %v1984_v8  ;;  %v1642_v22 = vmul.f32 0.2, %v1343_v14  ;;  %v1692_v23 = vmul.f32 0.2, %v1468_v18 }
 0x169   :  { %v1543_v24 = vmul.f32 0.2, %v1096_v20  ;;  %v1593_v25 = vmul.f32 0.2, %v1221_v21  ;;  %2726 = vmatmul.msk.bf16.gmra.mxu0 %vm721_vm0, %v2824_v10  ;;  %2751 = vmatmul.msk.bf16.gmra.mxu1 %vm721_vm0, %v2849_v11  ;;  %2280 = vst.msk [vmem:[%s4327_s3 + $0x2c0] sm:$0xf] %vm2103_vm1, %v2083_v12 }
 0x16a   :  { %v1838_v26 = vmax.f32 %v1343_v14, %v1642_v22  ;;  %2776 = vmatmul.msk.bf16.gmra.mxu2 %vm721_vm0, %v2874_v17  ;;  %v1888_v27 = vmax.f32 %v1468_v18, %v1692_v23  ;;  %2801 = vmatmul.msk.bf16.gmra.mxu3 %vm721_vm0, %v2899_v19 }
 0x16b   :  { %v1739_v28 = vmax.f32 %v1096_v20, %v1543_v24  ;;  %v1789_v29 = vmax.f32 %v1221_v21, %v1593_v25 }
 0x16c   :  { %v2034_v30 = vpack.c.bf16 %v1838_v26, %v1838_v26  ;;  %v2084_v35 = vpack.c.bf16 %v1888_v27, %v1888_v27 }
 0x16d   :  { %v1935_v31 = vpack.c.bf16 %v1739_v28, %v1739_v28  ;;  %v1985_v32 = vpack.c.bf16 %v1789_v29, %v1789_v29  ;;  %v1345_v33 = vpop.f32.mrf.mxu2  ;;  %v1470_v36 = vpop.f32.mrf.mxu3 }
 0x16e   :  { %2231 = vst.msk [vmem:[%s4327_s3 + $0x1fc] sm:$0xf] %vm2103_vm1, %v2034_v30  ;;  %v1346_v37 = vadd.f32 %v3591_v4, %v1345_v33  ;;  %v1097_v38 = vpop.f32.mrf.mxu0  ;;  %v1222_v39 = vpop.f32.mrf.mxu1  ;;  %v1471_v40 = vadd.f32 %v3591_v4, %v1470_v36  ;;  %v2851_v36 = vld [vmem:[%s4325_s0 + $0x188] sm:$0xff] }
 0x16f   :  { %2132 = vst.msk [vmem:[%s4327_s3 + $0x70] sm:$0xf] %vm2103_vm1, %v1935_v31  ;;  %v1098_v41 = vadd.f32 %v3591_v4, %v1097_v38  ;;  %v1223_v42 = vadd.f32 %v3591_v4, %v1222_v39 }
 0x170   :  { %2182 = vst.msk [vmem:[%s4327_s3 + $0x138] sm:$0xf] %vm2103_vm1, %v1985_v32  ;;  %v1643_v43 = vmul.f32 0.2, %v1346_v37  ;;  %v1693_v44 = vmul.f32 0.2, %v1471_v40 }
 0x171   :  { %v1544_v45 = vmul.f32 0.2, %v1098_v41  ;;  %v1594_v46 = vmul.f32 0.2, %v1223_v42  ;;  %2281 = vst.msk [vmem:[%s4327_s3 + $0x2c4] sm:$0xf] %vm2103_vm1, %v2084_v35 }
 0x172   :  { %v1839_v47 = vmax.f32 %v1346_v37, %v1643_v43  ;;  %v1889_v48 = vmax.f32 %v1471_v40, %v1693_v44  ;;  %v2826_v35 = vld [vmem:[%s4325_s0 + $0xc0] sm:$0xff] }
 0x173   :  { %v1740_v49 = vmax.f32 %v1098_v41, %v1544_v45  ;;  %v1790_v50 = vmax.f32 %v1223_v42, %v1594_v46  ;;  %v2876_v42 = vld [vmem:[%s4325_s0 + $0x250] sm:$0xff] }
 0x174   :  { %v2035_v51 = vpack.c.bf16 %v1839_v47, %v1839_v47  ;;  %v2085_v57 = vpack.c.bf16 %v1889_v48, %v1889_v48 }
 0x175   :  { %v1936_v52 = vpack.c.bf16 %v1740_v49, %v1740_v49  ;;  %v1986_v53 = vpack.c.bf16 %v1790_v50, %v1790_v50  ;;  %v1347_v54 = vpop.f32.mrf.mxu2  ;;  %v1472_v58 = vpop.f32.mrf.mxu3 }
 0x176   :  { %2232 = vst.msk [vmem:[%s4327_s3 + $0x200] sm:$0xf] %vm2103_vm1, %v2035_v51  ;;  %v1348_v59 = vadd.f32 %v3591_v4, %v1347_v54  ;;  %v1100_v34 = vpop.f32.mrf.mxu0  ;;  %v1225_v60 = vpop.f32.mrf.mxu1  ;;  %v1473_v62 = vadd.f32 %v3591_v4, %v1472_v58 }
 0x177   :  { %2133 = vst.msk [vmem:[%s4327_s3 + $0x74] sm:$0xf] %vm2103_vm1, %v1936_v52  ;;  %v1101_v63 = vadd.f32 %v3591_v4, %v1100_v34  ;;  %v1226_v0 = vadd.f32 %v3591_v4, %v1225_v60 }
 0x178   :  { %2183 = vst.msk [vmem:[%s4327_s3 + $0x13c] sm:$0xf] %vm2103_vm1, %v1986_v53  ;;  %v1644_v1 = vmul.f32 0.2, %v1348_v59  ;;  %v1694_v2 = vmul.f32 0.2, %v1473_v62 }
 0x179   :  { %v1545_v3 = vmul.f32 0.2, %v1101_v63  ;;  %v1595_v5 = vmul.f32 0.2, %v1226_v0  ;;  %2727 = vmatmul.msk.bf16.gmra.mxu0 %vm721_vm0, %v2825_v55  ;;  %2752 = vmatmul.msk.bf16.gmra.mxu1 %vm721_vm0, %v2850_v56  ;;  %2282 = vst.msk [vmem:[%s4327_s3 + $0x2c8] sm:$0xf] %vm2103_vm1, %v2085_v57 }
 0x17a   :  { %v1840_v6 = vmax.f32 %v1348_v59, %v1644_v1  ;;  %2777 = vmatmul.msk.bf16.gmra.mxu2 %vm721_vm0, %v2875_v61  ;;  %v1890_v7 = vmax.f32 %v1473_v62, %v1694_v2 }
 0x17b   :  { %v1741_v8 = vmax.f32 %v1101_v63, %v1545_v3  ;;  %v1791_v9 = vmax.f32 %v1226_v0, %v1595_v5 }
 0x17c   :  { %v2036_v10 = vpack.c.bf16 %v1840_v6, %v1840_v6  ;;  %v2086_v14 = vpack.c.bf16 %v1890_v7, %v1890_v7 }
 0x17d   :  { %v1937_v11 = vpack.c.bf16 %v1741_v8, %v1741_v8  ;;  %v1987_v12 = vpack.c.bf16 %v1791_v9, %v1791_v9  ;;  %v1350_v13 = vpop.f32.mrf.mxu2  ;;  %v1475_v15 = vpop.f32.mrf.mxu3 }
 0x17e   :  { %2233 = vst.msk [vmem:[%s4327_s3 + $0x204] sm:$0xf] %vm2103_vm1, %v2036_v10  ;;  %v1351_v16 = vadd.f32 %v3591_v4, %v1350_v13  ;;  %v1102_v17 = vpop.f32.mrf.mxu0  ;;  %v1227_v18 = vpop.f32.mrf.mxu1  ;;  %v1476_v19 = vadd.f32 %v3591_v4, %v1475_v15 }
 0x17f   :  { %2134 = vst.msk [vmem:[%s4327_s3 + $0x78] sm:$0xf] %vm2103_vm1, %v1937_v11  ;;  %v1103_v20 = vadd.f32 %v3591_v4, %v1102_v17  ;;  %v1228_v21 = vadd.f32 %v3591_v4, %v1227_v18 }
 0x180   :  { %2184 = vst.msk [vmem:[%s4327_s3 + $0x140] sm:$0xf] %vm2103_vm1, %v1987_v12  ;;  %v1645_v22 = vmul.f32 0.2, %v1351_v16  ;;  %v1695_v23 = vmul.f32 0.2, %v1476_v19 }
 0x181   :  { %v1546_v24 = vmul.f32 0.2, %v1103_v20  ;;  %v1596_v25 = vmul.f32 0.2, %v1228_v21  ;;  %2283 = vst.msk [vmem:[%s4327_s3 + $0x2cc] sm:$0xf] %vm2103_vm1, %v2086_v14 }
 0x182   :  { %v1841_v26 = vmax.f32 %v1351_v16, %v1645_v22  ;;  %v1891_v27 = vmax.f32 %v1476_v19, %v1695_v23 }
 0x183   :  { %v1742_v28 = vmax.f32 %v1103_v20, %v1546_v24  ;;  %v1792_v29 = vmax.f32 %v1228_v21, %v1596_v25 }
 0x184   :  { %v2037_v30 = vpack.c.bf16 %v1841_v26, %v1841_v26  ;;  %v2087_v37 = vpack.c.bf16 %v1891_v27, %v1891_v27 }
 0x185   :  { %v1938_v31 = vpack.c.bf16 %v1742_v28, %v1742_v28  ;;  %v1988_v32 = vpack.c.bf16 %v1792_v29, %v1792_v29  ;;  %v1352_v33 = vpop.f32.mrf.mxu2  ;;  %v1477_v38 = vpop.f32.mrf.mxu3 }
 0x186   :  { %2234 = vst.msk [vmem:[%s4327_s3 + $0x208] sm:$0xf] %vm2103_vm1, %v2037_v30  ;;  %v1353_v39 = vadd.f32 %v3591_v4, %v1352_v33  ;;  %v1105_v40 = vpop.f32.mrf.mxu0  ;;  %v1230_v41 = vpop.f32.mrf.mxu1  ;;  %v1478_v43 = vadd.f32 %v3591_v4, %v1477_v38 }
 0x187   :  { %2135 = vst.msk [vmem:[%s4327_s3 + $0x7c] sm:$0xf] %vm2103_vm1, %v1938_v31  ;;  %v1106_v44 = vadd.f32 %v3591_v4, %v1105_v40  ;;  %v1231_v45 = vadd.f32 %v3591_v4, %v1230_v41 }
 0x188   :  { %2185 = vst.msk [vmem:[%s4327_s3 + $0x144] sm:$0xf] %vm2103_vm1, %v1988_v32  ;;  %v1646_v46 = vmul.f32 0.2, %v1353_v39  ;;  %v1696_v47 = vmul.f32 0.2, %v1478_v43 }
 0x189   :  { %v1547_v48 = vmul.f32 0.2, %v1106_v44  ;;  %v1597_v49 = vmul.f32 0.2, %v1231_v45  ;;  %2728 = vmatmul.msk.bf16.gmra.mxu0 %vm721_vm0, %v2826_v35  ;;  %2753 = vmatmul.msk.bf16.gmra.mxu1 %vm721_vm0, %v2851_v36  ;;  %2284 = vst.msk [vmem:[%s4327_s3 + $0x2d0] sm:$0xf] %vm2103_vm1, %v2087_v37 }
 0x18a   :  { %v1842_v50 = vmax.f32 %v1353_v39, %v1646_v46  ;;  %2778 = vmatmul.msk.bf16.gmra.mxu2 %vm721_vm0, %v2876_v42  ;;  %v1892_v51 = vmax.f32 %v1478_v43, %v1696_v47 }
 0x18b   :  { %v1743_v52 = vmax.f32 %v1106_v44, %v1547_v48  ;;  %v1793_v53 = vmax.f32 %v1231_v45, %v1597_v49 }
 0x18c   :  { %v2038_v54 = vpack.c.bf16 %v1842_v50, %v1842_v50  ;;  %v2088_v58 = vpack.c.bf16 %v1892_v51, %v1892_v51 }
 0x18d   :  { %v1939_v55 = vpack.c.bf16 %v1743_v52, %v1743_v52  ;;  %v1989_v56 = vpack.c.bf16 %v1793_v53, %v1793_v53  ;;  %v1355_v57 = vpop.f32.mrf.mxu2  ;;  %v1480_v59 = vpop.f32.mrf.mxu3 }
 0x18e   :  { %2235 = vst.msk [vmem:[%s4327_s3 + $0x20c] sm:$0xf] %vm2103_vm1, %v2038_v54  ;;  %v1356_v34 = vadd.f32 %v3591_v4, %v1355_v57  ;;  %v1107_v60 = vpop.f32.mrf.mxu0  ;;  %v1232_v61 = vpop.f32.mrf.mxu1  ;;  %v1481_v62 = vadd.f32 %v3591_v4, %v1480_v59 }
 0x18f   :  { %2136 = vst.msk [vmem:[%s4327_s3 + $0x80] sm:$0xf] %vm2103_vm1, %v1939_v55  ;;  %v1108_v63 = vadd.f32 %v3591_v4, %v1107_v60  ;;  %v1233_v0 = vadd.f32 %v3591_v4, %v1232_v61 }
 0x190   :  { %2186 = vst.msk [vmem:[%s4327_s3 + $0x148] sm:$0xf] %vm2103_vm1, %v1989_v56  ;;  %v1647_v1 = vmul.f32 0.2, %v1356_v34  ;;  %v1697_v2 = vmul.f32 0.2, %v1481_v62 }
 0x191   :  { %v1548_v3 = vmul.f32 0.2, %v1108_v63  ;;  %v1598_v5 = vmul.f32 0.2, %v1233_v0  ;;  %2285 = vst.msk [vmem:[%s4327_s3 + $0x2d4] sm:$0xf] %vm2103_vm1, %v2088_v58 }
 0x192   :  { %v1843_v6 = vmax.f32 %v1356_v34, %v1647_v1  ;;  %v1893_v7 = vmax.f32 %v1481_v62, %v1697_v2 }
 0x193   :  { %v1744_v8 = vmax.f32 %v1108_v63, %v1548_v3  ;;  %v1794_v9 = vmax.f32 %v1233_v0, %v1598_v5 }
 0x194   :  { %v2039_v10 = vpack.c.bf16 %v1843_v6, %v1843_v6  ;;  %v2089_v14 = vpack.c.bf16 %v1893_v7, %v1893_v7 }
 0x195   :  { %v1940_v11 = vpack.c.bf16 %v1744_v8, %v1744_v8  ;;  %v1990_v12 = vpack.c.bf16 %v1794_v9, %v1794_v9  ;;  %v1357_v13 = vpop.f32.mrf.mxu2  ;;  %v1482_v15 = vpop.f32.mrf.mxu3 }
 0x196   :  { %2236 = vst.msk [vmem:[%s4327_s3 + $0x210] sm:$0xf] %vm2103_vm1, %v2039_v10  ;;  %v1358_v16 = vadd.f32 %v3591_v4, %v1357_v13  ;;  %v1110_v17 = vpop.f32.mrf.mxu0  ;;  %v1235_v18 = vpop.f32.mrf.mxu1  ;;  %v1483_v19 = vadd.f32 %v3591_v4, %v1482_v15 }
 0x197   :  { %2137 = vst.msk [vmem:[%s4327_s3 + $0x84] sm:$0xf] %vm2103_vm1, %v1940_v11  ;;  %v1111_v20 = vadd.f32 %v3591_v4, %v1110_v17  ;;  %v1236_v21 = vadd.f32 %v3591_v4, %v1235_v18 }
 0x198   :  { %2187 = vst.msk [vmem:[%s4327_s3 + $0x14c] sm:$0xf] %vm2103_vm1, %v1990_v12  ;;  %v1648_v22 = vmul.f32 0.2, %v1358_v16  ;;  %v1698_v23 = vmul.f32 0.2, %v1483_v19 }
 0x199   :  { %v1549_v24 = vmul.f32 0.2, %v1111_v20  ;;  %v1599_v25 = vmul.f32 0.2, %v1236_v21  ;;  %2286 = vst.msk [vmem:[%s4327_s3 + $0x2d8] sm:$0xf] %vm2103_vm1, %v2089_v14 }
 0x19a   :  { %v1844_v26 = vmax.f32 %v1358_v16, %v1648_v22  ;;  %v1894_v27 = vmax.f32 %v1483_v19, %v1698_v23 }
 0x19b   :  { %v1745_v28 = vmax.f32 %v1111_v20, %v1549_v24  ;;  %v1795_v29 = vmax.f32 %v1236_v21, %v1599_v25 }
 0x19c   :  { %v2040_v30 = vpack.c.bf16 %v1844_v26, %v1844_v26  ;;  %v2090_v35 = vpack.c.bf16 %v1894_v27, %v1894_v27 }
 0x19d   :  { %v1941_v31 = vpack.c.bf16 %v1745_v28, %v1745_v28  ;;  %v1991_v32 = vpack.c.bf16 %v1795_v29, %v1795_v29  ;;  %v1360_v33 = vpop.f32.mrf.mxu2  ;;  %v1485_v36 = vpop.f32.mrf.mxu3 }
 0x19e   :  { %2237 = vst.msk [vmem:[%s4327_s3 + $0x214] sm:$0xf] %vm2103_vm1, %v2040_v30  ;;  %v1361_v37 = vadd.f32 %v3591_v4, %v1360_v33  ;;  %v1112_v38 = vpop.f32.mrf.mxu0  ;;  %v1237_v39 = vpop.f32.mrf.mxu1  ;;  %v1486_v40 = vadd.f32 %v3591_v4, %v1485_v36 }
 0x19f   :  { %2138 = vst.msk [vmem:[%s4327_s3 + $0x88] sm:$0xf] %vm2103_vm1, %v1941_v31  ;;  %v1113_v41 = vadd.f32 %v3591_v4, %v1112_v38  ;;  %v1238_v42 = vadd.f32 %v3591_v4, %v1237_v39  ;;  %v4086_v38 = vld [vmem:[%s4326_s2] ss:$0 sm:$0xff] }
 0x1a0   :  { %2188 = vst.msk [vmem:[%s4327_s3 + $0x150] sm:$0xf] %vm2103_vm1, %v1991_v32  ;;  %v1649_v43 = vmul.f32 0.2, %v1361_v37  ;;  %v1699_v44 = vmul.f32 0.2, %v1486_v40 }
 0x1a1   :  { %v1550_v45 = vmul.f32 0.2, %v1113_v41  ;;  %v1600_v46 = vmul.f32 0.2, %v1238_v42  ;;  %2287 = vst.msk [vmem:[%s4327_s3 + $0x2dc] sm:$0xf] %vm2103_vm1, %v2090_v35 }
 0x1a2   :  { %v1845_v47 = vmax.f32 %v1361_v37, %v1649_v43  ;;  %v1895_v48 = vmax.f32 %v1486_v40, %v1699_v44 }
 0x1a3   :  { %v1746_v49 = vmax.f32 %v1113_v41, %v1550_v45  ;;  %v1796_v50 = vmax.f32 %v1238_v42, %v1600_v46 }
 0x1a4   :  { %v2041_v51 = vpack.c.bf16 %v1845_v47, %v1845_v47  ;;  %v2091_v55 = vpack.c.bf16 %v1895_v48, %v1895_v48 }
 0x1a5   :  { %v1942_v52 = vpack.c.bf16 %v1746_v49, %v1746_v49  ;;  %v1992_v53 = vpack.c.bf16 %v1796_v50, %v1796_v50  ;;  %v1362_v54 = vpop.f32.mrf.mxu2  ;;  %v1487_v56 = vpop.f32.mrf.mxu3 }
 0x1a6   :  { %2238 = vst.msk [vmem:[%s4327_s3 + $0x218] sm:$0xf] %vm2103_vm1, %v2041_v51  ;;  %v1363_v57 = vadd.f32 %v3591_v4, %v1362_v54  ;;  %v1115_v58 = vpop.f32.mrf.mxu0  ;;  %v1240_v59 = vpop.f32.mrf.mxu1  ;;  %v1488_v34 = vadd.f32 %v3591_v4, %v1487_v56 }
 0x1a7   :  { %2139 = vst.msk [vmem:[%s4327_s3 + $0x8c] sm:$0xf] %vm2103_vm1, %v1942_v52  ;;  %v1116_v60 = vadd.f32 %v3591_v4, %v1115_v58  ;;  %v1241_v61 = vadd.f32 %v3591_v4, %v1240_v59 }
 0x1a8   :  { %2189 = vst.msk [vmem:[%s4327_s3 + $0x154] sm:$0xf] %vm2103_vm1, %v1992_v53  ;;  %v1650_v62 = vmul.f32 0.2, %v1363_v57  ;;  %v1700_v63 = vmul.f32 0.2, %v1488_v34 }
 0x1a9   :  { %v1551_v0 = vmul.f32 0.2, %v1116_v60  ;;  %v1601_v1 = vmul.f32 0.2, %v1241_v61  ;;  %2288 = vst.msk [vmem:[%s4327_s3 + $0x2e0] sm:$0xf] %vm2103_vm1, %v2091_v55 }
 0x1aa   :  { %v1846_v2 = vmax.f32 %v1363_v57, %v1650_v62  ;;  %v1896_v3 = vmax.f32 %v1488_v34, %v1700_v63 }
 0x1ab   :  { %v1747_v5 = vmax.f32 %v1116_v60, %v1551_v0  ;;  %v1797_v6 = vmax.f32 %v1241_v61, %v1601_v1 }
 0x1ac   :  { %v2042_v7 = vpack.c.bf16 %v1846_v2, %v1846_v2  ;;  %v2092_v11 = vpack.c.bf16 %v1896_v3, %v1896_v3 }
 0x1ad   :  { %v1943_v8 = vpack.c.bf16 %v1747_v5, %v1747_v5  ;;  %v1993_v9 = vpack.c.bf16 %v1797_v6, %v1797_v6  ;;  %v1365_v10 = vpop.f32.mrf.mxu2  ;;  %v1490_v12 = vpop.f32.mrf.mxu3 }
 0x1ae   :  { %2239 = vst.msk [vmem:[%s4327_s3 + $0x21c] sm:$0xf] %vm2103_vm1, %v2042_v7  ;;  %v1366_v13 = vadd.f32 %v3591_v4, %v1365_v10  ;;  %v1117_v14 = vpop.f32.mrf.mxu0  ;;  %v1242_v15 = vpop.f32.mrf.mxu1  ;;  %v1491_v16 = vadd.f32 %v3591_v4, %v1490_v12 }
 0x1af   :  { %2140 = vst.msk [vmem:[%s4327_s3 + $0x90] sm:$0xf] %vm2103_vm1, %v1943_v8  ;;  %v1118_v17 = vadd.f32 %v3591_v4, %v1117_v14  ;;  %v1243_v18 = vadd.f32 %v3591_v4, %v1242_v15 }
 0x1b0   :  { %2190 = vst.msk [vmem:[%s4327_s3 + $0x158] sm:$0xf] %vm2103_vm1, %v1993_v9  ;;  %v1651_v19 = vmul.f32 0.2, %v1366_v13  ;;  %v1701_v20 = vmul.f32 0.2, %v1491_v16 }
 0x1b1   :  { %v1552_v21 = vmul.f32 0.2, %v1118_v17  ;;  %v1602_v22 = vmul.f32 0.2, %v1243_v18  ;;  %2289 = vst.msk [vmem:[%s4327_s3 + $0x2e4] sm:$0xf] %vm2103_vm1, %v2092_v11 }
 0x1b2   :  { %v1847_v23 = vmax.f32 %v1366_v13, %v1651_v19  ;;  %v1897_v24 = vmax.f32 %v1491_v16, %v1701_v20 }
 0x1b3   :  { %v1748_v25 = vmax.f32 %v1118_v17, %v1552_v21  ;;  %v1798_v26 = vmax.f32 %v1243_v18, %v1602_v22 }
 0x1b4   :  { %v2043_v27 = vpack.c.bf16 %v1847_v23, %v1847_v23  ;;  %v2093_v31 = vpack.c.bf16 %v1897_v24, %v1897_v24 }
 0x1b5   :  { %v1944_v28 = vpack.c.bf16 %v1748_v25, %v1748_v25  ;;  %v1994_v29 = vpack.c.bf16 %v1798_v26, %v1798_v26  ;;  %v1367_v30 = vpop.f32.mrf.mxu2  ;;  %v1492_v32 = vpop.f32.mrf.mxu3 }
 0x1b6   :  { %2240 = vst.msk [vmem:[%s4327_s3 + $0x220] sm:$0xf] %vm2103_vm1, %v2043_v27  ;;  %v1368_v33 = vadd.f32 %v3591_v4, %v1367_v30  ;;  %v1120_v35 = vpop.f32.mrf.mxu0  ;;  %v1245_v36 = vpop.f32.mrf.mxu1  ;;  %v1493_v37 = vadd.f32 %v3591_v4, %v1492_v32 }
 0x1b7   :  { %2141 = vst.msk [vmem:[%s4327_s3 + $0x94] sm:$0xf] %vm2103_vm1, %v1944_v28  ;;  %v1121_v39 = vadd.f32 %v4086_v38, %v1120_v35  ;;  %v1246_v40 = vadd.f32 %v4086_v38, %v1245_v36 }
 0x1b8   :  { %2191 = vst.msk [vmem:[%s4327_s3 + $0x15c] sm:$0xf] %vm2103_vm1, %v1994_v29  ;;  %v1652_v4 = vmul.f32 0.2, %v1368_v33  ;;  %v1702_v41 = vmul.f32 0.2, %v1493_v37 }
 0x1b9   :  { %v1553_v42 = vmul.f32 0.2, %v1121_v39  ;;  %v1603_v43 = vmul.f32 0.2, %v1246_v40  ;;  %2290 = vst.msk [vmem:[%s4327_s3 + $0x2e8] sm:$0xf] %vm2103_vm1, %v2093_v31 }
 0x1ba   :  { %v1848_v44 = vmax.f32 %v1368_v33, %v1652_v4  ;;  %v1898_v45 = vmax.f32 %v1493_v37, %v1702_v41 }
 0x1bb   :  { %v1749_v46 = vmax.f32 %v1121_v39, %v1553_v42  ;;  %v1799_v47 = vmax.f32 %v1246_v40, %v1603_v43 }
 0x1bc   :  { %v2044_v48 = vpack.c.bf16 %v1848_v44, %v1848_v44  ;;  %v2094_v52 = vpack.c.bf16 %v1898_v45, %v1898_v45 }
 0x1bd   :  { %v1945_v49 = vpack.c.bf16 %v1749_v46, %v1749_v46  ;;  %v1995_v50 = vpack.c.bf16 %v1799_v47, %v1799_v47  ;;  %v1370_v51 = vpop.f32.mrf.mxu2  ;;  %v1495_v53 = vpop.f32.mrf.mxu3 }
 0x1be   :  { %2241 = vst.msk [vmem:[%s4327_s3 + $0x224] sm:$0xf] %vm2103_vm1, %v2044_v48  ;;  %v1371_v54 = vadd.f32 %v4086_v38, %v1370_v51  ;;  %v1122_v55 = vpop.f32.mrf.mxu0  ;;  %v1247_v56 = vpop.f32.mrf.mxu1  ;;  %v1496_v57 = vadd.f32 %v4086_v38, %v1495_v53 }
 0x1bf   :  { %2142 = vst.msk [vmem:[%s4327_s3 + $0x98] sm:$0xf] %vm2103_vm1, %v1945_v49  ;;  %v1123_v58 = vadd.f32 %v4086_v38, %v1122_v55  ;;  %v1248_v59 = vadd.f32 %v4086_v38, %v1247_v56 }
 0x1c0   :  { %2192 = vst.msk [vmem:[%s4327_s3 + $0x160] sm:$0xf] %vm2103_vm1, %v1995_v50  ;;  %v1653_v34 = vmul.f32 0.2, %v1371_v54  ;;  %v1703_v60 = vmul.f32 0.2, %v1496_v57 }
 0x1c1   :  { %v1554_v61 = vmul.f32 0.2, %v1123_v58  ;;  %v1604_v62 = vmul.f32 0.2, %v1248_v59  ;;  %2291 = vst.msk [vmem:[%s4327_s3 + $0x2ec] sm:$0xf] %vm2103_vm1, %v2094_v52 }
 0x1c2   :  { %v1849_v63 = vmax.f32 %v1371_v54, %v1653_v34  ;;  %v1899_v0 = vmax.f32 %v1496_v57, %v1703_v60 }
 0x1c3   :  { %v1750_v1 = vmax.f32 %v1123_v58, %v1554_v61  ;;  %v1800_v2 = vmax.f32 %v1248_v59, %v1604_v62 }
 0x1c4   :  { %v2045_v3 = vpack.c.bf16 %v1849_v63, %v1849_v63  ;;  %v2095_v8 = vpack.c.bf16 %v1899_v0, %v1899_v0 }
 0x1c5   :  { %v1946_v5 = vpack.c.bf16 %v1750_v1, %v1750_v1  ;;  %v1996_v6 = vpack.c.bf16 %v1800_v2, %v1800_v2  ;;  %v1372_v7 = vpop.f32.mrf.mxu2  ;;  %v1497_v9 = vpop.f32.mrf.mxu3 }
 0x1c6   :  { %2242 = vst.msk [vmem:[%s4327_s3 + $0x228] sm:$0xf] %vm2103_vm1, %v2045_v3  ;;  %v1373_v10 = vadd.f32 %v4086_v38, %v1372_v7  ;;  %v1125_v11 = vpop.f32.mrf.mxu0  ;;  %v1250_v12 = vpop.f32.mrf.mxu1  ;;  %v1498_v13 = vadd.f32 %v4086_v38, %v1497_v9 }
 0x1c7   :  { %2143 = vst.msk [vmem:[%s4327_s3 + $0x9c] sm:$0xf] %vm2103_vm1, %v1946_v5  ;;  %v1126_v14 = vadd.f32 %v4086_v38, %v1125_v11  ;;  %v1251_v15 = vadd.f32 %v4086_v38, %v1250_v12 }
 0x1c8   :  { %2193 = vst.msk [vmem:[%s4327_s3 + $0x164] sm:$0xf] %vm2103_vm1, %v1996_v6  ;;  %v1654_v16 = vmul.f32 0.2, %v1373_v10  ;;  %v1704_v17 = vmul.f32 0.2, %v1498_v13 }
 0x1c9   :  { %v1555_v18 = vmul.f32 0.2, %v1126_v14  ;;  %v1605_v19 = vmul.f32 0.2, %v1251_v15  ;;  %2292 = vst.msk [vmem:[%s4327_s3 + $0x2f0] sm:$0xf] %vm2103_vm1, %v2095_v8 }
 0x1ca   :  { %v1850_v20 = vmax.f32 %v1373_v10, %v1654_v16  ;;  %v1900_v21 = vmax.f32 %v1498_v13, %v1704_v17 }
 0x1cb   :  { %v1751_v22 = vmax.f32 %v1126_v14, %v1555_v18  ;;  %v1801_v23 = vmax.f32 %v1251_v15, %v1605_v19 }
 0x1cc   :  { %v2046_v24 = vpack.c.bf16 %v1850_v20, %v1850_v20  ;;  %v2096_v28 = vpack.c.bf16 %v1900_v21, %v1900_v21 }
 0x1cd   :  { %v1947_v25 = vpack.c.bf16 %v1751_v22, %v1751_v22  ;;  %v1997_v26 = vpack.c.bf16 %v1801_v23, %v1801_v23  ;;  %v1375_v27 = vpop.f32.mrf.mxu2  ;;  %v1500_v29 = vpop.f32.mrf.mxu3 }
 0x1ce   :  { %2243 = vst.msk [vmem:[%s4327_s3 + $0x22c] sm:$0xf] %vm2103_vm1, %v2046_v24  ;;  %v1376_v30 = vadd.f32 %v4086_v38, %v1375_v27  ;;  %v1127_v31 = vpop.f32.mrf.mxu0  ;;  %v1252_v32 = vpop.f32.mrf.mxu1  ;;  %v1501_v33 = vadd.f32 %v4086_v38, %v1500_v29 }
 0x1cf   :  { %2144 = vst.msk [vmem:[%s4327_s3 + $0xa0] sm:$0xf] %vm2103_vm1, %v1947_v25  ;;  %v1128_v35 = vadd.f32 %v4086_v38, %v1127_v31  ;;  %v1253_v36 = vadd.f32 %v4086_v38, %v1252_v32 }
 0x1d0   :  { %2194 = vst.msk [vmem:[%s4327_s3 + $0x168] sm:$0xf] %vm2103_vm1, %v1997_v26  ;;  %v1655_v37 = vmul.f32 0.2, %v1376_v30  ;;  %v1705_v39 = vmul.f32 0.2, %v1501_v33 }
 0x1d1   :  { %v1556_v40 = vmul.f32 0.2, %v1128_v35  ;;  %v1606_v4 = vmul.f32 0.2, %v1253_v36  ;;  %2293 = vst.msk [vmem:[%s4327_s3 + $0x2f4] sm:$0xf] %vm2103_vm1, %v2096_v28 }
 0x1d2   :  { %v1851_v41 = vmax.f32 %v1376_v30, %v1655_v37  ;;  %v1901_v42 = vmax.f32 %v1501_v33, %v1705_v39 }
 0x1d3   :  { %v1752_v43 = vmax.f32 %v1128_v35, %v1556_v40  ;;  %v1802_v44 = vmax.f32 %v1253_v36, %v1606_v4 }
 0x1d4   :  { %v2047_v45 = vpack.c.bf16 %v1851_v41, %v1851_v41  ;;  %v2097_v49 = vpack.c.bf16 %v1901_v42, %v1901_v42 }
 0x1d5   :  { %v1948_v46 = vpack.c.bf16 %v1752_v43, %v1752_v43  ;;  %v1998_v47 = vpack.c.bf16 %v1802_v44, %v1802_v44  ;;  %v1377_v48 = vpop.f32.mrf.mxu2  ;;  %v1502_v50 = vpop.f32.mrf.mxu3 }
 0x1d6   :  { %2244 = vst.msk [vmem:[%s4327_s3 + $0x230] sm:$0xf] %vm2103_vm1, %v2047_v45  ;;  %v1378_v51 = vadd.f32 %v4086_v38, %v1377_v48  ;;  %v1130_v52 = vpop.f32.mrf.mxu0  ;;  %v1255_v53 = vpop.f32.mrf.mxu1  ;;  %v1503_v54 = vadd.f32 %v4086_v38, %v1502_v50 }
 0x1d7   :  { %2145 = vst.msk [vmem:[%s4327_s3 + $0xa4] sm:$0xf] %vm2103_vm1, %v1948_v46  ;;  %v1131_v55 = vadd.f32 %v4086_v38, %v1130_v52  ;;  %v1256_v56 = vadd.f32 %v4086_v38, %v1255_v53 }
 0x1d8   :  { %2195 = vst.msk [vmem:[%s4327_s3 + $0x16c] sm:$0xf] %vm2103_vm1, %v1998_v47  ;;  %v1656_v57 = vmul.f32 0.2, %v1378_v51  ;;  %v1706_v58 = vmul.f32 0.2, %v1503_v54 }
 0x1d9   :  { %v1557_v59 = vmul.f32 0.2, %v1131_v55  ;;  %v1607_v34 = vmul.f32 0.2, %v1256_v56  ;;  %2294 = vst.msk [vmem:[%s4327_s3 + $0x2f8] sm:$0xf] %vm2103_vm1, %v2097_v49 }
 0x1da   :  { %v1852_v60 = vmax.f32 %v1378_v51, %v1656_v57  ;;  %v1902_v61 = vmax.f32 %v1503_v54, %v1706_v58 }
 0x1db   :  { %v1753_v62 = vmax.f32 %v1131_v55, %v1557_v59  ;;  %v1803_v63 = vmax.f32 %v1256_v56, %v1607_v34 }
 0x1dc   :  { %v2048_v0 = vpack.c.bf16 %v1852_v60, %v1852_v60  ;;  %v2098_v5 = vpack.c.bf16 %v1902_v61, %v1902_v61 }
 0x1dd   :  { %v1949_v1 = vpack.c.bf16 %v1753_v62, %v1753_v62  ;;  %v1999_v2 = vpack.c.bf16 %v1803_v63, %v1803_v63  ;;  %v1380_v3 = vpop.f32.mrf.mxu2  ;;  %v1505_v6 = vpop.f32.mrf.mxu3 }
 0x1de   :  { %2245 = vst.msk [vmem:[%s4327_s3 + $0x234] sm:$0xf] %vm2103_vm1, %v2048_v0  ;;  %v1381_v7 = vadd.f32 %v4086_v38, %v1380_v3  ;;  %v1132_v8 = vpop.f32.mrf.mxu0  ;;  %v1257_v9 = vpop.f32.mrf.mxu1  ;;  %v1506_v10 = vadd.f32 %v4086_v38, %v1505_v6 }
 0x1df   :  { %2146 = vst.msk [vmem:[%s4327_s3 + $0xa8] sm:$0xf] %vm2103_vm1, %v1949_v1  ;;  %v1133_v11 = vadd.f32 %v4086_v38, %v1132_v8  ;;  %v1258_v12 = vadd.f32 %v4086_v38, %v1257_v9 }
 0x1e0   :  { %2196 = vst.msk [vmem:[%s4327_s3 + $0x170] sm:$0xf] %vm2103_vm1, %v1999_v2  ;;  %v1657_v13 = vmul.f32 0.2, %v1381_v7  ;;  %v1707_v14 = vmul.f32 0.2, %v1506_v10 }
 0x1e1   :  { %v1558_v15 = vmul.f32 0.2, %v1133_v11  ;;  %v1608_v16 = vmul.f32 0.2, %v1258_v12  ;;  %2295 = vst.msk [vmem:[%s4327_s3 + $0x2fc] sm:$0xf] %vm2103_vm1, %v2098_v5 }
 0x1e2   :  { %v1853_v17 = vmax.f32 %v1381_v7, %v1657_v13  ;;  %v1903_v18 = vmax.f32 %v1506_v10, %v1707_v14 }
 0x1e3   :  { %v1754_v19 = vmax.f32 %v1133_v11, %v1558_v15  ;;  %v1804_v20 = vmax.f32 %v1258_v12, %v1608_v16 }
 0x1e4   :  { %v2049_v21 = vpack.c.bf16 %v1853_v17, %v1853_v17  ;;  %v2099_v25 = vpack.c.bf16 %v1903_v18, %v1903_v18 }
 0x1e5   :  { %v1950_v22 = vpack.c.bf16 %v1754_v19, %v1754_v19  ;;  %v2000_v23 = vpack.c.bf16 %v1804_v20, %v1804_v20  ;;  %v1382_v24 = vpop.f32.mrf.mxu2  ;;  %v1507_v26 = vpop.f32.mrf.mxu3 }
 0x1e6   :  { %2246 = vst.msk [vmem:[%s4327_s3 + $0x238] sm:$0xf] %vm2103_vm1, %v2049_v21  ;;  %v1383_v27 = vadd.f32 %v4086_v38, %v1382_v24  ;;  %v1135_v28 = vpop.f32.mrf.mxu0  ;;  %v1260_v29 = vpop.f32.mrf.mxu1  ;;  %v1508_v30 = vadd.f32 %v4086_v38, %v1507_v26 }
 0x1e7   :  { %2147 = vst.msk [vmem:[%s4327_s3 + $0xac] sm:$0xf] %vm2103_vm1, %v1950_v22  ;;  %v1136_v31 = vadd.f32 %v4086_v38, %v1135_v28  ;;  %v1261_v32 = vadd.f32 %v4086_v38, %v1260_v29 }
 0x1e8   :  { %2197 = vst.msk [vmem:[%s4327_s3 + $0x174] sm:$0xf] %vm2103_vm1, %v2000_v23  ;;  %v1658_v33 = vmul.f32 0.2, %v1383_v27  ;;  %v1708_v35 = vmul.f32 0.2, %v1508_v30 }
 0x1e9   :  { %v1559_v36 = vmul.f32 0.2, %v1136_v31  ;;  %v1609_v37 = vmul.f32 0.2, %v1261_v32  ;;  %2296 = vst.msk [vmem:[%s4327_s3 + $0x300] sm:$0xf] %vm2103_vm1, %v2099_v25 }
 0x1ea   :  { %v1854_v39 = vmax.f32 %v1383_v27, %v1658_v33  ;;  %v1904_v40 = vmax.f32 %v1508_v30, %v1708_v35 }
 0x1eb   :  { %v1755_v4 = vmax.f32 %v1136_v31, %v1559_v36  ;;  %v1805_v41 = vmax.f32 %v1261_v32, %v1609_v37 }
 0x1ec   :  { %v2050_v42 = vpack.c.bf16 %v1854_v39, %v1854_v39  ;;  %v2100_v46 = vpack.c.bf16 %v1904_v40, %v1904_v40 }
 0x1ed   :  { %v1951_v43 = vpack.c.bf16 %v1755_v4, %v1755_v4  ;;  %v2001_v44 = vpack.c.bf16 %v1805_v41, %v1805_v41  ;;  %v1385_v45 = vpop.f32.mrf.mxu2  ;;  %v1510_v47 = vpop.f32.mrf.mxu3 }
 0x1ee   :  { %2247 = vst.msk [vmem:[%s4327_s3 + $0x23c] sm:$0xf] %vm2103_vm1, %v2050_v42  ;;  %v1386_v48 = vadd.f32 %v4086_v38, %v1385_v45  ;;  %v1137_v49 = vpop.f32.mrf.mxu0  ;;  %v1262_v50 = vpop.f32.mrf.mxu1  ;;  %v1511_v51 = vadd.f32 %v4086_v38, %v1510_v47 }
 0x1ef   :  { %2148 = vst.msk [vmem:[%s4327_s3 + $0xb0] sm:$0xf] %vm2103_vm1, %v1951_v43  ;;  %v1138_v52 = vadd.f32 %v4086_v38, %v1137_v49  ;;  %v1263_v53 = vadd.f32 %v4086_v38, %v1262_v50 }
 0x1f0   :  { %2198 = vst.msk [vmem:[%s4327_s3 + $0x178] sm:$0xf] %vm2103_vm1, %v2001_v44  ;;  %v1659_v54 = vmul.f32 0.2, %v1386_v48  ;;  %v1709_v55 = vmul.f32 0.2, %v1511_v51 }
 0x1f1   :  { %v1560_v56 = vmul.f32 0.2, %v1138_v52  ;;  %v1610_v57 = vmul.f32 0.2, %v1263_v53  ;;  %2297 = vst.msk [vmem:[%s4327_s3 + $0x304] sm:$0xf] %vm2103_vm1, %v2100_v46 }
 0x1f2   :  { %v1855_v58 = vmax.f32 %v1386_v48, %v1659_v54  ;;  %v1905_v59 = vmax.f32 %v1511_v51, %v1709_v55 }
 0x1f3   :  { %v1756_v34 = vmax.f32 %v1138_v52, %v1560_v56  ;;  %v1806_v60 = vmax.f32 %v1263_v53, %v1610_v57 }
 0x1f4   :  { %v2051_v61 = vpack.c.bf16 %v1855_v58, %v1855_v58  ;;  %v2101_v1 = vpack.c.bf16 %v1905_v59, %v1905_v59 }
 0x1f5   :  { %v1952_v62 = vpack.c.bf16 %v1756_v34, %v1756_v34  ;;  %v2002_v63 = vpack.c.bf16 %v1806_v60, %v1806_v60  ;;  %v1387_v0 = vpop.f32.mrf.mxu2  ;;  %v1512_v2 = vpop.f32.mrf.mxu3 }
 0x1f6   :  { %2248 = vst.msk [vmem:[%s4327_s3 + $0x240] sm:$0xf] %vm2103_vm1, %v2051_v61  ;;  %v1388_v3 = vadd.f32 %v4086_v38, %v1387_v0  ;;  %v1140_v5 = vpop.f32.mrf.mxu0  ;;  %v1265_v6 = vpop.f32.mrf.mxu1  ;;  %v1513_v7 = vadd.f32 %v4086_v38, %v1512_v2 }
 0x1f7   :  { %2149 = vst.msk [vmem:[%s4327_s3 + $0xb4] sm:$0xf] %vm2103_vm1, %v1952_v62  ;;  %v1141_v8 = vadd.f32 %v4086_v38, %v1140_v5  ;;  %v1266_v9 = vadd.f32 %v4086_v38, %v1265_v6 }
 0x1f8   :  { %2199 = vst.msk [vmem:[%s4327_s3 + $0x17c] sm:$0xf] %vm2103_vm1, %v2002_v63  ;;  %v1660_v10 = vmul.f32 0.2, %v1388_v3  ;;  %v1710_v11 = vmul.f32 0.2, %v1513_v7 }
 0x1f9   :  { %v1561_v12 = vmul.f32 0.2, %v1141_v8  ;;  %v1611_v13 = vmul.f32 0.2, %v1266_v9  ;;  %2298 = vst.msk [vmem:[%s4327_s3 + $0x308] sm:$0xf] %vm2103_vm1, %v2101_v1 }
 0x1fa   :  { %v1856_v14 = vmax.f32 %v1388_v3, %v1660_v10  ;;  %v1906_v15 = vmax.f32 %v1513_v7, %v1710_v11 }
 0x1fb   :  { %v1757_v16 = vmax.f32 %v1141_v8, %v1561_v12  ;;  %v1807_v17 = vmax.f32 %v1266_v9, %v1611_v13 }
 0x1fc   :  { %v2052_v18 = vpack.c.bf16 %v1856_v14, %v1856_v14  ;;  %v2102_v22 = vpack.c.bf16 %v1906_v15, %v1906_v15 }
 0x1fd   :  { %v1953_v19 = vpack.c.bf16 %v1757_v16, %v1757_v16  ;;  %v2003_v20 = vpack.c.bf16 %v1807_v17, %v1807_v17  ;;  %v1390_v21 = vpop.f32.mrf.mxu2 }
 0x1fe   :  { %2249 = vst.msk [vmem:[%s4327_s3 + $0x244] sm:$0xf] %vm2103_vm1, %v2052_v18  ;;  %v1391_v23 = vadd.f32 %v4086_v38, %v1390_v21  ;;  %v1142_v24 = vpop.f32.mrf.mxu0  ;;  %v1267_v25 = vpop.f32.mrf.mxu1 }
 0x1ff   :  { %2150 = vst.msk [vmem:[%s4327_s3 + $0xb8] sm:$0xf] %vm2103_vm1, %v1953_v19  ;;  %v1143_v26 = vadd.f32 %v4086_v38, %v1142_v24  ;;  %v1268_v27 = vadd.f32 %v4086_v38, %v1267_v25 }
 0x200   :  { %2200 = vst.msk [vmem:[%s4327_s3 + $0x180] sm:$0xf] %vm2103_vm1, %v2003_v20  ;;  %v1661_v28 = vmul.f32 0.2, %v1391_v23 }
 0x201   :  { %v1562_v29 = vmul.f32 0.2, %v1143_v26  ;;  %v1612_v30 = vmul.f32 0.2, %v1268_v27  ;;  %2299 = vst.msk [vmem:[%s4327_s3 + $0x30c] sm:$0xf] %vm2103_vm1, %v2102_v22 }
 0x202   :  { %v1857_v31 = vmax.f32 %v1391_v23, %v1661_v28 }
 0x203   :  { %v1758_v32 = vmax.f32 %v1143_v26, %v1562_v29  ;;  %v1808_v33 = vmax.f32 %v1268_v27, %v1612_v30 }
 0x204   :  { %v2053_v35 = vpack.c.bf16 %v1857_v31, %v1857_v31 }
 0x205   :  { %v1954_v36 = vpack.c.bf16 %v1758_v32, %v1758_v32  ;;  %v2004_v37 = vpack.c.bf16 %v1808_v33, %v1808_v33  ;;  %v1392_v39 = vpop.f32.mrf.mxu2 }
 0x206   :  { %2250 = vst.msk [vmem:[%s4327_s3 + $0x248] sm:$0xf] %vm2103_vm1, %v2053_v35  ;;  %v1393_v40 = vadd.f32 %v4086_v38, %v1392_v39  ;;  %v1145_v4 = vpop.f32.mrf.mxu0  ;;  %v1270_v41 = vpop.f32.mrf.mxu1 }
 0x207   :  { %2151 = vst.msk [vmem:[%s4327_s3 + $0xbc] sm:$0xf] %vm2103_vm1, %v1954_v36  ;;  %v1146_v42 = vadd.f32 %v4086_v38, %v1145_v4  ;;  %v1271_v43 = vadd.f32 %v4086_v38, %v1270_v41 }
 0x208   :  { %2201 = vst.msk [vmem:[%s4327_s3 + $0x184] sm:$0xf] %vm2103_vm1, %v2004_v37  ;;  %v1662_v44 = vmul.f32 0.2, %v1393_v40 }
 0x209   :  { %v1563_v45 = vmul.f32 0.2, %v1146_v42  ;;  %v1613_v46 = vmul.f32 0.2, %v1271_v43 }
 0x20a   :  { %v1858_v47 = vmax.f32 %v1393_v40, %v1662_v44 }
 0x20b   :  { %v1759_v48 = vmax.f32 %v1146_v42, %v1563_v45  ;;  %v1809_v49 = vmax.f32 %v1271_v43, %v1613_v46 }
 0x20c   :  { %v2054_v50 = vpack.c.bf16 %v1858_v47, %v1858_v47 }
 0x20d   :  { %v1955_v51 = vpack.c.bf16 %v1759_v48, %v1759_v48  ;;  %v2005_v52 = vpack.c.bf16 %v1809_v49, %v1809_v49  ;;  %v1395_v53 = vpop.f32.mrf.mxu2 }
 0x20e   :  { %2251 = vst.msk [vmem:[%s4327_s3 + $0x24c] sm:$0xf] %vm2103_vm1, %v2054_v50  ;;  %v1396_v54 = vadd.f32 %v4086_v38, %v1395_v53  ;;  %v1147_v55 = vpop.f32.mrf.mxu0  ;;  %v1272_v56 = vpop.f32.mrf.mxu1 }
 0x20f   :  { %2152 = vst.msk [vmem:[%s4327_s3 + $0xc0] sm:$0xf] %vm2103_vm1, %v1955_v51  ;;  %v1148_v57 = vadd.f32 %v4086_v38, %v1147_v55  ;;  %v1273_v58 = vadd.f32 %v4086_v38, %v1272_v56 }
 0x210   :  { %2202 = vst.msk [vmem:[%s4327_s3 + $0x188] sm:$0xf] %vm2103_vm1, %v2005_v52  ;;  %v1663_v59 = vmul.f32 0.2, %v1396_v54 }
 0x211   :  { %v1564_v34 = vmul.f32 0.2, %v1148_v57  ;;  %v1614_v60 = vmul.f32 0.2, %v1273_v58 }
 0x212   :  { %v1859_v61 = vmax.f32 %v1396_v54, %v1663_v59 }
 0x213   :  { %v1760_v62 = vmax.f32 %v1148_v57, %v1564_v34  ;;  %v1810_v63 = vmax.f32 %v1273_v58, %v1614_v60 }
 0x214   :  { %v2055_v0 = vpack.c.bf16 %v1859_v61, %v1859_v61 }
 0x215   :  { %v1956_v1 = vpack.c.bf16 %v1760_v62, %v1760_v62  ;;  %v2006_v2 = vpack.c.bf16 %v1810_v63, %v1810_v63  ;;  %v1397_v3 = vpop.f32.mrf.mxu2 }
 0x216   :  { %2252 = vst.msk [vmem:[%s4327_s3 + $0x250] sm:$0xf] %vm2103_vm1, %v2055_v0  ;;  %v1398_v5 = vadd.f32 %v4086_v38, %v1397_v3 }
 0x217   :  { %2153 = vst.msk [vmem:[%s4327_s3 + $0xc4] sm:$0xf] %vm2103_vm1, %v1956_v1 }
 0x218   :  { %2203 = vst.msk [vmem:[%s4327_s3 + $0x18c] sm:$0xf] %vm2103_vm1, %v2006_v2  ;;  %v1664_v6 = vmul.f32 0.2, %v1398_v5 }
 0x21a   :  { %v1860_v7 = vmax.f32 %v1398_v5, %v1664_v6 }
 0x21c   :  { %v2056_v8 = vpack.c.bf16 %v1860_v7, %v1860_v7 }
 0x21e   :  { %2253 = vst.msk [vmem:[%s4327_s3 + $0x254] sm:$0xf] %vm2103_vm1, %v2056_v8 }

// kernel: discriminator_forward.3
= control target key start
LH: loop header
LB: loop body
LE: loop exit
PB: predicated region body
PF: predicated region fallthrough
CT: control target
= control target key end

     0   :  { %v1621_v0 = vmov 0.0   ;;  %s1662_s24 = smov 0   ;;  %s1976_s0 = inlined_call_operand.vmem [shape: bf16[49,8,800], index: 0, kind: input, shape index: {}]   ;;  %s1977_s1 = inlined_call_operand.vmem [shape: bf16[800,64], index: 1, kind: input, shape index: {}]   ;;  %s1978_s2 = inlined_call_operand.vmem [shape: f32[1,64], index: 2, kind: input, shape index: {}]   ;;  %s1979_s3 = inlined_call_operand.vmem [shape: bf16[49,64,512], index: 3, kind: input, shape index: {}]   ;;  %s1980_s4 = inlined_call_operand.vmem [shape: f32[1,512], index: 4, kind: input, shape index: {}]   ;;  %s1981_s5 = inlined_call_operand.vmem [shape: bf16[512,128], index: 5, kind: input, shape index: {}]   ;;  %s1982_s6 = inlined_call_operand.vmem [shape: f32[1,128], index: 6, kind: input, shape index: {}]   ;;  %s1983_s7 = inlined_call_operand.vmem [shape: f32[8,128], index: 7, kind: output, shape index: {}]  }
   0x1   :  { %27 = vst [vmem:[#allocation2 + $0x10] sm:$0xff] %v1621_v0 }
   0x2   :  { %28 = vst [vmem:[#allocation2] sm:$0xff] %v1621_v0 }
   0x3   :  { %29 = vst [vmem:[#allocation2 + $0x18] sm:$0xff] %v1621_v0 }
   0x4   :  { %30 = vst [vmem:[#allocation2 + $0x8] sm:$0xff] %v1621_v0 }
   0x5 LB: > { %v1506_v1 = vld [vmem:[%s1977_s1 + $0x38] sm:$0xff]  ;;  %v1505_v4 = vld [vmem:[%s1977_s1 + $0x30] sm:$0xff]  ;;  %v1504_v9 = vld [vmem:[%s1977_s1 + $0x28] sm:$0xff]  ;;  %s1498_s20 = smul.u32 28, %s1619_s24  ;;  %vm472_vm0 = vcmask 261120   ;;  %vm673_vm1 = vcmask 523264   ;;  %s1619_s24 = sphi %s1662_s24, %s36_s24  }
   0x6   : > { %v1514_v2 = vld [vmem:[%s1977_s1 + $0x78] sm:$0xff]  ;;  %476 = vmatpush.bf16.msra.mxu0 %v1506_v1  ;;  %v1513_v5 = vld [vmem:[%s1977_s1 + $0x70] sm:$0xff]  ;;  %v1512_v10 = vld [vmem:[%s1977_s1 + $0x68] sm:$0xff] }
   0x7   : > { %v1522_v3 = vld [vmem:[%s1977_s1 + $0xb8] sm:$0xff]  ;;  %489 = vmatpush.bf16.msra.mxu1 %v1514_v2  ;;  %v1521_v6 = vld [vmem:[%s1977_s1 + $0xb0] sm:$0xff]  ;;  %v1520_v11 = vld [vmem:[%s1977_s1 + $0xa8] sm:$0xff]  ;;  %s1743_s9 = scalar_lea.vmem %s1976_s0, %s1498_s20 }
   0x8   : > { %502 = vmatpush.bf16.msra.mxu2 %v1522_v3  ;;  %v1530_v7 = vld [vmem:[%s1977_s1 + $0xf8] sm:$0xff]  ;;  %v1529_v8 = vld [vmem:[%s1977_s1 + $0xf0] sm:$0xff]  ;;  %v1528_v12 = vld [vmem:[%s1977_s1 + $0xe8] sm:$0xff] }
   0x9   : > { %515 = vmatpush.bf16.msra.mxu3 %v1530_v7  ;;  %v1503_v13 = vld [vmem:[%s1977_s1 + $0x20] sm:$0xff]  ;;  %v1502_v17 = vld [vmem:[%s1977_s1 + $0x18] sm:$0xff]  ;;  %v1501_v21 = vld [vmem:[%s1977_s1 + $0x10] sm:$0xff] }
   0xa   : > { %477 = vmatpush.bf16.msra.mxu0 %v1505_v4  ;;  %v1511_v14 = vld [vmem:[%s1977_s1 + $0x60] sm:$0xff]  ;;  %v1510_v18 = vld [vmem:[%s1977_s1 + $0x58] sm:$0xff]  ;;  %v1509_v22 = vld [vmem:[%s1977_s1 + $0x50] sm:$0xff] }
   0xb   : > { %490 = vmatpush.bf16.msra.mxu1 %v1513_v5  ;;  %v1519_v15 = vld [vmem:[%s1977_s1 + $0xa0] sm:$0xff]  ;;  %v1518_v19 = vld [vmem:[%s1977_s1 + $0x98] sm:$0xff]  ;;  %v1517_v23 = vld [vmem:[%s1977_s1 + $0x90] sm:$0xff] }
   0xc   : > { %503 = vmatpush.bf16.msra.mxu2 %v1521_v6  ;;  %v1527_v16 = vld [vmem:[%s1977_s1 + $0xe0] sm:$0xff]  ;;  %v1526_v20 = vld [vmem:[%s1977_s1 + $0xd8] sm:$0xff]  ;;  %v1525_v24 = vld [vmem:[%s1977_s1 + $0xd0] sm:$0xff] }
   0xd   : > { %516 = vmatpush.bf16.msra.mxu3 %v1529_v8  ;;  %v1500_v25 = vld [vmem:[%s1977_s1 + $0x8] sm:$0xff]  ;;  %v40_v27 = vld [vmem:[%s1743_s9] sm:$0xff]  ;;  %v1538_v35 = vld [vmem:[%s1977_s1 + $0x138] sm:$0xff] }
   0xe   : > { %478 = vmatpush.bf16.msra.mxu0 %v1504_v9  ;;  %v1508_v26 = vld [vmem:[%s1977_s1 + $0x48] sm:$0xff]  ;;  %v152_v30 = vunpack.c.l.b16 %v40_v27  ;;  %v153_v32 = vunpack.c.h.b16 %v40_v27  ;;  %v1499_v33 = vld [vmem:[%s1977_s1] sm:$0xff]  ;;  %v1546_v36 = vld [vmem:[%s1977_s1 + $0x178] sm:$0xff] }
   0xf   : > { %491 = vmatpush.bf16.msra.mxu1 %v1512_v10  ;;  %v1516_v28 = vld [vmem:[%s1977_s1 + $0x88] sm:$0xff]  ;;  %v1507_v34 = vld [vmem:[%s1977_s1 + $0x40] sm:$0xff]  ;;  %v1537_v44 = vld [vmem:[%s1977_s1 + $0x130] sm:$0xff] }
  0x10   : > { %504 = vmatpush.bf16.msra.mxu2 %v1520_v11  ;;  %v41_v29 = vld [vmem:[%s1743_s9 + $0x8] sm:$0xff]  ;;  %v1515_v37 = vld [vmem:[%s1977_s1 + $0x80] sm:$0xff]  ;;  %v159_v39 = vpack.c.b16 %v152_v30, %v152_v30  ;;  %v160_v40 = vpack.c.b16 %v153_v32, %v153_v32  ;;  %v1545_v45 = vld [vmem:[%s1977_s1 + $0x170] sm:$0xff] }
  0x11   : > { %517 = vmatpush.bf16.msra.mxu3 %v1528_v12  ;;  %v1524_v31 = vld [vmem:[%s1977_s1 + $0xc8] sm:$0xff]  ;;  %v154_v38 = vunpack.c.l.b16 %v41_v29  ;;  %v155_v41 = vunpack.c.h.b16 %v41_v29  ;;  %v1523_v42 = vld [vmem:[%s1977_s1 + $0xc0] sm:$0xff]  ;;  %v43_v53 = vld [vmem:[%s1743_s9 + $0x18] sm:$0xf] }
  0x12   : > { %479 = vmatpush.bf16.msra.mxu0 %v1503_v13  ;;  %v1548_v43 = vld [vmem:[%s1977_s1 + $0x188] sm:$0xff]  ;;  %v1547_v48 = vld [vmem:[%s1977_s1 + $0x180] sm:$0xff]  ;;  %v1534_v54 = vld [vmem:[%s1977_s1 + $0x118] sm:$0xff]  ;;  %v158_v56 = vunpack.c.l.b16 %v43_v53 }
  0x13   : > { %492 = vmatpush.bf16.msra.mxu1 %v1511_v14  ;;  %v161_v46 = vpack.c.b16 %v154_v38, %v154_v38  ;;  %v162_v47 = vpack.c.b16 %v155_v41, %v155_v41  ;;  %v1536_v49 = vld [vmem:[%s1977_s1 + $0x128] sm:$0xff]  ;;  %v1535_v51 = vld [vmem:[%s1977_s1 + $0x120] sm:$0xff]  ;;  %v1542_v55 = vld [vmem:[%s1977_s1 + $0x158] sm:$0xff] }
  0x14   : > { %505 = vmatpush.bf16.msra.mxu2 %v1519_v15  ;;  %v1544_v50 = vld [vmem:[%s1977_s1 + $0x168] sm:$0xff]  ;;  %v1543_v52 = vld [vmem:[%s1977_s1 + $0x160] sm:$0xff]  ;;  %v1533_v57 = vld [vmem:[%s1977_s1 + $0x110] sm:$0xff]  ;;  %v165_v59 = vpack.c.b16 %v158_v56, %v158_v56 }
  0x15   : > { %518 = vmatpush.bf16.msra.mxu3 %v1527_v16  ;;  %v1541_v58 = vld [vmem:[%s1977_s1 + $0x150] sm:$0xff]  ;;  %v1532_v60 = vld [vmem:[%s1977_s1 + $0x108] sm:$0xff]  ;;  %v1531_v1 = vld [vmem:[%s1977_s1 + $0x100] sm:$0xff] }
  0x16   : > { %480 = vmatpush.bf16.msra.mxu0 %v1502_v17  ;;  %v1540_v61 = vld [vmem:[%s1977_s1 + $0x148] sm:$0xff]  ;;  %v42_v62 = vld [vmem:[%s1743_s9 + $0x10] sm:$0xff]  ;;  %v1539_v2 = vld [vmem:[%s1977_s1 + $0x140] sm:$0xff]  ;;  %s1549_s9 = sshll.u32 %s1619_s24, 7  ;;  %s36_s24 = sadd.s32 1, %s1619_s24  }
  0x17   : > { %493 = vmatpush.bf16.msra.mxu1 %v1510_v18  ;;  %v156_v63 = vunpack.c.l.b16 %v42_v62  ;;  %v157_v0 = vunpack.c.h.b16 %v42_v62  ;;  %s1831_s22 = scalar_lea.vmem %s1979_s3, %s1549_s9  ;;  %p33_p0 = scmp.ge.s32.totalorder %s36_s24, 49  }
  0x18   : > { %506 = vmatpush.bf16.msra.mxu2 %v1518_v19  ;;  %v1352_v5 = vld [vmem:[%s1831_s22 + $0x60] sm:$0xf]  ;;  %v1564_v6 = vld [vmem:[%s1831_s22 + $0x6c] sm:$0xf0]  ;;  %v1562_v7 = vld [vmem:[%s1831_s22 + $0x64] sm:$0xf] }
  0x19   : > { %519 = vmatpush.bf16.msra.mxu3 %v1526_v20  ;;  %v163_v3 = vpack.c.b16 %v156_v63, %v156_v63  ;;  %v164_v4 = vpack.c.b16 %v157_v0, %v157_v0  ;;  %v1353_v8 = vor.u32 %v1564_v6, %v1352_v5  ;;  %v1354_v9 = vld [vmem:[%s1831_s22 + $0x70] sm:$0xf0]  ;;  %v1563_v10 = vld [vmem:[%s1831_s22 + $0x6c] sm:$0xf]  ;;  %v1362_v11 = vld [vmem:[%s1831_s22 + $0x78] sm:$0xf0] }
  0x1a   : > { %481 = vmatpush.bf16.msra.mxu0 %v1501_v21  ;;  %v1357_v12 = vor.u32 %v1562_v7, %v1354_v9  ;;  %v1365_v13 = vor.u32 %v1563_v10, %v1362_v11  ;;  %v1336_v14 = vld [vmem:[%s1831_s22 + $0x40] sm:$0xf]  ;;  %v1560_v15 = vld [vmem:[%s1831_s22 + $0x4c] sm:$0xf0]  ;;  %v1558_v16 = vld [vmem:[%s1831_s22 + $0x44] sm:$0xf] }
  0x1b   : > { %494 = vmatpush.bf16.msra.mxu1 %v1509_v22  ;;  %v1337_v17 = vor.u32 %v1560_v15, %v1336_v14  ;;  %v1338_v18 = vld [vmem:[%s1831_s22 + $0x50] sm:$0xf0]  ;;  %v1559_v19 = vld [vmem:[%s1831_s22 + $0x4c] sm:$0xf]  ;;  %v1346_v20 = vld [vmem:[%s1831_s22 + $0x58] sm:$0xf0] }
  0x1c   : > { %507 = vmatpush.bf16.msra.mxu2 %v1517_v23  ;;  %v1341_v21 = vor.u32 %v1558_v16, %v1338_v18  ;;  %v1349_v22 = vor.u32 %v1559_v19, %v1346_v20  ;;  %v1554_v27 = vld [vmem:[%s1831_s22 + $0x24] sm:$0xf]  ;;  %v1322_v29 = vld [vmem:[%s1831_s22 + $0x30] sm:$0xf0]  ;;  %v1555_v30 = vld [vmem:[%s1831_s22 + $0x2c] sm:$0xf] }
  0x1d   : > { %520 = vmatpush.bf16.msra.mxu3 %v1525_v24  ;;  %v1325_v32 = vor.u32 %v1554_v27, %v1322_v29  ;;  %v1306_v38 = vld [vmem:[%s1831_s22 + $0x10] sm:$0xf0]  ;;  %v572_v14 = vld [vmem:[#allocation2 + $0x8] sm:$0xff]  ;;  %v570_v18 = vld [vmem:[#allocation2] sm:$0xff] }
  0x1e   : > { %482 = vmatpush.bf16.msra.mxu0 %v1500_v25  ;;  %v1320_v25 = vld [vmem:[%s1831_s22 + $0x20] sm:$0xf] }
  0x1f   : > { %495 = vmatpush.bf16.msra.mxu1 %v1508_v26  ;;  %v1556_v26 = vld [vmem:[%s1831_s22 + $0x2c] sm:$0xf0] }
  0x20   : > { %508 = vmatpush.bf16.msra.mxu2 %v1516_v28  ;;  %v1321_v28 = vor.u32 %v1556_v26, %v1320_v25  ;;  %v571_v26 = vld [vmem:[#allocation2 + $0x18] sm:$0xff] }
  0x21   : > { %521 = vmatpush.bf16.msra.mxu3 %v1524_v31  ;;  %v1330_v31 = vld [vmem:[%s1831_s22 + $0x38] sm:$0xf0] }
  0x22   : > { %483 = vmatpush.bf16.msra.mxu0 %v1499_v33  ;;  %v1333_v33 = vor.u32 %v1555_v30, %v1330_v31  ;;  %v1573_v30 = vld [vmem:[%s1981_s5 + $0x38] sm:$0xff] (%p33_p0) }
  0x23   : > { %496 = vmatpush.bf16.msra.mxu1 %v1507_v34  ;;  %v1304_v34 = vld [vmem:[%s1831_s22] sm:$0xf]  ;;  %v1581_v31 = vld [vmem:[%s1981_s5 + $0x78] sm:$0xff] (%p33_p0) }
  0x24   : > { %509 = vmatpush.bf16.msra.mxu2 %v1515_v37 }
  0x25   : > { %484 = vmatmul.bf16.vlgmr.msra.gmra.mxu0 %v159_v39  ;;  %522 = vmatpush.bf16.msra.mxu3 %v1523_v42  ;;  %v1551_v39 = vld [vmem:[%s1831_s22 + $0xc] sm:$0xf] }
  0x26   : > { %528 = vmatpush.bf16.msrb.mxu0 %v1538_v35  ;;  %497 = vmatmul.bf16.vlgmr.msra.gmra.mxu1 %v160_v40  ;;  %v1552_v35 = vld [vmem:[%s1831_s22 + $0xc] sm:$0xf0]  ;;  %v1314_v40 = vld [vmem:[%s1831_s22 + $0x18] sm:$0xf0] }
  0x27   : > { %541 = vmatpush.bf16.msrb.mxu1 %v1546_v36  ;;  %510 = vmatmul.bf16.vlgmr.msra.gmra.mxu2 %v161_v46  ;;  %v1550_v36 = vld [vmem:[%s1831_s22 + $0x4] sm:$0xf]  ;;  %v1305_v37 = vor.u32 %v1552_v35, %v1304_v34  ;;  %v1317_v42 = vor.u32 %v1551_v39, %v1314_v40  ;;  %v1565_v46 = vld [vmem:[%s1831_s22 + $0x74] sm:$0xf0]  ;;  %v1572_v34 = vld [vmem:[%s1981_s5 + $0x30] sm:$0xff] (%p33_p0) }
  0x28   : > { %560 = vmatpush.bf16.msrb.mxu2 %v1548_v43  ;;  %523 = vmatmul.bf16.vlgmr.msra.gmra.mxu3 %v162_v47  ;;  %v1309_v41 = vor.u32 %v1550_v36, %v1306_v38  ;;  %v1580_v35 = vld [vmem:[%s1981_s5 + $0x70] sm:$0xff] (%p33_p0)  ;;  %v1571_v38 = vld [vmem:[%s1981_s5 + $0x28] sm:$0xff] (%p33_p0) }
  0x29   : > { %681 = vmatpush.bf16.msrb.mxu3 %v1353_v8  ;;  %v1588_v36 = vld [vmem:[%s1981_s5 + $0xb0] sm:$0xff] (%p33_p0)  ;;  %v1579_v39 = vld [vmem:[%s1981_s5 + $0x68] sm:$0xff] (%p33_p0) }
  0x2a   : > { %529 = vmatpush.bf16.msrb.mxu0 %v1537_v44  ;;  %v1587_v40 = vld [vmem:[%s1981_s5 + $0xa8] sm:$0xff] (%p33_p0) }
  0x2b   : > { %542 = vmatpush.bf16.msrb.mxu1 %v1545_v45  ;;  %v1360_v45 = vld [vmem:[%s1831_s22 + $0x68] sm:$0xf] }
  0x2c   : > { %561 = vmatpush.bf16.msrb.mxu2 %v1547_v48  ;;  %v1361_v48 = vor.u32 %v1565_v46, %v1360_v45  ;;  %v1594_v45 = vld [vmem:[%s1981_s5 + $0xe0] sm:$0xff] (%p33_p0) }
  0x2d   : > { %682 = vmatpush.bf16.msrb.mxu3 %v1337_v17  ;;  %v569_v17 = vld [vmem:[#allocation2 + $0x10] sm:$0xff]  ;;  %v741_v46 = vld [vmem:[%s1980_s4] sm:$0xf] (%p33_p0) }
  0x2e   : > { %530 = vmatpush.bf16.msrb.mxu0 %v1536_v49 }
  0x2f   : > { %543 = vmatpush.bf16.msrb.mxu1 %v1544_v50  ;;  %v1344_v50 = vld [vmem:[%s1831_s22 + $0x48] sm:$0xf] }
  0x30   : > { %694 = vmatpush.bf16.msra.mxu2 %v1357_v12 }
  0x31   : > { %683 = vmatpush.bf16.msrb.mxu3 %v1321_v28 }
  0x32   : > { %531 = vmatpush.bf16.msrb.mxu0 %v1535_v51  ;;  %v1561_v51 = vld [vmem:[%s1831_s22 + $0x54] sm:$0xf0] }
  0x33   : > { %544 = vmatpush.bf16.msrb.mxu1 %v1543_v52  ;;  %v1607_v52 = vld [vmem:[%s1978_s2] ss:$0 sm:$0xff]  ;;  %v1345_v53 = vor.u32 %v1561_v51, %v1344_v50  ;;  %v744_v50 = vperm.slane (%p33_p0), %v741_v46, 1  ;;  %v1585_v51 = vld [vmem:[%s1981_s5 + $0x98] sm:$0xff] (%p33_p0) }
  0x34   : > { %695 = vmatpush.bf16.msra.mxu2 %v1341_v21 }
  0x35   : > { %684 = vmatpush.bf16.msrb.mxu3 %v1305_v37  ;;  %v1596_v37 = vld [vmem:[%s1981_s5 + $0xf0] sm:$0xff] (%p33_p0) }
  0x36   : > { %532 = vmatpush.bf16.msrb.mxu0 %v1534_v54  ;;  %v1328_v54 = vld [vmem:[%s1831_s22 + $0x28] sm:$0xf] }
  0x37   : > { %545 = vmatpush.bf16.msrb.mxu1 %v1542_v55  ;;  %1299 = vmatmul.msk.bf16.vlgmr.msrb.gmra.mxu2 %vm472_vm0, %v165_v59  ;;  %v1557_v55 = vld [vmem:[%s1831_s22 + $0x34] sm:$0xf0] }
  0x38   : > { %696 = vmatpush.bf16.msra.mxu2 %v1325_v32  ;;  %v1329_v56 = vor.u32 %v1557_v55, %v1328_v54  ;;  %v1553_v59 = vld [vmem:[%s1831_s22 + $0x14] sm:$0xf0]  ;;  %v745_v54 = vperm.slane (%p33_p0), %v741_v46, 2  ;;  %v746_v55 = vperm.slane (%p33_p0), %v741_v46, 3 }
  0x39   : > { %707 = vmatpush.bf16.msra.mxu3 %v1361_v48  ;;  %v1589_v32 = vld [vmem:[%s1981_s5 + $0xb8] sm:$0xff] (%p33_p0) }
  0x3a   : > { %533 = vmatpush.bf16.msrb.mxu0 %v1533_v57  ;;  %v1577_v48 = vld [vmem:[%s1981_s5 + $0x58] sm:$0xff] (%p33_p0) }
  0x3b   : > { %546 = vmatpush.bf16.msrb.mxu1 %v1541_v58  ;;  %v1312_v58 = vld [vmem:[%s1831_s22 + $0x8] sm:$0xf] }
  0x3c   : > { %697 = vmatpush.bf16.msra.mxu2 %v1309_v41  ;;  %v1313_v62 = vor.u32 %v1553_v59, %v1312_v58  ;;  %v1595_v41 = vld [vmem:[%s1981_s5 + $0xe8] sm:$0xff] (%p33_p0) }
  0x3d   : > { %708 = vmatpush.bf16.msra.mxu3 %v1345_v53 }
  0x3e   : > { %534 = vmatpush.bf16.msrb.mxu0 %v1532_v60 }
  0x3f   : > { %547 = vmatpush.bf16.msrb.mxu1 %v1540_v61 }
  0x41   : > { %709 = vmatpush.bf16.msra.mxu3 %v1329_v56  ;;  %v1593_v56 = vld [vmem:[%s1981_s5 + $0xd8] sm:$0xff] (%p33_p0) }
  0x42   : > { %535 = vmatpush.bf16.msrb.mxu0 %v1531_v1 }
  0x43   : > { %548 = vmatpush.bf16.msrb.mxu1 %v1539_v2 }
  0x45   : > { %536 = vmatmul.bf16.vlgmr.msrb.gmra.mxu0 %v163_v3  ;;  %710 = vmatpush.bf16.msra.mxu3 %v1313_v62  ;;  %v1576_v62 = vld [vmem:[%s1981_s5 + $0x50] sm:$0xff] (%p33_p0) }
  0x46   : > { %549 = vmatmul.bf16.vlgmr.msrb.gmra.mxu1 %v164_v4  ;;  %720 = vmatpush.bf16.msra.mxu0 %v1365_v13 }
  0x47   :  { %1040 = vmatpush.bf16.msra.mxu1 (%p33_p0), %v1581_v31 }
  0x4a   : > { %721 = vmatpush.bf16.msra.mxu0 %v1349_v22 }
  0x4b   :  { %1041 = vmatpush.bf16.msra.mxu1 (%p33_p0), %v1580_v35 }
  0x4e   : > { %722 = vmatpush.bf16.msra.mxu0 %v1333_v33  ;;  %v1597_v33 = vld [vmem:[%s1981_s5 + $0xf8] sm:$0xff] (%p33_p0) }
  0x4f   :  { %1042 = vmatpush.bf16.msra.mxu1 (%p33_p0), %v1579_v39 }
  0x52   : > { %723 = vmatpush.bf16.msra.mxu0 %v1317_v42  ;;  %v1570_v42 = vld [vmem:[%s1981_s5 + $0x20] sm:$0xff] (%p33_p0) }
  0xa2   : > { %v485_v23 = vpop.f32.mrf.mxu0 }
  0xa3   : > { %v498_v24 = vpop.f32.mrf.mxu1  ;;  %v486_v57 = vadd.f32 %v1607_v52, %v485_v23 }
  0xa5   : > { %v499_v63 = vadd.f32 %v498_v24, %v486_v57 }
  0xaa   : > { %v487_v43 = vpop.f32.mrf.mxu0  ;;  %v511_v47 = vpop.f32.mrf.mxu2 }
  0xab   : > { %v500_v44 = vpop.f32.mrf.mxu1  ;;  %v524_v49 = vpop.f32.mrf.mxu3  ;;  %v512_v0 = vadd.f32 %v511_v47, %v499_v63  ;;  %v1578_v43 = vld [vmem:[%s1981_s5 + $0x60] sm:$0xff] (%p33_p0)  ;;  %v1569_v47 = vld [vmem:[%s1981_s5 + $0x18] sm:$0xff] (%p33_p0) }
  0xac   :  { %v1586_v44 = vld [vmem:[%s1981_s5 + $0xa0] sm:$0xff] (%p33_p0)  ;;  %1043 = vmatpush.bf16.msra.mxu1 (%p33_p0), %v1578_v43 }
  0xad   : > { %v525_v2 = vadd.f32 %v524_v49, %v512_v0  ;;  %v743_v49 = vperm.slane (%p33_p0), %v741_v46, 0 }
  0xb0   :  { %1044 = vmatpush.bf16.msra.mxu1 (%p33_p0), %v1577_v48 }
  0xb2   : > { %v513_v60 = vpop.f32.mrf.mxu2 }
  0xb3   : > { %v526_v61 = vpop.f32.mrf.mxu3 }
  0xb4   :  { %v1568_v61 = vld [vmem:[%s1981_s5 + $0x10] sm:$0xff] (%p33_p0)  ;;  %1045 = vmatpush.bf16.msra.mxu1 (%p33_p0), %v1576_v62 }
  0xba   : > { %v563_v1 = vpop.f32.mrf.mxu2 }
  0xc2   : > { %v537_v3 = vpop.f32.mrf.mxu0  ;;  %v565_v7 = vpop.f32.mrf.mxu2 }
  0xc3   : > { %v550_v4 = vpop.f32.mrf.mxu1  ;;  %v538_v5 = vadd.f32 %v537_v3, %v525_v2  ;;  %v1592_v2 = vld [vmem:[%s1981_s5 + $0xd0] sm:$0xff] (%p33_p0) }
  0xc5   : > { %v551_v6 = vadd.f32 %v550_v4, %v538_v5  ;;  %v1567_v5 = vld [vmem:[%s1981_s5 + $0x8] sm:$0xff] (%p33_p0) }
  0xc7   : > { %v564_v8 = vadd.f32 %v563_v1, %v551_v6  ;;  %v1584_v1 = vld [vmem:[%s1981_s5 + $0x90] sm:$0xff] (%p33_p0)  ;;  %v1575_v6 = vld [vmem:[%s1981_s5 + $0x48] sm:$0xff] (%p33_p0) }
  0xc8   :  { %1046 = vmatpush.bf16.msra.mxu1 (%p33_p0), %v1575_v6 }
  0xc9   : > { %v567_v9 = vmul.f32 0.2, %v564_v8 }
  0xca   : > { %v539_v10 = vpop.f32.mrf.mxu0 }
  0xcb   : > { %v552_v11 = vpop.f32.mrf.mxu1  ;;  %v568_v12 = vmax.f32 %v564_v8, %v567_v9  ;;  %v1583_v9 = vld [vmem:[%s1981_s5 + $0x88] sm:$0xff] (%p33_p0) }
  0xcc   :  { %v1591_v10 = vld [vmem:[%s1981_s5 + $0xc8] sm:$0xff] (%p33_p0) }
  0xcd   : > { %v573_v13 = vpack.c.bf16 %v568_v12, %v568_v12 }
  0xcf   : > { %1366 = vmatmul.msk.bf16.vlgmr.msrb.gmra.mxu3 %vm673_vm1, %v573_v13  ;;  %1367 = vmatmul.msk.bf16.vlgmr.msra.gmra.mxu2 %vm673_vm1, %v573_v13 }
  0xd0   : > { %1369 = vmatmul.msk.bf16.vlgmr.msra.gmra.mxu0 %vm673_vm1, %v573_v13  ;;  %1053 = vmatpush.bf16.msra.mxu2 (%p33_p0), %v1589_v32 }
  0xd1   :  { %1027 = vmatpush.bf16.msra.mxu0 (%p33_p0), %v1573_v30 }
  0xd4   :  { %1054 = vmatpush.bf16.msra.mxu2 (%p33_p0), %v1588_v36 }
  0xd5   :  { %1028 = vmatpush.bf16.msra.mxu0 (%p33_p0), %v1572_v34 }
  0xd8   :  { %1055 = vmatpush.bf16.msra.mxu2 (%p33_p0), %v1587_v40 }
  0xd9   :  { %1029 = vmatpush.bf16.msra.mxu0 (%p33_p0), %v1571_v38 }
  0xdc   :  { %1056 = vmatpush.bf16.msra.mxu2 (%p33_p0), %v1586_v44 }
  0xdd   :  { %1030 = vmatpush.bf16.msra.mxu0 (%p33_p0), %v1570_v42 }
  0xdf   : > { %1368 = vmatmul.msk.bf16.vlgmr.msra.gmra.mxu3 %vm673_vm1, %v573_v13  ;;  %v1566_v13 = vld [vmem:[%s1981_s5] sm:$0xff] (%p33_p0) }
  0xe0   :  { %1066 = vmatpush.bf16.msra.mxu3 (%p33_p0), %v1597_v33  ;;  %1057 = vmatpush.bf16.msra.mxu2 (%p33_p0), %v1585_v51 }
  0xe1   :  { %1031 = vmatpush.bf16.msra.mxu0 (%p33_p0), %v1569_v47 }
  0xe4   :  { %1067 = vmatpush.bf16.msra.mxu3 (%p33_p0), %v1596_v37  ;;  %1058 = vmatpush.bf16.msra.mxu2 (%p33_p0), %v1584_v1 }
  0xe5   :  { %1032 = vmatpush.bf16.msra.mxu0 (%p33_p0), %v1568_v61 }
  0xe8   :  { %1068 = vmatpush.bf16.msra.mxu3 (%p33_p0), %v1595_v41  ;;  %1059 = vmatpush.bf16.msra.mxu2 (%p33_p0), %v1583_v9 }
  0xe9   :  { %1033 = vmatpush.bf16.msra.mxu0 (%p33_p0), %v1567_v5 }
  0xec   :  { %1069 = vmatpush.bf16.msra.mxu3 (%p33_p0), %v1594_v45 }
  0xed   :  { %1034 = vmatpush.bf16.msra.mxu0 (%p33_p0), %v1566_v13 }
  0xf0   :  { %1070 = vmatpush.bf16.msra.mxu3 (%p33_p0), %v1593_v56 }
  0xf4   :  { %1071 = vmatpush.bf16.msra.mxu3 (%p33_p0), %v1592_v2 }
  0xf8   :  { %1072 = vmatpush.bf16.msra.mxu3 (%p33_p0), %v1591_v10 }
 0x14d   : > { %v725_v15 = vpop.f32.mrf.mxu0 }
 0x14e   : > { %v732_v16 = vadd.f32 %v725_v15, %v572_v14  ;;  %v1574_v14 = vld [vmem:[%s1981_s5 + $0x40] sm:$0xff] (%p33_p0) }
 0x14f   :  { %1047 = vmatpush.bf16.msra.mxu1 (%p33_p0), %v1574_v14 }
 0x150   : > { %736 = vst [vmem:[#allocation2 + $0x8] sm:$0xff] %v732_v16 }
 0x152   : > { %v686_v19 = vpop.f32.mrf.mxu3  ;;  %v699_v20 = vpop.f32.mrf.mxu2 }
 0x153   : > { %v729_v21 = vadd.f32 %v686_v19, %v569_v17  ;;  %v730_v22 = vadd.f32 %v699_v20, %v570_v18  ;;  %v1582_v17 = vld [vmem:[%s1981_s5 + $0x80] sm:$0xff] (%p33_p0) }
 0x154   :  { %v1590_v18 = vld [vmem:[%s1981_s5 + $0xc0] sm:$0xff] (%p33_p0)  ;;  %1060 = vmatpush.bf16.msra.mxu2 (%p33_p0), %v1582_v17 }
 0x155   : > { %733 = vst [vmem:[#allocation2 + $0x10] sm:$0xff] %v729_v21  ;;  %v727_v23 = vpop.f32.mrf.mxu0  ;;  %1073 = vmatpush.bf16.msra.mxu3 (%p33_p0), %v1590_v18 }
 0x156   : > { %734 = vst [vmem:[#allocation2] sm:$0xff] %v730_v22  ;;  %v1608_v23 = vld [vmem:[%s1982_s6] ss:$0 sm:$0xff] (%p33_p0) }
 0x157   :  { %v740_v58 = vld [vmem:[#allocation2 + $0x8] sm:$0xff] (%p33_p0) }
 0x158   :  { %v754_v0 = vadd.f32 (%p33_p0), %v746_v55, %v740_v58 }
 0x15a   : > { %v688_v24 = vpop.f32.mrf.mxu3  ;;  %v701_v25 = vpop.f32.mrf.mxu2  ;;  %v758_v8 = vmul.f32 (%p33_p0), 0.2, %v754_v0 }
 0x15c   :  { %v737_v52 = vld [vmem:[#allocation2 + $0x10] sm:$0xff] (%p33_p0)  ;;  %v762_v16 = vmax.f32 (%p33_p0), %v754_v0, %v758_v8 }
 0x15d   :  { %v738_v53 = vld [vmem:[#allocation2] sm:$0xff] (%p33_p0)  ;;  %v751_v59 = vadd.f32 (%p33_p0), %v743_v49, %v737_v52 }
 0x15e   :  { %v752_v60 = vadd.f32 (%p33_p0), %v744_v50, %v738_v53  ;;  %v766_v22 = vpack.c.bf16 (%p33_p0), %v762_v16, %v762_v16 }
 0x15f   :  { %v755_v3 = vmul.f32 (%p33_p0), 0.2, %v751_v59 }
 0x160   :  { %v756_v4 = vmul.f32 (%p33_p0), 0.2, %v752_v60  ;;  %1074 = vmatmul.bf16.vlgmr.msra.gmra.mxu3 (%p33_p0), %v766_v22 }
 0x161   :  { %v759_v11 = vmax.f32 (%p33_p0), %v751_v59, %v755_v3 }
 0x162   : > { %v712_v27 = vpop.f32.mrf.mxu3  ;;  %v760_v12 = vmax.f32 (%p33_p0), %v752_v60, %v756_v4 }
 0x163   : > { %v731_v28 = vadd.f32 %v712_v27, %v571_v26  ;;  %v763_v19 = vpack.c.bf16 (%p33_p0), %v759_v11, %v759_v11 }
 0x164   :  { %v764_v20 = vpack.c.bf16 (%p33_p0), %v760_v12, %v760_v12 }
 0x165   : > { %735 = vst [vmem:[#allocation2 + $0x18] sm:$0xff] %v731_v28  ;;  %1035 = vmatmul.bf16.vlgmr.msra.gmra.mxu0 (%p33_p0), %v763_v19 }
 0x166   :  { %35 = sbr.rel (!%p33_p0) target bundleno = 5 (0x5), region = 57  ;;  %1048 = vmatmul.bf16.vlgmr.msra.gmra.mxu1 (%p33_p0), %v764_v20 }
 0x16a   : > { %v714_v29 = vpop.f32.mrf.mxu3 }
 0x16c   :  { %v739_v57 = vld [vmem:[#allocation2 + $0x18] sm:$0xff] }
 0x16d   :  { %v753_v63 = vadd.f32 %v745_v54, %v739_v57 }
 0x16f   :  { %v757_v7 = vmul.f32 0.2, %v753_v63 }
 0x171   :  { %v761_v15 = vmax.f32 %v753_v63, %v757_v7 }
 0x173   :  { %v765_v21 = vpack.c.bf16 %v761_v15, %v761_v15 }
 0x175   :  { %1061 = vmatmul.bf16.vlgmr.msra.gmra.mxu2 %v765_v21 }
 0x1e2   :  { %v1036_v24 = vpop.f32.mrf.mxu0 }
 0x1e3   :  { %v1049_v25 = vpop.f32.mrf.mxu1  ;;  %v1037_v26 = vadd.f32 %v1608_v23, %v1036_v24  ;;  %v1075_v29 = vpop.f32.mrf.mxu3 }
 0x1e5   :  { %v1050_v27 = vadd.f32 %v1049_v25, %v1037_v26 }
 0x1ea   :  { %v1038_v31 = vpop.f32.mrf.mxu0 }
 0x1eb   :  { %v1051_v32 = vpop.f32.mrf.mxu1  ;;  %v1077_v37 = vpop.f32.mrf.mxu3 }
 0x1f8   :  { %v1062_v28 = vpop.f32.mrf.mxu2 }
 0x1f9   :  { %v1063_v30 = vadd.f32 %v1062_v28, %v1050_v27 }
 0x1fb   :  { %v1076_v33 = vadd.f32 %v1075_v29, %v1063_v30 }
 0x1fd   :  { %v1079_v34 = vsub.f32 0.0, %v1076_v33 }
 0x1ff   :  { %v1080_v35 = vmul.f32 1.442695, %v1079_v34 }
 0x200   :  { %v1064_v36 = vpop.f32.mrf.mxu2 }
 0x201   :  { %1609 = vpow2.f32 %v1080_v35 }
 0x207   :  { %v1610_v38 = vpop.eup %1609 }
 0x208   :  { %v1082_v39 = vadd.f32 1.0, %v1610_v38 }
 0x20a   :  { %1611 = vrcp.f32 %v1082_v39 }
 0x210   :  { %v1612_v40 = vpop.eup %1611 }
 0x211   :  { %1084 = vst [vmem:[%s1983_s7] sm:$0xff] %v1612_v40 }

</bundles_post_ra>
